<compile_context>
chip_gen: v6e
topology: v6e:2x2x1
jax: 0.10.0
libtpu: 0.0.40
codegen_flags: <defaults>
</compile_context>

<pallas_src>
import jax
import jax.numpy as jnp
from jax import lax
from jax.experimental import pallas as pl
from jax.experimental.pallas import tpu as pltpu

KSIZE = 7
PAD = KSIZE // 2
LANES = 128


def _round_up(x, m):
    return (x + m - 1) // m * m


def spatial_attention_kernel(w_ref, x_ref, o_ref, pad_ref):
    # w_ref   : SMEM (2*7*7,)          flattened conv weight, order (in_ch, kh, kw)
    # x_ref   : VMEM (B, C, H, W)      input tile (B batch elements per grid step)
    # o_ref   : VMEM (B, H, WS)        lane-padded output tile (WS = round_up(W+6,128))
    # pad_ref : VMEM (2, H+2*PAD, WS)  zero-padded [avg, max] scratch
    B, C, H, W = x_ref.shape
    WS = pad_ref.shape[2]

    # Re-zero the scratch each step.  On the lane-dense (.., 128) scratch this is
    # just a handful of full-width vector stores.  Doing it unconditionally
    # (instead of @pl.when(program_id == 0)) keeps the kernel correct when the
    # "parallel" grid axis is split across TensorCores, where a core that never
    # executes step 0 would otherwise run on an un-zeroed scratch.
    pad_ref[...] = jnp.zeros_like(pad_ref)

    # Channel reduce in f32 (C is small; the block DMA dominates this anyway).
    x = x_ref[...].astype(jnp.float32)                 # (B, C, H, W)
    avg = jnp.mean(x, axis=1)                          # (B, H, W)
    mx = jnp.max(x, axis=1)                            # (B, H, W)

    # Hoist the 2*49 SMEM scalar weight reads out of the per-batch loop.
    wv = [w_ref[i] for i in range(2 * KSIZE * KSIZE)]

    for b in range(B):
        # Write the two feature maps into the interior of the padded scratch.
        # Lane offset is 0 (aligned); only the sublane offset is PAD.  The
        # border rows and the columns [W, WS) stay zero.
        pad_ref[0, PAD:PAD + H, 0:W] = avg[b]
        pad_ref[1, PAD:PAD + H, 0:W] = mx[b]

        acc = jnp.zeros((H, WS), jnp.float32)
        for c in range(2):
            plane = pad_ref[c]                         # (H + 2*PAD, WS)
            for dx in range(KSIZE):
                # One lane rotation per (c, dx).  Elements that would read
                # outside [0, W) wrap into the zero columns, so zero padding
                # along W is implicit.
                shift = (PAD - dx) % WS
                shifted = pltpu.roll(plane, shift, axis=1) if shift else plane
                for dy in range(KSIZE):
                    w = wv[c * KSIZE * KSIZE + dy * KSIZE + dx]
                    # Sublane-only slice; full 128-lane VALU MAC.
                    acc = acc + w * shifted[dy:dy + H, :]

        # Exact sigmoid (exp runs on the EUP).  Lanes >= W hold junk and are
        # sliced off in the wrapper; the store itself is a full-lane vst.
        o_ref[b] = (1.0 / (1.0 + jnp.exp(-acc))).astype(o_ref.dtype)


def spatial_attention(x, w, *, b_tile=None):
    """x: (N, C, H, W) float; w: (1, 2, 7, 7) conv weight (OIHW), no bias.

    Returns sigmoid(conv2d(concat([mean_c(x), max_c(x)], 1), w, padding=3)),
    shape (N, 1, H, W) -- the PyTorch SpatialAttention forward.
    """
    N, C, H, W = x.shape
    WS = _round_up(W + 2 * PAD, LANES)      # lane-dense scratch / output width

    if b_tile is None:
        # Few, fat grid steps for small batches; set b_tile=1 to expose batch
        # parallelism across TensorCores instead.
        b_tile = next(t for t in (8, 4, 2, 1) if N % t == 0)
    assert N % b_tile == 0

    w_flat = w.reshape(-1).astype(jnp.float32)          # (2*49,) -> SMEM scalars

    out_padded = pl.pallas_call(
        spatial_attention_kernel,
        out_shape=jax.ShapeDtypeStruct((N, H, WS), x.dtype),
        grid_spec=pltpu.PrefetchScalarGridSpec(
            num_scalar_prefetch=0,
            grid=(N // b_tile,),
            in_specs=[
                pl.BlockSpec(memory_space=pltpu.MemorySpace.SMEM),        # weights
                pl.BlockSpec((b_tile, C, H, W), lambda n: (n, 0, 0, 0)),  # x tile
            ],
            out_specs=pl.BlockSpec((b_tile, H, WS), lambda n: (n, 0, 0)),
            scratch_shapes=[
                pltpu.VMEM((2, H + 2 * PAD, WS), jnp.float32),
            ],
        ),
        compiler_params=pltpu.CompilerParams(
            dimension_semantics=("parallel",),
        ),
    )(w_flat, x)

    # Drop the lane padding and restore the NCHW (N, 1, H, W) shape (cheap XLA).
    return out_padded[:, :, :W].reshape(N, 1, H, W)


def reference(x, w):
    """Pure-JAX reference matching the PyTorch module semantics."""
    avg = jnp.mean(x, axis=1, keepdims=True)
    mx = jnp.max(x, axis=1, keepdims=True)
    feat = jnp.concatenate([avg, mx], axis=1)           # (N, 2, H, W)
    out = lax.conv_general_dilated(
        feat, w, window_strides=(1, 1),
        padding=[(PAD, PAD), (PAD, PAD)],
        dimension_numbers=("NCHW", "OIHW", "NCHW"))
    return jax.nn.sigmoid(out)


if __name__ == "__main__":
    key = jax.random.PRNGKey(0)
    kx, kw = jax.random.split(key)

    N, C, H, W = 2, 4, 16, 16
    x = jax.random.normal(kx, (N, C, H, W), dtype=jnp.float32)

    # Deterministic Conv2d(2, 1, 7, bias=False) weight init (uniform, kaiming-style bound).
    fan_in = 2 * KSIZE * KSIZE
    bound = (1.0 / fan_in) ** 0.5
    w = jax.random.uniform(kw, (1, 2, KSIZE, KSIZE), jnp.float32, -bound, bound)

    out = spatial_attention(x, w)
    out = jax.block_until_ready(out)

    ref = reference(x, w)
    assert out.shape == (N, 1, H, W)
    assert jnp.allclose(out, ref, atol=1e-5, rtol=1e-5), "mismatch vs JAX reference"

    print("KERNEL_OK")
</pallas_src>

<mosaic_0001>
module attributes {stable_mosaic.version = 11 : i64} {
  func.func @spatial_attention_kernel(%arg0: i32, %arg1: memref<98xf32, #tpu.memory_space<smem>>, %arg2: memref<2x4x16x16xf32, #tpu.memory_space<vmem>>, %arg3: memref<2x16x128xf32, #tpu.memory_space<vmem>>, %arg4: memref<2x22x128xf32, #tpu.memory_space<vmem>>) attributes {dimension_semantics = [#tpu.dimension_semantics<parallel>], iteration_bounds = array<i64: 1>, scalar_prefetch = 0 : i64, scratch_operands = 1 : i64, tpu.core_type = #tpu.core_type<tc>, window_params = [{transform_indices = @transform_0, window_bounds = array<i64: 98>}, {transform_indices = @transform_1, window_bounds = array<i64: 2, 4, 16, 16>}, {transform_indices = @transform_2, window_bounds = array<i64: 2, 16, 128>}]} {
    %cst = arith.constant 0.000000e+00 : f32
    %0 = vector.broadcast %cst : f32 to vector<2x22x128xf32>
    %c0 = arith.constant 0 : index
    %c0_0 = arith.constant 0 : index
    %c0_1 = arith.constant 0 : index
    %1 = vector.load %arg4[%c0, %c0_0, %c0_1] : memref<2x22x128xf32, #tpu.memory_space<vmem>>, vector<2x22x128xf32>
    tpu.vector_store %arg4[%c0, %c0_0, %c0_1], %0 {strides = array<i32>} : memref<2x22x128xf32, #tpu.memory_space<vmem>>, vector<2x22x128xf32>,
    %c0_2 = arith.constant 0 : index
    %c0_3 = arith.constant 0 : index
    %c0_4 = arith.constant 0 : index
    %c0_5 = arith.constant 0 : index
    %2 = vector.load %arg2[%c0_2, %c0_3, %c0_4, %c0_5] : memref<2x4x16x16xf32, #tpu.memory_space<vmem>>, vector<2x4x16x16xf32>
    %cst_6 = arith.constant dense<0.000000e+00> : vector<2x16x16xf32>
    %3 = vector.multi_reduction <add>, %2, %cst_6 [1] : vector<2x4x16x16xf32> to vector<2x16x16xf32>
    %cst_7 = arith.constant 4.000000e+00 : f32
    %4 = vector.broadcast %cst_7 : f32 to vector<2x16x16xf32>
    %5 = arith.divf %3, %4 : vector<2x16x16xf32>
    %cst_8 = arith.constant dense<0xFF800000> : vector<2x16x16xf32>
    %6 = vector.multi_reduction <maximumf>, %2, %cst_8 [1] : vector<2x4x16x16xf32> to vector<2x16x16xf32>
    %c0_9 = arith.constant 0 : index
    %7 = memref.load %arg1[%c0_9] : memref<98xf32, #tpu.memory_space<smem>>
    %c1 = arith.constant 1 : index
    %8 = memref.load %arg1[%c1] : memref<98xf32, #tpu.memory_space<smem>>
    %c2 = arith.constant 2 : index
    %9 = memref.load %arg1[%c2] : memref<98xf32, #tpu.memory_space<smem>>
    %c3 = arith.constant 3 : index
    %10 = memref.load %arg1[%c3] : memref<98xf32, #tpu.memory_space<smem>>
    %c4 = arith.constant 4 : index
    %11 = memref.load %arg1[%c4] : memref<98xf32, #tpu.memory_space<smem>>
    %c5 = arith.constant 5 : index
    %12 = memref.load %arg1[%c5] : memref<98xf32, #tpu.memory_space<smem>>
    %c6 = arith.constant 6 : index
    %13 = memref.load %arg1[%c6] : memref<98xf32, #tpu.memory_space<smem>>
    %c7 = arith.constant 7 : index
    %14 = memref.load %arg1[%c7] : memref<98xf32, #tpu.memory_space<smem>>
    %c8 = arith.constant 8 : index
    %15 = memref.load %arg1[%c8] : memref<98xf32, #tpu.memory_space<smem>>
    %c9 = arith.constant 9 : index
    %16 = memref.load %arg1[%c9] : memref<98xf32, #tpu.memory_space<smem>>
    %c10 = arith.constant 10 : index
    %17 = memref.load %arg1[%c10] : memref<98xf32, #tpu.memory_space<smem>>
    %c11 = arith.constant 11 : index
    %18 = memref.load %arg1[%c11] : memref<98xf32, #tpu.memory_space<smem>>
    %c12 = arith.constant 12 : index
    %19 = memref.load %arg1[%c12] : memref<98xf32, #tpu.memory_space<smem>>
    %c13 = arith.constant 13 : index
    %20 = memref.load %arg1[%c13] : memref<98xf32, #tpu.memory_space<smem>>
    %c14 = arith.constant 14 : index
    %21 = memref.load %arg1[%c14] : memref<98xf32, #tpu.memory_space<smem>>
    %c15 = arith.constant 15 : index
    %22 = memref.load %arg1[%c15] : memref<98xf32, #tpu.memory_space<smem>>
    %c16 = arith.constant 16 : index
    %23 = memref.load %arg1[%c16] : memref<98xf32, #tpu.memory_space<smem>>
    %c17 = arith.constant 17 : index
    %24 = memref.load %arg1[%c17] : memref<98xf32, #tpu.memory_space<smem>>
    %c18 = arith.constant 18 : index
    %25 = memref.load %arg1[%c18] : memref<98xf32, #tpu.memory_space<smem>>
    %c19 = arith.constant 19 : index
    %26 = memref.load %arg1[%c19] : memref<98xf32, #tpu.memory_space<smem>>
    %c20 = arith.constant 20 : index
    %27 = memref.load %arg1[%c20] : memref<98xf32, #tpu.memory_space<smem>>
    %c21 = arith.constant 21 : index
    %28 = memref.load %arg1[%c21] : memref<98xf32, #tpu.memory_space<smem>>
    %c22 = arith.constant 22 : index
    %29 = memref.load %arg1[%c22] : memref<98xf32, #tpu.memory_space<smem>>
    %c23 = arith.constant 23 : index
    %30 = memref.load %arg1[%c23] : memref<98xf32, #tpu.memory_space<smem>>
    %c24 = arith.constant 24 : index
    %31 = memref.load %arg1[%c24] : memref<98xf32, #tpu.memory_space<smem>>
    %c25 = arith.constant 25 : index
    %32 = memref.load %arg1[%c25] : memref<98xf32, #tpu.memory_space<smem>>
    %c26 = arith.constant 26 : index
    %33 = memref.load %arg1[%c26] : memref<98xf32, #tpu.memory_space<smem>>
    %c27 = arith.constant 27 : index
    %34 = memref.load %arg1[%c27] : memref<98xf32, #tpu.memory_space<smem>>
    %c28 = arith.constant 28 : index
    %35 = memref.load %arg1[%c28] : memref<98xf32, #tpu.memory_space<smem>>
    %c29 = arith.constant 29 : index
    %36 = memref.load %arg1[%c29] : memref<98xf32, #tpu.memory_space<smem>>
    %c30 = arith.constant 30 : index
    %37 = memref.load %arg1[%c30] : memref<98xf32, #tpu.memory_space<smem>>
    %c31 = arith.constant 31 : index
    %38 = memref.load %arg1[%c31] : memref<98xf32, #tpu.memory_space<smem>>
    %c32 = arith.constant 32 : index
    %39 = memref.load %arg1[%c32] : memref<98xf32, #tpu.memory_space<smem>>
    %c33 = arith.constant 33 : index
    %40 = memref.load %arg1[%c33] : memref<98xf32, #tpu.memory_space<smem>>
    %c34 = arith.constant 34 : index
    %41 = memref.load %arg1[%c34] : memref<98xf32, #tpu.memory_space<smem>>
    %c35 = arith.constant 35 : index
    %42 = memref.load %arg1[%c35] : memref<98xf32, #tpu.memory_space<smem>>
    %c36 = arith.constant 36 : index
    %43 = memref.load %arg1[%c36] : memref<98xf32, #tpu.memory_space<smem>>
    %c37 = arith.constant 37 : index
    %44 = memref.load %arg1[%c37] : memref<98xf32, #tpu.memory_space<smem>>
    %c38 = arith.constant 38 : index
    %45 = memref.load %arg1[%c38] : memref<98xf32, #tpu.memory_space<smem>>
    %c39 = arith.constant 39 : index
    %46 = memref.load %arg1[%c39] : memref<98xf32, #tpu.memory_space<smem>>
    %c40 = arith.constant 40 : index
    %47 = memref.load %arg1[%c40] : memref<98xf32, #tpu.memory_space<smem>>
    %c41 = arith.constant 41 : index
    %48 = memref.load %arg1[%c41] : memref<98xf32, #tpu.memory_space<smem>>
    %c42 = arith.constant 42 : index
    %49 = memref.load %arg1[%c42] : memref<98xf32, #tpu.memory_space<smem>>
    %c43 = arith.constant 43 : index
    %50 = memref.load %arg1[%c43] : memref<98xf32, #tpu.memory_space<smem>>
    %c44 = arith.constant 44 : index
    %51 = memref.load %arg1[%c44] : memref<98xf32, #tpu.memory_space<smem>>
    %c45 = arith.constant 45 : index
    %52 = memref.load %arg1[%c45] : memref<98xf32, #tpu.memory_space<smem>>
    %c46 = arith.constant 46 : index
    %53 = memref.load %arg1[%c46] : memref<98xf32, #tpu.memory_space<smem>>
    %c47 = arith.constant 47 : index
    %54 = memref.load %arg1[%c47] : memref<98xf32, #tpu.memory_space<smem>>
    %c48 = arith.constant 48 : index
    %55 = memref.load %arg1[%c48] : memref<98xf32, #tpu.memory_space<smem>>
    %c49 = arith.constant 49 : index
    %56 = memref.load %arg1[%c49] : memref<98xf32, #tpu.memory_space<smem>>
    %c50 = arith.constant 50 : index
    %57 = memref.load %arg1[%c50] : memref<98xf32, #tpu.memory_space<smem>>
    %c51 = arith.constant 51 : index
    %58 = memref.load %arg1[%c51] : memref<98xf32, #tpu.memory_space<smem>>
    %c52 = arith.constant 52 : index
    %59 = memref.load %arg1[%c52] : memref<98xf32, #tpu.memory_space<smem>>
    %c53 = arith.constant 53 : index
    %60 = memref.load %arg1[%c53] : memref<98xf32, #tpu.memory_space<smem>>
    %c54 = arith.constant 54 : index
    %61 = memref.load %arg1[%c54] : memref<98xf32, #tpu.memory_space<smem>>
    %c55 = arith.constant 55 : index
    %62 = memref.load %arg1[%c55] : memref<98xf32, #tpu.memory_space<smem>>
    %c56 = arith.constant 56 : index
    %63 = memref.load %arg1[%c56] : memref<98xf32, #tpu.memory_space<smem>>
    %c57 = arith.constant 57 : index
    %64 = memref.load %arg1[%c57] : memref<98xf32, #tpu.memory_space<smem>>
    %c58 = arith.constant 58 : index
    %65 = memref.load %arg1[%c58] : memref<98xf32, #tpu.memory_space<smem>>
    %c59 = arith.constant 59 : index
    %66 = memref.load %arg1[%c59] : memref<98xf32, #tpu.memory_space<smem>>
    %c60 = arith.constant 60 : index
    %67 = memref.load %arg1[%c60] : memref<98xf32, #tpu.memory_space<smem>>
    %c61 = arith.constant 61 : index
    %68 = memref.load %arg1[%c61] : memref<98xf32, #tpu.memory_space<smem>>
    %c62 = arith.constant 62 : index
    %69 = memref.load %arg1[%c62] : memref<98xf32, #tpu.memory_space<smem>>
    %c63 = arith.constant 63 : index
    %70 = memref.load %arg1[%c63] : memref<98xf32, #tpu.memory_space<smem>>
    %c64 = arith.constant 64 : index
    %71 = memref.load %arg1[%c64] : memref<98xf32, #tpu.memory_space<smem>>
    %c65 = arith.constant 65 : index
    %72 = memref.load %arg1[%c65] : memref<98xf32, #tpu.memory_space<smem>>
    %c66 = arith.constant 66 : index
    %73 = memref.load %arg1[%c66] : memref<98xf32, #tpu.memory_space<smem>>
    %c67 = arith.constant 67 : index
    %74 = memref.load %arg1[%c67] : memref<98xf32, #tpu.memory_space<smem>>
    %c68 = arith.constant 68 : index
    %75 = memref.load %arg1[%c68] : memref<98xf32, #tpu.memory_space<smem>>
    %c69 = arith.constant 69 : index
    %76 = memref.load %arg1[%c69] : memref<98xf32, #tpu.memory_space<smem>>
    %c70 = arith.constant 70 : index
    %77 = memref.load %arg1[%c70] : memref<98xf32, #tpu.memory_space<smem>>
    %c71 = arith.constant 71 : index
    %78 = memref.load %arg1[%c71] : memref<98xf32, #tpu.memory_space<smem>>
    %c72 = arith.constant 72 : index
    %79 = memref.load %arg1[%c72] : memref<98xf32, #tpu.memory_space<smem>>
    %c73 = arith.constant 73 : index
    %80 = memref.load %arg1[%c73] : memref<98xf32, #tpu.memory_space<smem>>
    %c74 = arith.constant 74 : index
    %81 = memref.load %arg1[%c74] : memref<98xf32, #tpu.memory_space<smem>>
    %c75 = arith.constant 75 : index
    %82 = memref.load %arg1[%c75] : memref<98xf32, #tpu.memory_space<smem>>
    %c76 = arith.constant 76 : index
    %83 = memref.load %arg1[%c76] : memref<98xf32, #tpu.memory_space<smem>>
    %c77 = arith.constant 77 : index
    %84 = memref.load %arg1[%c77] : memref<98xf32, #tpu.memory_space<smem>>
    %c78 = arith.constant 78 : index
    %85 = memref.load %arg1[%c78] : memref<98xf32, #tpu.memory_space<smem>>
    %c79 = arith.constant 79 : index
    %86 = memref.load %arg1[%c79] : memref<98xf32, #tpu.memory_space<smem>>
    %c80 = arith.constant 80 : index
    %87 = memref.load %arg1[%c80] : memref<98xf32, #tpu.memory_space<smem>>
    %c81 = arith.constant 81 : index
    %88 = memref.load %arg1[%c81] : memref<98xf32, #tpu.memory_space<smem>>
    %c82 = arith.constant 82 : index
    %89 = memref.load %arg1[%c82] : memref<98xf32, #tpu.memory_space<smem>>
    %c83 = arith.constant 83 : index
    %90 = memref.load %arg1[%c83] : memref<98xf32, #tpu.memory_space<smem>>
    %c84 = arith.constant 84 : index
    %91 = memref.load %arg1[%c84] : memref<98xf32, #tpu.memory_space<smem>>
    %c85 = arith.constant 85 : index
    %92 = memref.load %arg1[%c85] : memref<98xf32, #tpu.memory_space<smem>>
    %c86 = arith.constant 86 : index
    %93 = memref.load %arg1[%c86] : memref<98xf32, #tpu.memory_space<smem>>
    %c87 = arith.constant 87 : index
    %94 = memref.load %arg1[%c87] : memref<98xf32, #tpu.memory_space<smem>>
    %c88 = arith.constant 88 : index
    %95 = memref.load %arg1[%c88] : memref<98xf32, #tpu.memory_space<smem>>
    %c89 = arith.constant 89 : index
    %96 = memref.load %arg1[%c89] : memref<98xf32, #tpu.memory_space<smem>>
    %c90 = arith.constant 90 : index
    %97 = memref.load %arg1[%c90] : memref<98xf32, #tpu.memory_space<smem>>
    %c91 = arith.constant 91 : index
    %98 = memref.load %arg1[%c91] : memref<98xf32, #tpu.memory_space<smem>>
    %c92 = arith.constant 92 : index
    %99 = memref.load %arg1[%c92] : memref<98xf32, #tpu.memory_space<smem>>
    %c93 = arith.constant 93 : index
    %100 = memref.load %arg1[%c93] : memref<98xf32, #tpu.memory_space<smem>>
    %c94 = arith.constant 94 : index
    %101 = memref.load %arg1[%c94] : memref<98xf32, #tpu.memory_space<smem>>
    %c95 = arith.constant 95 : index
    %102 = memref.load %arg1[%c95] : memref<98xf32, #tpu.memory_space<smem>>
    %c96 = arith.constant 96 : index
    %103 = memref.load %arg1[%c96] : memref<98xf32, #tpu.memory_space<smem>>
    %c97 = arith.constant 97 : index
    %104 = memref.load %arg1[%c97] : memref<98xf32, #tpu.memory_space<smem>>
    %105 = vector.extract_strided_slice %5 {offsets = [0, 0, 0], sizes = [1, 16, 16], strides = [1, 1, 1]} : vector<2x16x16xf32> to vector<1x16x16xf32>
    %106 = vector.shape_cast %105 : vector<1x16x16xf32> to vector<16x16xf32>
    %c0_10 = arith.constant 0 : index
    %c3_11 = arith.constant 3 : index
    %c0_12 = arith.constant 0 : index
    %107 = vector.load %arg4[%c0_10, %c3_11, %c0_12] : memref<2x22x128xf32, #tpu.memory_space<vmem>>, vector<1x16x16xf32>
    %108 = vector.shape_cast %107 : vector<1x16x16xf32> to vector<16x16xf32>
    %109 = vector.shape_cast %106 : vector<16x16xf32> to vector<1x16x16xf32>
    tpu.vector_store %arg4[%c0_10, %c3_11, %c0_12], %109 {strides = array<i32>} : memref<2x22x128xf32, #tpu.memory_space<vmem>>, vector<1x16x16xf32>,
    %110 = vector.extract_strided_slice %6 {offsets = [0, 0, 0], sizes = [1, 16, 16], strides = [1, 1, 1]} : vector<2x16x16xf32> to vector<1x16x16xf32>
    %111 = vector.shape_cast %110 : vector<1x16x16xf32> to vector<16x16xf32>
    %c1_13 = arith.constant 1 : index
    %c3_14 = arith.constant 3 : index
    %c0_15 = arith.constant 0 : index
    %112 = vector.load %arg4[%c1_13, %c3_14, %c0_15] : memref<2x22x128xf32, #tpu.memory_space<vmem>>, vector<1x16x16xf32>
    %113 = vector.shape_cast %112 : vector<1x16x16xf32> to vector<16x16xf32>
    %114 = vector.shape_cast %111 : vector<16x16xf32> to vector<1x16x16xf32>
    tpu.vector_store %arg4[%c1_13, %c3_14, %c0_15], %114 {strides = array<i32>} : memref<2x22x128xf32, #tpu.memory_space<vmem>>, vector<1x16x16xf32>,
    %cst_16 = arith.constant 0.000000e+00 : f32
    %115 = vector.broadcast %cst_16 : f32 to vector<16x128xf32>
    %c0_17 = arith.constant 0 : index
    %c0_18 = arith.constant 0 : index
    %c0_19 = arith.constant 0 : index
    %116 = vector.load %arg4[%c0_17, %c0_18, %c0_19] : memref<2x22x128xf32, #tpu.memory_space<vmem>>, vector<1x22x128xf32>
    %117 = vector.shape_cast %116 : vector<1x22x128xf32> to vector<22x128xf32>
    %c3_i32 = arith.constant 3 : i32
    %118 = tpu.dynamic_rotate %117 by %c3_i32 dim 1 : vector<22x128xf32>, i32 -> vector<22x128xf32>
    %119 = vector.extract_strided_slice %118 {offsets = [0, 0], sizes = [16, 128], strides = [1, 1]} : vector<22x128xf32> to vector<16x128xf32>
    %120 = vector.broadcast %7 : f32 to vector<16x128xf32>
    %121 = arith.mulf %120, %119 : vector<16x128xf32>
    %122 = arith.addf %115, %121 : vector<16x128xf32>
    %123 = vector.extract_strided_slice %118 {offsets = [1, 0], sizes = [16, 128], strides = [1, 1]} : vector<22x128xf32> to vector<16x128xf32>
    %124 = vector.broadcast %14 : f32 to vector<16x128xf32>
    %125 = arith.mulf %124, %123 : vector<16x128xf32>
    %126 = arith.addf %122, %125 : vector<16x128xf32>
    %127 = vector.extract_strided_slice %118 {offsets = [2, 0], sizes = [16, 128], strides = [1, 1]} : vector<22x128xf32> to vector<16x128xf32>
    %128 = vector.broadcast %21 : f32 to vector<16x128xf32>
    %129 = arith.mulf %128, %127 : vector<16x128xf32>
    %130 = arith.addf %126, %129 : vector<16x128xf32>
    %131 = vector.extract_strided_slice %118 {offsets = [3, 0], sizes = [16, 128], strides = [1, 1]} : vector<22x128xf32> to vector<16x128xf32>
    %132 = vector.broadcast %28 : f32 to vector<16x128xf32>
    %133 = arith.mulf %132, %131 : vector<16x128xf32>
    %134 = arith.addf %130, %133 : vector<16x128xf32>
    %135 = vector.extract_strided_slice %118 {offsets = [4, 0], sizes = [16, 128], strides = [1, 1]} : vector<22x128xf32> to vector<16x128xf32>
    %136 = vector.broadcast %35 : f32 to vector<16x128xf32>
    %137 = arith.mulf %136, %135 : vector<16x128xf32>
    %138 = arith.addf %134, %137 : vector<16x128xf32>
    %139 = vector.extract_strided_slice %118 {offsets = [5, 0], sizes = [16, 128], strides = [1, 1]} : vector<22x128xf32> to vector<16x128xf32>
    %140 = vector.broadcast %42 : f32 to vector<16x128xf32>
    %141 = arith.mulf %140, %139 : vector<16x128xf32>
    %142 = arith.addf %138, %141 : vector<16x128xf32>
    %143 = vector.extract_strided_slice %118 {offsets = [6, 0], sizes = [16, 128], strides = [1, 1]} : vector<22x128xf32> to vector<16x128xf32>
    %144 = vector.broadcast %49 : f32 to vector<16x128xf32>
    %145 = arith.mulf %144, %143 : vector<16x128xf32>
    %146 = arith.addf %142, %145 : vector<16x128xf32>
    %c2_i32 = arith.constant 2 : i32
    %147 = tpu.dynamic_rotate %117 by %c2_i32 dim 1 : vector<22x128xf32>, i32 -> vector<22x128xf32>
    %148 = vector.extract_strided_slice %147 {offsets = [0, 0], sizes = [16, 128], strides = [1, 1]} : vector<22x128xf32> to vector<16x128xf32>
    %149 = vector.broadcast %8 : f32 to vector<16x128xf32>
    %150 = arith.mulf %149, %148 : vector<16x128xf32>
    %151 = arith.addf %146, %150 : vector<16x128xf32>
    %152 = vector.extract_strided_slice %147 {offsets = [1, 0], sizes = [16, 128], strides = [1, 1]} : vector<22x128xf32> to vector<16x128xf32>
    %153 = vector.broadcast %15 : f32 to vector<16x128xf32>
    %154 = arith.mulf %153, %152 : vector<16x128xf32>
    %155 = arith.addf %151, %154 : vector<16x128xf32>
    %156 = vector.extract_strided_slice %147 {offsets = [2, 0], sizes = [16, 128], strides = [1, 1]} : vector<22x128xf32> to vector<16x128xf32>
    %157 = vector.broadcast %22 : f32 to vector<16x128xf32>
    %158 = arith.mulf %157, %156 : vector<16x128xf32>
    %159 = arith.addf %155, %158 : vector<16x128xf32>
    %160 = vector.extract_strided_slice %147 {offsets = [3, 0], sizes = [16, 128], strides = [1, 1]} : vector<22x128xf32> to vector<16x128xf32>
    %161 = vector.broadcast %29 : f32 to vector<16x128xf32>
    %162 = arith.mulf %161, %160 : vector<16x128xf32>
    %163 = arith.addf %159, %162 : vector<16x128xf32>
    %164 = vector.extract_strided_slice %147 {offsets = [4, 0], sizes = [16, 128], strides = [1, 1]} : vector<22x128xf32> to vector<16x128xf32>
    %165 = vector.broadcast %36 : f32 to vector<16x128xf32>
    %166 = arith.mulf %165, %164 : vector<16x128xf32>
    %167 = arith.addf %163, %166 : vector<16x128xf32>
    %168 = vector.extract_strided_slice %147 {offsets = [5, 0], sizes = [16, 128], strides = [1, 1]} : vector<22x128xf32> to vector<16x128xf32>
    %169 = vector.broadcast %43 : f32 to vector<16x128xf32>
    %170 = arith.mulf %169, %168 : vector<16x128xf32>
    %171 = arith.addf %167, %170 : vector<16x128xf32>
    %172 = vector.extract_strided_slice %147 {offsets = [6, 0], sizes = [16, 128], strides = [1, 1]} : vector<22x128xf32> to vector<16x128xf32>
    %173 = vector.broadcast %50 : f32 to vector<16x128xf32>
    %174 = arith.mulf %173, %172 : vector<16x128xf32>
    %175 = arith.addf %171, %174 : vector<16x128xf32>
    %c1_i32 = arith.constant 1 : i32
    %176 = tpu.dynamic_rotate %117 by %c1_i32 dim 1 : vector<22x128xf32>, i32 -> vector<22x128xf32>
    %177 = vector.extract_strided_slice %176 {offsets = [0, 0], sizes = [16, 128], strides = [1, 1]} : vector<22x128xf32> to vector<16x128xf32>
    %178 = vector.broadcast %9 : f32 to vector<16x128xf32>
    %179 = arith.mulf %178, %177 : vector<16x128xf32>
    %180 = arith.addf %175, %179 : vector<16x128xf32>
    %181 = vector.extract_strided_slice %176 {offsets = [1, 0], sizes = [16, 128], strides = [1, 1]} : vector<22x128xf32> to vector<16x128xf32>
    %182 = vector.broadcast %16 : f32 to vector<16x128xf32>
    %183 = arith.mulf %182, %181 : vector<16x128xf32>
    %184 = arith.addf %180, %183 : vector<16x128xf32>
    %185 = vector.extract_strided_slice %176 {offsets = [2, 0], sizes = [16, 128], strides = [1, 1]} : vector<22x128xf32> to vector<16x128xf32>
    %186 = vector.broadcast %23 : f32 to vector<16x128xf32>
    %187 = arith.mulf %186, %185 : vector<16x128xf32>
    %188 = arith.addf %184, %187 : vector<16x128xf32>
    %189 = vector.extract_strided_slice %176 {offsets = [3, 0], sizes = [16, 128], strides = [1, 1]} : vector<22x128xf32> to vector<16x128xf32>
    %190 = vector.broadcast %30 : f32 to vector<16x128xf32>
    %191 = arith.mulf %190, %189 : vector<16x128xf32>
    %192 = arith.addf %188, %191 : vector<16x128xf32>
    %193 = vector.extract_strided_slice %176 {offsets = [4, 0], sizes = [16, 128], strides = [1, 1]} : vector<22x128xf32> to vector<16x128xf32>
    %194 = vector.broadcast %37 : f32 to vector<16x128xf32>
    %195 = arith.mulf %194, %193 : vector<16x128xf32>
    %196 = arith.addf %192, %195 : vector<16x128xf32>
    %197 = vector.extract_strided_slice %176 {offsets = [5, 0], sizes = [16, 128], strides = [1, 1]} : vector<22x128xf32> to vector<16x128xf32>
    %198 = vector.broadcast %44 : f32 to vector<16x128xf32>
    %199 = arith.mulf %198, %197 : vector<16x128xf32>
    %200 = arith.addf %196, %199 : vector<16x128xf32>
    %201 = vector.extract_strided_slice %176 {offsets = [6, 0], sizes = [16, 128], strides = [1, 1]} : vector<22x128xf32> to vector<16x128xf32>
    %202 = vector.broadcast %51 : f32 to vector<16x128xf32>
    %203 = arith.mulf %202, %201 : vector<16x128xf32>
    %204 = arith.addf %200, %203 : vector<16x128xf32>
    %205 = vector.extract_strided_slice %117 {offsets = [0, 0], sizes = [16, 128], strides = [1, 1]} : vector<22x128xf32> to vector<16x128xf32>
    %206 = vector.broadcast %10 : f32 to vector<16x128xf32>
    %207 = arith.mulf %206, %205 : vector<16x128xf32>
    %208 = arith.addf %204, %207 : vector<16x128xf32>
    %209 = vector.extract_strided_slice %117 {offsets = [1, 0], sizes = [16, 128], strides = [1, 1]} : vector<22x128xf32> to vector<16x128xf32>
    %210 = vector.broadcast %17 : f32 to vector<16x128xf32>
    %211 = arith.mulf %210, %209 : vector<16x128xf32>
    %212 = arith.addf %208, %211 : vector<16x128xf32>
    %213 = vector.extract_strided_slice %117 {offsets = [2, 0], sizes = [16, 128], strides = [1, 1]} : vector<22x128xf32> to vector<16x128xf32>
    %214 = vector.broadcast %24 : f32 to vector<16x128xf32>
    %215 = arith.mulf %214, %213 : vector<16x128xf32>
    %216 = arith.addf %212, %215 : vector<16x128xf32>
    %217 = vector.extract_strided_slice %117 {offsets = [3, 0], sizes = [16, 128], strides = [1, 1]} : vector<22x128xf32> to vector<16x128xf32>
    %218 = vector.broadcast %31 : f32 to vector<16x128xf32>
    %219 = arith.mulf %218, %217 : vector<16x128xf32>
    %220 = arith.addf %216, %219 : vector<16x128xf32>
    %221 = vector.extract_strided_slice %117 {offsets = [4, 0], sizes = [16, 128], strides = [1, 1]} : vector<22x128xf32> to vector<16x128xf32>
    %222 = vector.broadcast %38 : f32 to vector<16x128xf32>
    %223 = arith.mulf %222, %221 : vector<16x128xf32>
    %224 = arith.addf %220, %223 : vector<16x128xf32>
    %225 = vector.extract_strided_slice %117 {offsets = [5, 0], sizes = [16, 128], strides = [1, 1]} : vector<22x128xf32> to vector<16x128xf32>
    %226 = vector.broadcast %45 : f32 to vector<16x128xf32>
    %227 = arith.mulf %226, %225 : vector<16x128xf32>
    %228 = arith.addf %224, %227 : vector<16x128xf32>
    %229 = vector.extract_strided_slice %117 {offsets = [6, 0], sizes = [16, 128], strides = [1, 1]} : vector<22x128xf32> to vector<16x128xf32>
    %230 = vector.broadcast %52 : f32 to vector<16x128xf32>
    %231 = arith.mulf %230, %229 : vector<16x128xf32>
    %232 = arith.addf %228, %231 : vector<16x128xf32>
    %c127_i32 = arith.constant 127 : i32
    %233 = tpu.dynamic_rotate %117 by %c127_i32 dim 1 : vector<22x128xf32>, i32 -> vector<22x128xf32>
    %234 = vector.extract_strided_slice %233 {offsets = [0, 0], sizes = [16, 128], strides = [1, 1]} : vector<22x128xf32> to vector<16x128xf32>
    %235 = vector.broadcast %11 : f32 to vector<16x128xf32>
    %236 = arith.mulf %235, %234 : vector<16x128xf32>
    %237 = arith.addf %232, %236 : vector<16x128xf32>
    %238 = vector.extract_strided_slice %233 {offsets = [1, 0], sizes = [16, 128], strides = [1, 1]} : vector<22x128xf32> to vector<16x128xf32>
    %239 = vector.broadcast %18 : f32 to vector<16x128xf32>
    %240 = arith.mulf %239, %238 : vector<16x128xf32>
    %241 = arith.addf %237, %240 : vector<16x128xf32>
    %242 = vector.extract_strided_slice %233 {offsets = [2, 0], sizes = [16, 128], strides = [1, 1]} : vector<22x128xf32> to vector<16x128xf32>
    %243 = vector.broadcast %25 : f32 to vector<16x128xf32>
    %244 = arith.mulf %243, %242 : vector<16x128xf32>
    %245 = arith.addf %241, %244 : vector<16x128xf32>
    %246 = vector.extract_strided_slice %233 {offsets = [3, 0], sizes = [16, 128], strides = [1, 1]} : vector<22x128xf32> to vector<16x128xf32>
    %247 = vector.broadcast %32 : f32 to vector<16x128xf32>
    %248 = arith.mulf %247, %246 : vector<16x128xf32>
    %249 = arith.addf %245, %248 : vector<16x128xf32>
    %250 = vector.extract_strided_slice %233 {offsets = [4, 0], sizes = [16, 128], strides = [1, 1]} : vector<22x128xf32> to vector<16x128xf32>
    %251 = vector.broadcast %39 : f32 to vector<16x128xf32>
    %252 = arith.mulf %251, %250 : vector<16x128xf32>
    %253 = arith.addf %249, %252 : vector<16x128xf32>
    %254 = vector.extract_strided_slice %233 {offsets = [5, 0], sizes = [16, 128], strides = [1, 1]} : vector<22x128xf32> to vector<16x128xf32>
    %255 = vector.broadcast %46 : f32 to vector<16x128xf32>
    %256 = arith.mulf %255, %254 : vector<16x128xf32>
    %257 = arith.addf %253, %256 : vector<16x128xf32>
    %258 = vector.extract_strided_slice %233 {offsets = [6, 0], sizes = [16, 128], strides = [1, 1]} : vector<22x128xf32> to vector<16x128xf32>
    %259 = vector.broadcast %53 : f32 to vector<16x128xf32>
    %260 = arith.mulf %259, %258 : vector<16x128xf32>
    %261 = arith.addf %257, %260 : vector<16x128xf32>
    %c126_i32 = arith.constant 126 : i32
    %262 = tpu.dynamic_rotate %117 by %c126_i32 dim 1 : vector<22x128xf32>, i32 -> vector<22x128xf32>
    %263 = vector.extract_strided_slice %262 {offsets = [0, 0], sizes = [16, 128], strides = [1, 1]} : vector<22x128xf32> to vector<16x128xf32>
    %264 = vector.broadcast %12 : f32 to vector<16x128xf32>
    %265 = arith.mulf %264, %263 : vector<16x128xf32>
    %266 = arith.addf %261, %265 : vector<16x128xf32>
    %267 = vector.extract_strided_slice %262 {offsets = [1, 0], sizes = [16, 128], strides = [1, 1]} : vector<22x128xf32> to vector<16x128xf32>
    %268 = vector.broadcast %19 : f32 to vector<16x128xf32>
    %269 = arith.mulf %268, %267 : vector<16x128xf32>
    %270 = arith.addf %266, %269 : vector<16x128xf32>
    %271 = vector.extract_strided_slice %262 {offsets = [2, 0], sizes = [16, 128], strides = [1, 1]} : vector<22x128xf32> to vector<16x128xf32>
    %272 = vector.broadcast %26 : f32 to vector<16x128xf32>
    %273 = arith.mulf %272, %271 : vector<16x128xf32>
    %274 = arith.addf %270, %273 : vector<16x128xf32>
    %275 = vector.extract_strided_slice %262 {offsets = [3, 0], sizes = [16, 128], strides = [1, 1]} : vector<22x128xf32> to vector<16x128xf32>
    %276 = vector.broadcast %33 : f32 to vector<16x128xf32>
    %277 = arith.mulf %276, %275 : vector<16x128xf32>
    %278 = arith.addf %274, %277 : vector<16x128xf32>
    %279 = vector.extract_strided_slice %262 {offsets = [4, 0], sizes = [16, 128], strides = [1, 1]} : vector<22x128xf32> to vector<16x128xf32>
    %280 = vector.broadcast %40 : f32 to vector<16x128xf32>
    %281 = arith.mulf %280, %279 : vector<16x128xf32>
    %282 = arith.addf %278, %281 : vector<16x128xf32>
    %283 = vector.extract_strided_slice %262 {offsets = [5, 0], sizes = [16, 128], strides = [1, 1]} : vector<22x128xf32> to vector<16x128xf32>
    %284 = vector.broadcast %47 : f32 to vector<16x128xf32>
    %285 = arith.mulf %284, %283 : vector<16x128xf32>
    %286 = arith.addf %282, %285 : vector<16x128xf32>
    %287 = vector.extract_strided_slice %262 {offsets = [6, 0], sizes = [16, 128], strides = [1, 1]} : vector<22x128xf32> to vector<16x128xf32>
    %288 = vector.broadcast %54 : f32 to vector<16x128xf32>
    %289 = arith.mulf %288, %287 : vector<16x128xf32>
    %290 = arith.addf %286, %289 : vector<16x128xf32>
    %c125_i32 = arith.constant 125 : i32
    %291 = tpu.dynamic_rotate %117 by %c125_i32 dim 1 : vector<22x128xf32>, i32 -> vector<22x128xf32>
    %292 = vector.extract_strided_slice %291 {offsets = [0, 0], sizes = [16, 128], strides = [1, 1]} : vector<22x128xf32> to vector<16x128xf32>
    %293 = vector.broadcast %13 : f32 to vector<16x128xf32>
    %294 = arith.mulf %293, %292 : vector<16x128xf32>
    %295 = arith.addf %290, %294 : vector<16x128xf32>
    %296 = vector.extract_strided_slice %291 {offsets = [1, 0], sizes = [16, 128], strides = [1, 1]} : vector<22x128xf32> to vector<16x128xf32>
    %297 = vector.broadcast %20 : f32 to vector<16x128xf32>
    %298 = arith.mulf %297, %296 : vector<16x128xf32>
    %299 = arith.addf %295, %298 : vector<16x128xf32>
    %300 = vector.extract_strided_slice %291 {offsets = [2, 0], sizes = [16, 128], strides = [1, 1]} : vector<22x128xf32> to vector<16x128xf32>
    %301 = vector.broadcast %27 : f32 to vector<16x128xf32>
    %302 = arith.mulf %301, %300 : vector<16x128xf32>
    %303 = arith.addf %299, %302 : vector<16x128xf32>
    %304 = vector.extract_strided_slice %291 {offsets = [3, 0], sizes = [16, 128], strides = [1, 1]} : vector<22x128xf32> to vector<16x128xf32>
    %305 = vector.broadcast %34 : f32 to vector<16x128xf32>
    %306 = arith.mulf %305, %304 : vector<16x128xf32>
    %307 = arith.addf %303, %306 : vector<16x128xf32>
    %308 = vector.extract_strided_slice %291 {offsets = [4, 0], sizes = [16, 128], strides = [1, 1]} : vector<22x128xf32> to vector<16x128xf32>
    %309 = vector.broadcast %41 : f32 to vector<16x128xf32>
    %310 = arith.mulf %309, %308 : vector<16x128xf32>
    %311 = arith.addf %307, %310 : vector<16x128xf32>
    %312 = vector.extract_strided_slice %291 {offsets = [5, 0], sizes = [16, 128], strides = [1, 1]} : vector<22x128xf32> to vector<16x128xf32>
    %313 = vector.broadcast %48 : f32 to vector<16x128xf32>
    %314 = arith.mulf %313, %312 : vector<16x128xf32>
    %315 = arith.addf %311, %314 : vector<16x128xf32>
    %316 = vector.extract_strided_slice %291 {offsets = [6, 0], sizes = [16, 128], strides = [1, 1]} : vector<22x128xf32> to vector<16x128xf32>
    %317 = vector.broadcast %55 : f32 to vector<16x128xf32>
    %318 = arith.mulf %317, %316 : vector<16x128xf32>
    %319 = arith.addf %315, %318 : vector<16x128xf32>
    %c1_20 = arith.constant 1 : index
    %c0_21 = arith.constant 0 : index
    %c0_22 = arith.constant 0 : index
    %320 = vector.load %arg4[%c1_20, %c0_21, %c0_22] : memref<2x22x128xf32, #tpu.memory_space<vmem>>, vector<1x22x128xf32>
    %321 = vector.shape_cast %320 : vector<1x22x128xf32> to vector<22x128xf32>
    %c3_i32_23 = arith.constant 3 : i32
    %322 = tpu.dynamic_rotate %321 by %c3_i32_23 dim 1 : vector<22x128xf32>, i32 -> vector<22x128xf32>
    %323 = vector.extract_strided_slice %322 {offsets = [0, 0], sizes = [16, 128], strides = [1, 1]} : vector<22x128xf32> to vector<16x128xf32>
    %324 = vector.broadcast %56 : f32 to vector<16x128xf32>
    %325 = arith.mulf %324, %323 : vector<16x128xf32>
    %326 = arith.addf %319, %325 : vector<16x128xf32>
    %327 = vector.extract_strided_slice %322 {offsets = [1, 0], sizes = [16, 128], strides = [1, 1]} : vector<22x128xf32> to vector<16x128xf32>
    %328 = vector.broadcast %63 : f32 to vector<16x128xf32>
    %329 = arith.mulf %328, %327 : vector<16x128xf32>
    %330 = arith.addf %326, %329 : vector<16x128xf32>
    %331 = vector.extract_strided_slice %322 {offsets = [2, 0], sizes = [16, 128], strides = [1, 1]} : vector<22x128xf32> to vector<16x128xf32>
    %332 = vector.broadcast %70 : f32 to vector<16x128xf32>
    %333 = arith.mulf %332, %331 : vector<16x128xf32>
    %334 = arith.addf %330, %333 : vector<16x128xf32>
    %335 = vector.extract_strided_slice %322 {offsets = [3, 0], sizes = [16, 128], strides = [1, 1]} : vector<22x128xf32> to vector<16x128xf32>
    %336 = vector.broadcast %77 : f32 to vector<16x128xf32>
    %337 = arith.mulf %336, %335 : vector<16x128xf32>
    %338 = arith.addf %334, %337 : vector<16x128xf32>
    %339 = vector.extract_strided_slice %322 {offsets = [4, 0], sizes = [16, 128], strides = [1, 1]} : vector<22x128xf32> to vector<16x128xf32>
    %340 = vector.broadcast %84 : f32 to vector<16x128xf32>
    %341 = arith.mulf %340, %339 : vector<16x128xf32>
    %342 = arith.addf %338, %341 : vector<16x128xf32>
    %343 = vector.extract_strided_slice %322 {offsets = [5, 0], sizes = [16, 128], strides = [1, 1]} : vector<22x128xf32> to vector<16x128xf32>
    %344 = vector.broadcast %91 : f32 to vector<16x128xf32>
    %345 = arith.mulf %344, %343 : vector<16x128xf32>
    %346 = arith.addf %342, %345 : vector<16x128xf32>
    %347 = vector.extract_strided_slice %322 {offsets = [6, 0], sizes = [16, 128], strides = [1, 1]} : vector<22x128xf32> to vector<16x128xf32>
    %348 = vector.broadcast %98 : f32 to vector<16x128xf32>
    %349 = arith.mulf %348, %347 : vector<16x128xf32>
    %350 = arith.addf %346, %349 : vector<16x128xf32>
    %c2_i32_24 = arith.constant 2 : i32
    %351 = tpu.dynamic_rotate %321 by %c2_i32_24 dim 1 : vector<22x128xf32>, i32 -> vector<22x128xf32>
    %352 = vector.extract_strided_slice %351 {offsets = [0, 0], sizes = [16, 128], strides = [1, 1]} : vector<22x128xf32> to vector<16x128xf32>
    %353 = vector.broadcast %57 : f32 to vector<16x128xf32>
    %354 = arith.mulf %353, %352 : vector<16x128xf32>
    %355 = arith.addf %350, %354 : vector<16x128xf32>
    %356 = vector.extract_strided_slice %351 {offsets = [1, 0], sizes = [16, 128], strides = [1, 1]} : vector<22x128xf32> to vector<16x128xf32>
    %357 = vector.broadcast %64 : f32 to vector<16x128xf32>
    %358 = arith.mulf %357, %356 : vector<16x128xf32>
    %359 = arith.addf %355, %358 : vector<16x128xf32>
    %360 = vector.extract_strided_slice %351 {offsets = [2, 0], sizes = [16, 128], strides = [1, 1]} : vector<22x128xf32> to vector<16x128xf32>
    %361 = vector.broadcast %71 : f32 to vector<16x128xf32>
    %362 = arith.mulf %361, %360 : vector<16x128xf32>
    %363 = arith.addf %359, %362 : vector<16x128xf32>
    %364 = vector.extract_strided_slice %351 {offsets = [3, 0], sizes = [16, 128], strides = [1, 1]} : vector<22x128xf32> to vector<16x128xf32>
    %365 = vector.broadcast %78 : f32 to vector<16x128xf32>
    %366 = arith.mulf %365, %364 : vector<16x128xf32>
    %367 = arith.addf %363, %366 : vector<16x128xf32>
    %368 = vector.extract_strided_slice %351 {offsets = [4, 0], sizes = [16, 128], strides = [1, 1]} : vector<22x128xf32> to vector<16x128xf32>
    %369 = vector.broadcast %85 : f32 to vector<16x128xf32>
    %370 = arith.mulf %369, %368 : vector<16x128xf32>
    %371 = arith.addf %367, %370 : vector<16x128xf32>
    %372 = vector.extract_strided_slice %351 {offsets = [5, 0], sizes = [16, 128], strides = [1, 1]} : vector<22x128xf32> to vector<16x128xf32>
    %373 = vector.broadcast %92 : f32 to vector<16x128xf32>
    %374 = arith.mulf %373, %372 : vector<16x128xf32>
    %375 = arith.addf %371, %374 : vector<16x128xf32>
    %376 = vector.extract_strided_slice %351 {offsets = [6, 0], sizes = [16, 128], strides = [1, 1]} : vector<22x128xf32> to vector<16x128xf32>
    %377 = vector.broadcast %99 : f32 to vector<16x128xf32>
    %378 = arith.mulf %377, %376 : vector<16x128xf32>
    %379 = arith.addf %375, %378 : vector<16x128xf32>
    %c1_i32_25 = arith.constant 1 : i32
    %380 = tpu.dynamic_rotate %321 by %c1_i32_25 dim 1 : vector<22x128xf32>, i32 -> vector<22x128xf32>
    %381 = vector.extract_strided_slice %380 {offsets = [0, 0], sizes = [16, 128], strides = [1, 1]} : vector<22x128xf32> to vector<16x128xf32>
    %382 = vector.broadcast %58 : f32 to vector<16x128xf32>
    %383 = arith.mulf %382, %381 : vector<16x128xf32>
    %384 = arith.addf %379, %383 : vector<16x128xf32>
    %385 = vector.extract_strided_slice %380 {offsets = [1, 0], sizes = [16, 128], strides = [1, 1]} : vector<22x128xf32> to vector<16x128xf32>
    %386 = vector.broadcast %65 : f32 to vector<16x128xf32>
    %387 = arith.mulf %386, %385 : vector<16x128xf32>
    %388 = arith.addf %384, %387 : vector<16x128xf32>
    %389 = vector.extract_strided_slice %380 {offsets = [2, 0], sizes = [16, 128], strides = [1, 1]} : vector<22x128xf32> to vector<16x128xf32>
    %390 = vector.broadcast %72 : f32 to vector<16x128xf32>
    %391 = arith.mulf %390, %389 : vector<16x128xf32>
    %392 = arith.addf %388, %391 : vector<16x128xf32>
    %393 = vector.extract_strided_slice %380 {offsets = [3, 0], sizes = [16, 128], strides = [1, 1]} : vector<22x128xf32> to vector<16x128xf32>
    %394 = vector.broadcast %79 : f32 to vector<16x128xf32>
    %395 = arith.mulf %394, %393 : vector<16x128xf32>
    %396 = arith.addf %392, %395 : vector<16x128xf32>
    %397 = vector.extract_strided_slice %380 {offsets = [4, 0], sizes = [16, 128], strides = [1, 1]} : vector<22x128xf32> to vector<16x128xf32>
    %398 = vector.broadcast %86 : f32 to vector<16x128xf32>
    %399 = arith.mulf %398, %397 : vector<16x128xf32>
    %400 = arith.addf %396, %399 : vector<16x128xf32>
    %401 = vector.extract_strided_slice %380 {offsets = [5, 0], sizes = [16, 128], strides = [1, 1]} : vector<22x128xf32> to vector<16x128xf32>
    %402 = vector.broadcast %93 : f32 to vector<16x128xf32>
    %403 = arith.mulf %402, %401 : vector<16x128xf32>
    %404 = arith.addf %400, %403 : vector<16x128xf32>
    %405 = vector.extract_strided_slice %380 {offsets = [6, 0], sizes = [16, 128], strides = [1, 1]} : vector<22x128xf32> to vector<16x128xf32>
    %406 = vector.broadcast %100 : f32 to vector<16x128xf32>
    %407 = arith.mulf %406, %405 : vector<16x128xf32>
    %408 = arith.addf %404, %407 : vector<16x128xf32>
    %409 = vector.extract_strided_slice %321 {offsets = [0, 0], sizes = [16, 128], strides = [1, 1]} : vector<22x128xf32> to vector<16x128xf32>
    %410 = vector.broadcast %59 : f32 to vector<16x128xf32>
    %411 = arith.mulf %410, %409 : vector<16x128xf32>
    %412 = arith.addf %408, %411 : vector<16x128xf32>
    %413 = vector.extract_strided_slice %321 {offsets = [1, 0], sizes = [16, 128], strides = [1, 1]} : vector<22x128xf32> to vector<16x128xf32>
    %414 = vector.broadcast %66 : f32 to vector<16x128xf32>
    %415 = arith.mulf %414, %413 : vector<16x128xf32>
    %416 = arith.addf %412, %415 : vector<16x128xf32>
    %417 = vector.extract_strided_slice %321 {offsets = [2, 0], sizes = [16, 128], strides = [1, 1]} : vector<22x128xf32> to vector<16x128xf32>
    %418 = vector.broadcast %73 : f32 to vector<16x128xf32>
    %419 = arith.mulf %418, %417 : vector<16x128xf32>
    %420 = arith.addf %416, %419 : vector<16x128xf32>
    %421 = vector.extract_strided_slice %321 {offsets = [3, 0], sizes = [16, 128], strides = [1, 1]} : vector<22x128xf32> to vector<16x128xf32>
    %422 = vector.broadcast %80 : f32 to vector<16x128xf32>
    %423 = arith.mulf %422, %421 : vector<16x128xf32>
    %424 = arith.addf %420, %423 : vector<16x128xf32>
    %425 = vector.extract_strided_slice %321 {offsets = [4, 0], sizes = [16, 128], strides = [1, 1]} : vector<22x128xf32> to vector<16x128xf32>
    %426 = vector.broadcast %87 : f32 to vector<16x128xf32>
    %427 = arith.mulf %426, %425 : vector<16x128xf32>
    %428 = arith.addf %424, %427 : vector<16x128xf32>
    %429 = vector.extract_strided_slice %321 {offsets = [5, 0], sizes = [16, 128], strides = [1, 1]} : vector<22x128xf32> to vector<16x128xf32>
    %430 = vector.broadcast %94 : f32 to vector<16x128xf32>
    %431 = arith.mulf %430, %429 : vector<16x128xf32>
    %432 = arith.addf %428, %431 : vector<16x128xf32>
    %433 = vector.extract_strided_slice %321 {offsets = [6, 0], sizes = [16, 128], strides = [1, 1]} : vector<22x128xf32> to vector<16x128xf32>
    %434 = vector.broadcast %101 : f32 to vector<16x128xf32>
    %435 = arith.mulf %434, %433 : vector<16x128xf32>
    %436 = arith.addf %432, %435 : vector<16x128xf32>
    %c127_i32_26 = arith.constant 127 : i32
    %437 = tpu.dynamic_rotate %321 by %c127_i32_26 dim 1 : vector<22x128xf32>, i32 -> vector<22x128xf32>
    %438 = vector.extract_strided_slice %437 {offsets = [0, 0], sizes = [16, 128], strides = [1, 1]} : vector<22x128xf32> to vector<16x128xf32>
    %439 = vector.broadcast %60 : f32 to vector<16x128xf32>
    %440 = arith.mulf %439, %438 : vector<16x128xf32>
    %441 = arith.addf %436, %440 : vector<16x128xf32>
    %442 = vector.extract_strided_slice %437 {offsets = [1, 0], sizes = [16, 128], strides = [1, 1]} : vector<22x128xf32> to vector<16x128xf32>
    %443 = vector.broadcast %67 : f32 to vector<16x128xf32>
    %444 = arith.mulf %443, %442 : vector<16x128xf32>
    %445 = arith.addf %441, %444 : vector<16x128xf32>
    %446 = vector.extract_strided_slice %437 {offsets = [2, 0], sizes = [16, 128], strides = [1, 1]} : vector<22x128xf32> to vector<16x128xf32>
    %447 = vector.broadcast %74 : f32 to vector<16x128xf32>
    %448 = arith.mulf %447, %446 : vector<16x128xf32>
    %449 = arith.addf %445, %448 : vector<16x128xf32>
    %450 = vector.extract_strided_slice %437 {offsets = [3, 0], sizes = [16, 128], strides = [1, 1]} : vector<22x128xf32> to vector<16x128xf32>
    %451 = vector.broadcast %81 : f32 to vector<16x128xf32>
    %452 = arith.mulf %451, %450 : vector<16x128xf32>
    %453 = arith.addf %449, %452 : vector<16x128xf32>
    %454 = vector.extract_strided_slice %437 {offsets = [4, 0], sizes = [16, 128], strides = [1, 1]} : vector<22x128xf32> to vector<16x128xf32>
    %455 = vector.broadcast %88 : f32 to vector<16x128xf32>
    %456 = arith.mulf %455, %454 : vector<16x128xf32>
    %457 = arith.addf %453, %456 : vector<16x128xf32>
    %458 = vector.extract_strided_slice %437 {offsets = [5, 0], sizes = [16, 128], strides = [1, 1]} : vector<22x128xf32> to vector<16x128xf32>
    %459 = vector.broadcast %95 : f32 to vector<16x128xf32>
    %460 = arith.mulf %459, %458 : vector<16x128xf32>
    %461 = arith.addf %457, %460 : vector<16x128xf32>
    %462 = vector.extract_strided_slice %437 {offsets = [6, 0], sizes = [16, 128], strides = [1, 1]} : vector<22x128xf32> to vector<16x128xf32>
    %463 = vector.broadcast %102 : f32 to vector<16x128xf32>
    %464 = arith.mulf %463, %462 : vector<16x128xf32>
    %465 = arith.addf %461, %464 : vector<16x128xf32>
    %c126_i32_27 = arith.constant 126 : i32
    %466 = tpu.dynamic_rotate %321 by %c126_i32_27 dim 1 : vector<22x128xf32>, i32 -> vector<22x128xf32>
    %467 = vector.extract_strided_slice %466 {offsets = [0, 0], sizes = [16, 128], strides = [1, 1]} : vector<22x128xf32> to vector<16x128xf32>
    %468 = vector.broadcast %61 : f32 to vector<16x128xf32>
    %469 = arith.mulf %468, %467 : vector<16x128xf32>
    %470 = arith.addf %465, %469 : vector<16x128xf32>
    %471 = vector.extract_strided_slice %466 {offsets = [1, 0], sizes = [16, 128], strides = [1, 1]} : vector<22x128xf32> to vector<16x128xf32>
    %472 = vector.broadcast %68 : f32 to vector<16x128xf32>
    %473 = arith.mulf %472, %471 : vector<16x128xf32>
    %474 = arith.addf %470, %473 : vector<16x128xf32>
    %475 = vector.extract_strided_slice %466 {offsets = [2, 0], sizes = [16, 128], strides = [1, 1]} : vector<22x128xf32> to vector<16x128xf32>
    %476 = vector.broadcast %75 : f32 to vector<16x128xf32>
    %477 = arith.mulf %476, %475 : vector<16x128xf32>
    %478 = arith.addf %474, %477 : vector<16x128xf32>
    %479 = vector.extract_strided_slice %466 {offsets = [3, 0], sizes = [16, 128], strides = [1, 1]} : vector<22x128xf32> to vector<16x128xf32>
    %480 = vector.broadcast %82 : f32 to vector<16x128xf32>
    %481 = arith.mulf %480, %479 : vector<16x128xf32>
    %482 = arith.addf %478, %481 : vector<16x128xf32>
    %483 = vector.extract_strided_slice %466 {offsets = [4, 0], sizes = [16, 128], strides = [1, 1]} : vector<22x128xf32> to vector<16x128xf32>
    %484 = vector.broadcast %89 : f32 to vector<16x128xf32>
    %485 = arith.mulf %484, %483 : vector<16x128xf32>
    %486 = arith.addf %482, %485 : vector<16x128xf32>
    %487 = vector.extract_strided_slice %466 {offsets = [5, 0], sizes = [16, 128], strides = [1, 1]} : vector<22x128xf32> to vector<16x128xf32>
    %488 = vector.broadcast %96 : f32 to vector<16x128xf32>
    %489 = arith.mulf %488, %487 : vector<16x128xf32>
    %490 = arith.addf %486, %489 : vector<16x128xf32>
    %491 = vector.extract_strided_slice %466 {offsets = [6, 0], sizes = [16, 128], strides = [1, 1]} : vector<22x128xf32> to vector<16x128xf32>
    %492 = vector.broadcast %103 : f32 to vector<16x128xf32>
    %493 = arith.mulf %492, %491 : vector<16x128xf32>
    %494 = arith.addf %490, %493 : vector<16x128xf32>
    %c125_i32_28 = arith.constant 125 : i32
    %495 = tpu.dynamic_rotate %321 by %c125_i32_28 dim 1 : vector<22x128xf32>, i32 -> vector<22x128xf32>
    %496 = vector.extract_strided_slice %495 {offsets = [0, 0], sizes = [16, 128], strides = [1, 1]} : vector<22x128xf32> to vector<16x128xf32>
    %497 = vector.broadcast %62 : f32 to vector<16x128xf32>
    %498 = arith.mulf %497, %496 : vector<16x128xf32>
    %499 = arith.addf %494, %498 : vector<16x128xf32>
    %500 = vector.extract_strided_slice %495 {offsets = [1, 0], sizes = [16, 128], strides = [1, 1]} : vector<22x128xf32> to vector<16x128xf32>
    %501 = vector.broadcast %69 : f32 to vector<16x128xf32>
    %502 = arith.mulf %501, %500 : vector<16x128xf32>
    %503 = arith.addf %499, %502 : vector<16x128xf32>
    %504 = vector.extract_strided_slice %495 {offsets = [2, 0], sizes = [16, 128], strides = [1, 1]} : vector<22x128xf32> to vector<16x128xf32>
    %505 = vector.broadcast %76 : f32 to vector<16x128xf32>
    %506 = arith.mulf %505, %504 : vector<16x128xf32>
    %507 = arith.addf %503, %506 : vector<16x128xf32>
    %508 = vector.extract_strided_slice %495 {offsets = [3, 0], sizes = [16, 128], strides = [1, 1]} : vector<22x128xf32> to vector<16x128xf32>
    %509 = vector.broadcast %83 : f32 to vector<16x128xf32>
    %510 = arith.mulf %509, %508 : vector<16x128xf32>
    %511 = arith.addf %507, %510 : vector<16x128xf32>
    %512 = vector.extract_strided_slice %495 {offsets = [4, 0], sizes = [16, 128], strides = [1, 1]} : vector<22x128xf32> to vector<16x128xf32>
    %513 = vector.broadcast %90 : f32 to vector<16x128xf32>
    %514 = arith.mulf %513, %512 : vector<16x128xf32>
    %515 = arith.addf %511, %514 : vector<16x128xf32>
    %516 = vector.extract_strided_slice %495 {offsets = [5, 0], sizes = [16, 128], strides = [1, 1]} : vector<22x128xf32> to vector<16x128xf32>
    %517 = vector.broadcast %97 : f32 to vector<16x128xf32>
    %518 = arith.mulf %517, %516 : vector<16x128xf32>
    %519 = arith.addf %515, %518 : vector<16x128xf32>
    %520 = vector.extract_strided_slice %495 {offsets = [6, 0], sizes = [16, 128], strides = [1, 1]} : vector<22x128xf32> to vector<16x128xf32>
    %521 = vector.broadcast %104 : f32 to vector<16x128xf32>
    %522 = arith.mulf %521, %520 : vector<16x128xf32>
    %523 = arith.addf %519, %522 : vector<16x128xf32>
    %cst_29 = arith.constant 0.000000e+00 : f32
    %524 = vector.broadcast %cst_29 : f32 to vector<16x128xf32>
    %525 = arith.subf %524, %523 : vector<16x128xf32>
    %526 = math.exp %525 : vector<16x128xf32>
    %cst_30 = arith.constant 1.000000e+00 : f32
    %527 = vector.broadcast %cst_30 : f32 to vector<16x128xf32>
    %528 = arith.addf %527, %526 : vector<16x128xf32>
    %cst_31 = arith.constant 1.000000e+00 : f32
    %529 = vector.broadcast %cst_31 : f32 to vector<16x128xf32>
    %530 = arith.divf %529, %528 : vector<16x128xf32>
    %c0_32 = arith.constant 0 : index
    %c0_33 = arith.constant 0 : index
    %c0_34 = arith.constant 0 : index
    %531 = vector.load %arg3[%c0_32, %c0_33, %c0_34] : memref<2x16x128xf32, #tpu.memory_space<vmem>>, vector<1x16x128xf32>
    %532 = vector.shape_cast %531 : vector<1x16x128xf32> to vector<16x128xf32>
    %533 = vector.shape_cast %530 : vector<16x128xf32> to vector<1x16x128xf32>
    tpu.vector_store %arg3[%c0_32, %c0_33, %c0_34], %533 {strides = array<i32>} : memref<2x16x128xf32, #tpu.memory_space<vmem>>, vector<1x16x128xf32>,
    %534 = vector.extract_strided_slice %5 {offsets = [1, 0, 0], sizes = [1, 16, 16], strides = [1, 1, 1]} : vector<2x16x16xf32> to vector<1x16x16xf32>
    %535 = vector.shape_cast %534 : vector<1x16x16xf32> to vector<16x16xf32>
    %c0_35 = arith.constant 0 : index
    %c3_36 = arith.constant 3 : index
    %c0_37 = arith.constant 0 : index
    %536 = vector.load %arg4[%c0_35, %c3_36, %c0_37] : memref<2x22x128xf32, #tpu.memory_space<vmem>>, vector<1x16x16xf32>
    %537 = vector.shape_cast %536 : vector<1x16x16xf32> to vector<16x16xf32>
    %538 = vector.shape_cast %535 : vector<16x16xf32> to vector<1x16x16xf32>
    tpu.vector_store %arg4[%c0_35, %c3_36, %c0_37], %538 {strides = array<i32>} : memref<2x22x128xf32, #tpu.memory_space<vmem>>, vector<1x16x16xf32>,
    %539 = vector.extract_strided_slice %6 {offsets = [1, 0, 0], sizes = [1, 16, 16], strides = [1, 1, 1]} : vector<2x16x16xf32> to vector<1x16x16xf32>
    %540 = vector.shape_cast %539 : vector<1x16x16xf32> to vector<16x16xf32>
    %c1_38 = arith.constant 1 : index
    %c3_39 = arith.constant 3 : index
    %c0_40 = arith.constant 0 : index
    %541 = vector.load %arg4[%c1_38, %c3_39, %c0_40] : memref<2x22x128xf32, #tpu.memory_space<vmem>>, vector<1x16x16xf32>
    %542 = vector.shape_cast %541 : vector<1x16x16xf32> to vector<16x16xf32>
    %543 = vector.shape_cast %540 : vector<16x16xf32> to vector<1x16x16xf32>
    tpu.vector_store %arg4[%c1_38, %c3_39, %c0_40], %543 {strides = array<i32>} : memref<2x22x128xf32, #tpu.memory_space<vmem>>, vector<1x16x16xf32>,
    %cst_41 = arith.constant 0.000000e+00 : f32
    %544 = vector.broadcast %cst_41 : f32 to vector<16x128xf32>
    %c0_42 = arith.constant 0 : index
    %c0_43 = arith.constant 0 : index
    %c0_44 = arith.constant 0 : index
    %545 = vector.load %arg4[%c0_42, %c0_43, %c0_44] : memref<2x22x128xf32, #tpu.memory_space<vmem>>, vector<1x22x128xf32>
    %546 = vector.shape_cast %545 : vector<1x22x128xf32> to vector<22x128xf32>
    %c3_i32_45 = arith.constant 3 : i32
    %547 = tpu.dynamic_rotate %546 by %c3_i32_45 dim 1 : vector<22x128xf32>, i32 -> vector<22x128xf32>
    %548 = vector.extract_strided_slice %547 {offsets = [0, 0], sizes = [16, 128], strides = [1, 1]} : vector<22x128xf32> to vector<16x128xf32>
    %549 = vector.broadcast %7 : f32 to vector<16x128xf32>
    %550 = arith.mulf %549, %548 : vector<16x128xf32>
    %551 = arith.addf %544, %550 : vector<16x128xf32>
    %552 = vector.extract_strided_slice %547 {offsets = [1, 0], sizes = [16, 128], strides = [1, 1]} : vector<22x128xf32> to vector<16x128xf32>
    %553 = vector.broadcast %14 : f32 to vector<16x128xf32>
    %554 = arith.mulf %553, %552 : vector<16x128xf32>
    %555 = arith.addf %551, %554 : vector<16x128xf32>
    %556 = vector.extract_strided_slice %547 {offsets = [2, 0], sizes = [16, 128], strides = [1, 1]} : vector<22x128xf32> to vector<16x128xf32>
    %557 = vector.broadcast %21 : f32 to vector<16x128xf32>
    %558 = arith.mulf %557, %556 : vector<16x128xf32>
    %559 = arith.addf %555, %558 : vector<16x128xf32>
    %560 = vector.extract_strided_slice %547 {offsets = [3, 0], sizes = [16, 128], strides = [1, 1]} : vector<22x128xf32> to vector<16x128xf32>
    %561 = vector.broadcast %28 : f32 to vector<16x128xf32>
    %562 = arith.mulf %561, %560 : vector<16x128xf32>
    %563 = arith.addf %559, %562 : vector<16x128xf32>
    %564 = vector.extract_strided_slice %547 {offsets = [4, 0], sizes = [16, 128], strides = [1, 1]} : vector<22x128xf32> to vector<16x128xf32>
    %565 = vector.broadcast %35 : f32 to vector<16x128xf32>
    %566 = arith.mulf %565, %564 : vector<16x128xf32>
    %567 = arith.addf %563, %566 : vector<16x128xf32>
    %568 = vector.extract_strided_slice %547 {offsets = [5, 0], sizes = [16, 128], strides = [1, 1]} : vector<22x128xf32> to vector<16x128xf32>
    %569 = vector.broadcast %42 : f32 to vector<16x128xf32>
    %570 = arith.mulf %569, %568 : vector<16x128xf32>
    %571 = arith.addf %567, %570 : vector<16x128xf32>
    %572 = vector.extract_strided_slice %547 {offsets = [6, 0], sizes = [16, 128], strides = [1, 1]} : vector<22x128xf32> to vector<16x128xf32>
    %573 = vector.broadcast %49 : f32 to vector<16x128xf32>
    %574 = arith.mulf %573, %572 : vector<16x128xf32>
    %575 = arith.addf %571, %574 : vector<16x128xf32>
    %c2_i32_46 = arith.constant 2 : i32
    %576 = tpu.dynamic_rotate %546 by %c2_i32_46 dim 1 : vector<22x128xf32>, i32 -> vector<22x128xf32>
    %577 = vector.extract_strided_slice %576 {offsets = [0, 0], sizes = [16, 128], strides = [1, 1]} : vector<22x128xf32> to vector<16x128xf32>
    %578 = vector.broadcast %8 : f32 to vector<16x128xf32>
    %579 = arith.mulf %578, %577 : vector<16x128xf32>
    %580 = arith.addf %575, %579 : vector<16x128xf32>
    %581 = vector.extract_strided_slice %576 {offsets = [1, 0], sizes = [16, 128], strides = [1, 1]} : vector<22x128xf32> to vector<16x128xf32>
    %582 = vector.broadcast %15 : f32 to vector<16x128xf32>
    %583 = arith.mulf %582, %581 : vector<16x128xf32>
    %584 = arith.addf %580, %583 : vector<16x128xf32>
    %585 = vector.extract_strided_slice %576 {offsets = [2, 0], sizes = [16, 128], strides = [1, 1]} : vector<22x128xf32> to vector<16x128xf32>
    %586 = vector.broadcast %22 : f32 to vector<16x128xf32>
    %587 = arith.mulf %586, %585 : vector<16x128xf32>
    %588 = arith.addf %584, %587 : vector<16x128xf32>
    %589 = vector.extract_strided_slice %576 {offsets = [3, 0], sizes = [16, 128], strides = [1, 1]} : vector<22x128xf32> to vector<16x128xf32>
    %590 = vector.broadcast %29 : f32 to vector<16x128xf32>
    %591 = arith.mulf %590, %589 : vector<16x128xf32>
    %592 = arith.addf %588, %591 : vector<16x128xf32>
    %593 = vector.extract_strided_slice %576 {offsets = [4, 0], sizes = [16, 128], strides = [1, 1]} : vector<22x128xf32> to vector<16x128xf32>
    %594 = vector.broadcast %36 : f32 to vector<16x128xf32>
    %595 = arith.mulf %594, %593 : vector<16x128xf32>
    %596 = arith.addf %592, %595 : vector<16x128xf32>
    %597 = vector.extract_strided_slice %576 {offsets = [5, 0], sizes = [16, 128], strides = [1, 1]} : vector<22x128xf32> to vector<16x128xf32>
    %598 = vector.broadcast %43 : f32 to vector<16x128xf32>
    %599 = arith.mulf %598, %597 : vector<16x128xf32>
    %600 = arith.addf %596, %599 : vector<16x128xf32>
    %601 = vector.extract_strided_slice %576 {offsets = [6, 0], sizes = [16, 128], strides = [1, 1]} : vector<22x128xf32> to vector<16x128xf32>
    %602 = vector.broadcast %50 : f32 to vector<16x128xf32>
    %603 = arith.mulf %602, %601 : vector<16x128xf32>
    %604 = arith.addf %600, %603 : vector<16x128xf32>
    %c1_i32_47 = arith.constant 1 : i32
    %605 = tpu.dynamic_rotate %546 by %c1_i32_47 dim 1 : vector<22x128xf32>, i32 -> vector<22x128xf32>
    %606 = vector.extract_strided_slice %605 {offsets = [0, 0], sizes = [16, 128], strides = [1, 1]} : vector<22x128xf32> to vector<16x128xf32>
    %607 = vector.broadcast %9 : f32 to vector<16x128xf32>
    %608 = arith.mulf %607, %606 : vector<16x128xf32>
    %609 = arith.addf %604, %608 : vector<16x128xf32>
    %610 = vector.extract_strided_slice %605 {offsets = [1, 0], sizes = [16, 128], strides = [1, 1]} : vector<22x128xf32> to vector<16x128xf32>
    %611 = vector.broadcast %16 : f32 to vector<16x128xf32>
    %612 = arith.mulf %611, %610 : vector<16x128xf32>
    %613 = arith.addf %609, %612 : vector<16x128xf32>
    %614 = vector.extract_strided_slice %605 {offsets = [2, 0], sizes = [16, 128], strides = [1, 1]} : vector<22x128xf32> to vector<16x128xf32>
    %615 = vector.broadcast %23 : f32 to vector<16x128xf32>
    %616 = arith.mulf %615, %614 : vector<16x128xf32>
    %617 = arith.addf %613, %616 : vector<16x128xf32>
    %618 = vector.extract_strided_slice %605 {offsets = [3, 0], sizes = [16, 128], strides = [1, 1]} : vector<22x128xf32> to vector<16x128xf32>
    %619 = vector.broadcast %30 : f32 to vector<16x128xf32>
    %620 = arith.mulf %619, %618 : vector<16x128xf32>
    %621 = arith.addf %617, %620 : vector<16x128xf32>
    %622 = vector.extract_strided_slice %605 {offsets = [4, 0], sizes = [16, 128], strides = [1, 1]} : vector<22x128xf32> to vector<16x128xf32>
    %623 = vector.broadcast %37 : f32 to vector<16x128xf32>
    %624 = arith.mulf %623, %622 : vector<16x128xf32>
    %625 = arith.addf %621, %624 : vector<16x128xf32>
    %626 = vector.extract_strided_slice %605 {offsets = [5, 0], sizes = [16, 128], strides = [1, 1]} : vector<22x128xf32> to vector<16x128xf32>
    %627 = vector.broadcast %44 : f32 to vector<16x128xf32>
    %628 = arith.mulf %627, %626 : vector<16x128xf32>
    %629 = arith.addf %625, %628 : vector<16x128xf32>
    %630 = vector.extract_strided_slice %605 {offsets = [6, 0], sizes = [16, 128], strides = [1, 1]} : vector<22x128xf32> to vector<16x128xf32>
    %631 = vector.broadcast %51 : f32 to vector<16x128xf32>
    %632 = arith.mulf %631, %630 : vector<16x128xf32>
    %633 = arith.addf %629, %632 : vector<16x128xf32>
    %634 = vector.extract_strided_slice %546 {offsets = [0, 0], sizes = [16, 128], strides = [1, 1]} : vector<22x128xf32> to vector<16x128xf32>
    %635 = vector.broadcast %10 : f32 to vector<16x128xf32>
    %636 = arith.mulf %635, %634 : vector<16x128xf32>
    %637 = arith.addf %633, %636 : vector<16x128xf32>
    %638 = vector.extract_strided_slice %546 {offsets = [1, 0], sizes = [16, 128], strides = [1, 1]} : vector<22x128xf32> to vector<16x128xf32>
    %639 = vector.broadcast %17 : f32 to vector<16x128xf32>
    %640 = arith.mulf %639, %638 : vector<16x128xf32>
    %641 = arith.addf %637, %640 : vector<16x128xf32>
    %642 = vector.extract_strided_slice %546 {offsets = [2, 0], sizes = [16, 128], strides = [1, 1]} : vector<22x128xf32> to vector<16x128xf32>
    %643 = vector.broadcast %24 : f32 to vector<16x128xf32>
    %644 = arith.mulf %643, %642 : vector<16x128xf32>
    %645 = arith.addf %641, %644 : vector<16x128xf32>
    %646 = vector.extract_strided_slice %546 {offsets = [3, 0], sizes = [16, 128], strides = [1, 1]} : vector<22x128xf32> to vector<16x128xf32>
    %647 = vector.broadcast %31 : f32 to vector<16x128xf32>
    %648 = arith.mulf %647, %646 : vector<16x128xf32>
    %649 = arith.addf %645, %648 : vector<16x128xf32>
    %650 = vector.extract_strided_slice %546 {offsets = [4, 0], sizes = [16, 128], strides = [1, 1]} : vector<22x128xf32> to vector<16x128xf32>
    %651 = vector.broadcast %38 : f32 to vector<16x128xf32>
    %652 = arith.mulf %651, %650 : vector<16x128xf32>
    %653 = arith.addf %649, %652 : vector<16x128xf32>
    %654 = vector.extract_strided_slice %546 {offsets = [5, 0], sizes = [16, 128], strides = [1, 1]} : vector<22x128xf32> to vector<16x128xf32>
    %655 = vector.broadcast %45 : f32 to vector<16x128xf32>
    %656 = arith.mulf %655, %654 : vector<16x128xf32>
    %657 = arith.addf %653, %656 : vector<16x128xf32>
    %658 = vector.extract_strided_slice %546 {offsets = [6, 0], sizes = [16, 128], strides = [1, 1]} : vector<22x128xf32> to vector<16x128xf32>
    %659 = vector.broadcast %52 : f32 to vector<16x128xf32>
    %660 = arith.mulf %659, %658 : vector<16x128xf32>
    %661 = arith.addf %657, %660 : vector<16x128xf32>
    %c127_i32_48 = arith.constant 127 : i32
    %662 = tpu.dynamic_rotate %546 by %c127_i32_48 dim 1 : vector<22x128xf32>, i32 -> vector<22x128xf32>
    %663 = vector.extract_strided_slice %662 {offsets = [0, 0], sizes = [16, 128], strides = [1, 1]} : vector<22x128xf32> to vector<16x128xf32>
    %664 = vector.broadcast %11 : f32 to vector<16x128xf32>
    %665 = arith.mulf %664, %663 : vector<16x128xf32>
    %666 = arith.addf %661, %665 : vector<16x128xf32>
    %667 = vector.extract_strided_slice %662 {offsets = [1, 0], sizes = [16, 128], strides = [1, 1]} : vector<22x128xf32> to vector<16x128xf32>
    %668 = vector.broadcast %18 : f32 to vector<16x128xf32>
    %669 = arith.mulf %668, %667 : vector<16x128xf32>
    %670 = arith.addf %666, %669 : vector<16x128xf32>
    %671 = vector.extract_strided_slice %662 {offsets = [2, 0], sizes = [16, 128], strides = [1, 1]} : vector<22x128xf32> to vector<16x128xf32>
    %672 = vector.broadcast %25 : f32 to vector<16x128xf32>
    %673 = arith.mulf %672, %671 : vector<16x128xf32>
    %674 = arith.addf %670, %673 : vector<16x128xf32>
    %675 = vector.extract_strided_slice %662 {offsets = [3, 0], sizes = [16, 128], strides = [1, 1]} : vector<22x128xf32> to vector<16x128xf32>
    %676 = vector.broadcast %32 : f32 to vector<16x128xf32>
    %677 = arith.mulf %676, %675 : vector<16x128xf32>
    %678 = arith.addf %674, %677 : vector<16x128xf32>
    %679 = vector.extract_strided_slice %662 {offsets = [4, 0], sizes = [16, 128], strides = [1, 1]} : vector<22x128xf32> to vector<16x128xf32>
    %680 = vector.broadcast %39 : f32 to vector<16x128xf32>
    %681 = arith.mulf %680, %679 : vector<16x128xf32>
    %682 = arith.addf %678, %681 : vector<16x128xf32>
    %683 = vector.extract_strided_slice %662 {offsets = [5, 0], sizes = [16, 128], strides = [1, 1]} : vector<22x128xf32> to vector<16x128xf32>
    %684 = vector.broadcast %46 : f32 to vector<16x128xf32>
    %685 = arith.mulf %684, %683 : vector<16x128xf32>
    %686 = arith.addf %682, %685 : vector<16x128xf32>
    %687 = vector.extract_strided_slice %662 {offsets = [6, 0], sizes = [16, 128], strides = [1, 1]} : vector<22x128xf32> to vector<16x128xf32>
    %688 = vector.broadcast %53 : f32 to vector<16x128xf32>
    %689 = arith.mulf %688, %687 : vector<16x128xf32>
    %690 = arith.addf %686, %689 : vector<16x128xf32>
    %c126_i32_49 = arith.constant 126 : i32
    %691 = tpu.dynamic_rotate %546 by %c126_i32_49 dim 1 : vector<22x128xf32>, i32 -> vector<22x128xf32>
    %692 = vector.extract_strided_slice %691 {offsets = [0, 0], sizes = [16, 128], strides = [1, 1]} : vector<22x128xf32> to vector<16x128xf32>
    %693 = vector.broadcast %12 : f32 to vector<16x128xf32>
    %694 = arith.mulf %693, %692 : vector<16x128xf32>
    %695 = arith.addf %690, %694 : vector<16x128xf32>
    %696 = vector.extract_strided_slice %691 {offsets = [1, 0], sizes = [16, 128], strides = [1, 1]} : vector<22x128xf32> to vector<16x128xf32>
    %697 = vector.broadcast %19 : f32 to vector<16x128xf32>
    %698 = arith.mulf %697, %696 : vector<16x128xf32>
    %699 = arith.addf %695, %698 : vector<16x128xf32>
    %700 = vector.extract_strided_slice %691 {offsets = [2, 0], sizes = [16, 128], strides = [1, 1]} : vector<22x128xf32> to vector<16x128xf32>
    %701 = vector.broadcast %26 : f32 to vector<16x128xf32>
    %702 = arith.mulf %701, %700 : vector<16x128xf32>
    %703 = arith.addf %699, %702 : vector<16x128xf32>
    %704 = vector.extract_strided_slice %691 {offsets = [3, 0], sizes = [16, 128], strides = [1, 1]} : vector<22x128xf32> to vector<16x128xf32>
    %705 = vector.broadcast %33 : f32 to vector<16x128xf32>
    %706 = arith.mulf %705, %704 : vector<16x128xf32>
    %707 = arith.addf %703, %706 : vector<16x128xf32>
    %708 = vector.extract_strided_slice %691 {offsets = [4, 0], sizes = [16, 128], strides = [1, 1]} : vector<22x128xf32> to vector<16x128xf32>
    %709 = vector.broadcast %40 : f32 to vector<16x128xf32>
    %710 = arith.mulf %709, %708 : vector<16x128xf32>
    %711 = arith.addf %707, %710 : vector<16x128xf32>
    %712 = vector.extract_strided_slice %691 {offsets = [5, 0], sizes = [16, 128], strides = [1, 1]} : vector<22x128xf32> to vector<16x128xf32>
    %713 = vector.broadcast %47 : f32 to vector<16x128xf32>
    %714 = arith.mulf %713, %712 : vector<16x128xf32>
    %715 = arith.addf %711, %714 : vector<16x128xf32>
    %716 = vector.extract_strided_slice %691 {offsets = [6, 0], sizes = [16, 128], strides = [1, 1]} : vector<22x128xf32> to vector<16x128xf32>
    %717 = vector.broadcast %54 : f32 to vector<16x128xf32>
    %718 = arith.mulf %717, %716 : vector<16x128xf32>
    %719 = arith.addf %715, %718 : vector<16x128xf32>
    %c125_i32_50 = arith.constant 125 : i32
    %720 = tpu.dynamic_rotate %546 by %c125_i32_50 dim 1 : vector<22x128xf32>, i32 -> vector<22x128xf32>
    %721 = vector.extract_strided_slice %720 {offsets = [0, 0], sizes = [16, 128], strides = [1, 1]} : vector<22x128xf32> to vector<16x128xf32>
    %722 = vector.broadcast %13 : f32 to vector<16x128xf32>
    %723 = arith.mulf %722, %721 : vector<16x128xf32>
    %724 = arith.addf %719, %723 : vector<16x128xf32>
    %725 = vector.extract_strided_slice %720 {offsets = [1, 0], sizes = [16, 128], strides = [1, 1]} : vector<22x128xf32> to vector<16x128xf32>
    %726 = vector.broadcast %20 : f32 to vector<16x128xf32>
    %727 = arith.mulf %726, %725 : vector<16x128xf32>
    %728 = arith.addf %724, %727 : vector<16x128xf32>
    %729 = vector.extract_strided_slice %720 {offsets = [2, 0], sizes = [16, 128], strides = [1, 1]} : vector<22x128xf32> to vector<16x128xf32>
    %730 = vector.broadcast %27 : f32 to vector<16x128xf32>
    %731 = arith.mulf %730, %729 : vector<16x128xf32>
    %732 = arith.addf %728, %731 : vector<16x128xf32>
    %733 = vector.extract_strided_slice %720 {offsets = [3, 0], sizes = [16, 128], strides = [1, 1]} : vector<22x128xf32> to vector<16x128xf32>
    %734 = vector.broadcast %34 : f32 to vector<16x128xf32>
    %735 = arith.mulf %734, %733 : vector<16x128xf32>
    %736 = arith.addf %732, %735 : vector<16x128xf32>
    %737 = vector.extract_strided_slice %720 {offsets = [4, 0], sizes = [16, 128], strides = [1, 1]} : vector<22x128xf32> to vector<16x128xf32>
    %738 = vector.broadcast %41 : f32 to vector<16x128xf32>
    %739 = arith.mulf %738, %737 : vector<16x128xf32>
    %740 = arith.addf %736, %739 : vector<16x128xf32>
    %741 = vector.extract_strided_slice %720 {offsets = [5, 0], sizes = [16, 128], strides = [1, 1]} : vector<22x128xf32> to vector<16x128xf32>
    %742 = vector.broadcast %48 : f32 to vector<16x128xf32>
    %743 = arith.mulf %742, %741 : vector<16x128xf32>
    %744 = arith.addf %740, %743 : vector<16x128xf32>
    %745 = vector.extract_strided_slice %720 {offsets = [6, 0], sizes = [16, 128], strides = [1, 1]} : vector<22x128xf32> to vector<16x128xf32>
    %746 = vector.broadcast %55 : f32 to vector<16x128xf32>
    %747 = arith.mulf %746, %745 : vector<16x128xf32>
    %748 = arith.addf %744, %747 : vector<16x128xf32>
    %c1_51 = arith.constant 1 : index
    %c0_52 = arith.constant 0 : index
    %c0_53 = arith.constant 0 : index
    %749 = vector.load %arg4[%c1_51, %c0_52, %c0_53] : memref<2x22x128xf32, #tpu.memory_space<vmem>>, vector<1x22x128xf32>
    %750 = vector.shape_cast %749 : vector<1x22x128xf32> to vector<22x128xf32>
    %c3_i32_54 = arith.constant 3 : i32
    %751 = tpu.dynamic_rotate %750 by %c3_i32_54 dim 1 : vector<22x128xf32>, i32 -> vector<22x128xf32>
    %752 = vector.extract_strided_slice %751 {offsets = [0, 0], sizes = [16, 128], strides = [1, 1]} : vector<22x128xf32> to vector<16x128xf32>
    %753 = vector.broadcast %56 : f32 to vector<16x128xf32>
    %754 = arith.mulf %753, %752 : vector<16x128xf32>
    %755 = arith.addf %748, %754 : vector<16x128xf32>
    %756 = vector.extract_strided_slice %751 {offsets = [1, 0], sizes = [16, 128], strides = [1, 1]} : vector<22x128xf32> to vector<16x128xf32>
    %757 = vector.broadcast %63 : f32 to vector<16x128xf32>
    %758 = arith.mulf %757, %756 : vector<16x128xf32>
    %759 = arith.addf %755, %758 : vector<16x128xf32>
    %760 = vector.extract_strided_slice %751 {offsets = [2, 0], sizes = [16, 128], strides = [1, 1]} : vector<22x128xf32> to vector<16x128xf32>
    %761 = vector.broadcast %70 : f32 to vector<16x128xf32>
    %762 = arith.mulf %761, %760 : vector<16x128xf32>
    %763 = arith.addf %759, %762 : vector<16x128xf32>
    %764 = vector.extract_strided_slice %751 {offsets = [3, 0], sizes = [16, 128], strides = [1, 1]} : vector<22x128xf32> to vector<16x128xf32>
    %765 = vector.broadcast %77 : f32 to vector<16x128xf32>
    %766 = arith.mulf %765, %764 : vector<16x128xf32>
    %767 = arith.addf %763, %766 : vector<16x128xf32>
    %768 = vector.extract_strided_slice %751 {offsets = [4, 0], sizes = [16, 128], strides = [1, 1]} : vector<22x128xf32> to vector<16x128xf32>
    %769 = vector.broadcast %84 : f32 to vector<16x128xf32>
    %770 = arith.mulf %769, %768 : vector<16x128xf32>
    %771 = arith.addf %767, %770 : vector<16x128xf32>
    %772 = vector.extract_strided_slice %751 {offsets = [5, 0], sizes = [16, 128], strides = [1, 1]} : vector<22x128xf32> to vector<16x128xf32>
    %773 = vector.broadcast %91 : f32 to vector<16x128xf32>
    %774 = arith.mulf %773, %772 : vector<16x128xf32>
    %775 = arith.addf %771, %774 : vector<16x128xf32>
    %776 = vector.extract_strided_slice %751 {offsets = [6, 0], sizes = [16, 128], strides = [1, 1]} : vector<22x128xf32> to vector<16x128xf32>
    %777 = vector.broadcast %98 : f32 to vector<16x128xf32>
    %778 = arith.mulf %777, %776 : vector<16x128xf32>
    %779 = arith.addf %775, %778 : vector<16x128xf32>
    %c2_i32_55 = arith.constant 2 : i32
    %780 = tpu.dynamic_rotate %750 by %c2_i32_55 dim 1 : vector<22x128xf32>, i32 -> vector<22x128xf32>
    %781 = vector.extract_strided_slice %780 {offsets = [0, 0], sizes = [16, 128], strides = [1, 1]} : vector<22x128xf32> to vector<16x128xf32>
    %782 = vector.broadcast %57 : f32 to vector<16x128xf32>
    %783 = arith.mulf %782, %781 : vector<16x128xf32>
    %784 = arith.addf %779, %783 : vector<16x128xf32>
    %785 = vector.extract_strided_slice %780 {offsets = [1, 0], sizes = [16, 128], strides = [1, 1]} : vector<22x128xf32> to vector<16x128xf32>
    %786 = vector.broadcast %64 : f32 to vector<16x128xf32>
    %787 = arith.mulf %786, %785 : vector<16x128xf32>
    %788 = arith.addf %784, %787 : vector<16x128xf32>
    %789 = vector.extract_strided_slice %780 {offsets = [2, 0], sizes = [16, 128], strides = [1, 1]} : vector<22x128xf32> to vector<16x128xf32>
    %790 = vector.broadcast %71 : f32 to vector<16x128xf32>
    %791 = arith.mulf %790, %789 : vector<16x128xf32>
    %792 = arith.addf %788, %791 : vector<16x128xf32>
    %793 = vector.extract_strided_slice %780 {offsets = [3, 0], sizes = [16, 128], strides = [1, 1]} : vector<22x128xf32> to vector<16x128xf32>
    %794 = vector.broadcast %78 : f32 to vector<16x128xf32>
    %795 = arith.mulf %794, %793 : vector<16x128xf32>
    %796 = arith.addf %792, %795 : vector<16x128xf32>
    %797 = vector.extract_strided_slice %780 {offsets = [4, 0], sizes = [16, 128], strides = [1, 1]} : vector<22x128xf32> to vector<16x128xf32>
    %798 = vector.broadcast %85 : f32 to vector<16x128xf32>
    %799 = arith.mulf %798, %797 : vector<16x128xf32>
    %800 = arith.addf %796, %799 : vector<16x128xf32>
    %801 = vector.extract_strided_slice %780 {offsets = [5, 0], sizes = [16, 128], strides = [1, 1]} : vector<22x128xf32> to vector<16x128xf32>
    %802 = vector.broadcast %92 : f32 to vector<16x128xf32>
    %803 = arith.mulf %802, %801 : vector<16x128xf32>
    %804 = arith.addf %800, %803 : vector<16x128xf32>
    %805 = vector.extract_strided_slice %780 {offsets = [6, 0], sizes = [16, 128], strides = [1, 1]} : vector<22x128xf32> to vector<16x128xf32>
    %806 = vector.broadcast %99 : f32 to vector<16x128xf32>
    %807 = arith.mulf %806, %805 : vector<16x128xf32>
    %808 = arith.addf %804, %807 : vector<16x128xf32>
    %c1_i32_56 = arith.constant 1 : i32
    %809 = tpu.dynamic_rotate %750 by %c1_i32_56 dim 1 : vector<22x128xf32>, i32 -> vector<22x128xf32>
    %810 = vector.extract_strided_slice %809 {offsets = [0, 0], sizes = [16, 128], strides = [1, 1]} : vector<22x128xf32> to vector<16x128xf32>
    %811 = vector.broadcast %58 : f32 to vector<16x128xf32>
    %812 = arith.mulf %811, %810 : vector<16x128xf32>
    %813 = arith.addf %808, %812 : vector<16x128xf32>
    %814 = vector.extract_strided_slice %809 {offsets = [1, 0], sizes = [16, 128], strides = [1, 1]} : vector<22x128xf32> to vector<16x128xf32>
    %815 = vector.broadcast %65 : f32 to vector<16x128xf32>
    %816 = arith.mulf %815, %814 : vector<16x128xf32>
    %817 = arith.addf %813, %816 : vector<16x128xf32>
    %818 = vector.extract_strided_slice %809 {offsets = [2, 0], sizes = [16, 128], strides = [1, 1]} : vector<22x128xf32> to vector<16x128xf32>
    %819 = vector.broadcast %72 : f32 to vector<16x128xf32>
    %820 = arith.mulf %819, %818 : vector<16x128xf32>
    %821 = arith.addf %817, %820 : vector<16x128xf32>
    %822 = vector.extract_strided_slice %809 {offsets = [3, 0], sizes = [16, 128], strides = [1, 1]} : vector<22x128xf32> to vector<16x128xf32>
    %823 = vector.broadcast %79 : f32 to vector<16x128xf32>
    %824 = arith.mulf %823, %822 : vector<16x128xf32>
    %825 = arith.addf %821, %824 : vector<16x128xf32>
    %826 = vector.extract_strided_slice %809 {offsets = [4, 0], sizes = [16, 128], strides = [1, 1]} : vector<22x128xf32> to vector<16x128xf32>
    %827 = vector.broadcast %86 : f32 to vector<16x128xf32>
    %828 = arith.mulf %827, %826 : vector<16x128xf32>
    %829 = arith.addf %825, %828 : vector<16x128xf32>
    %830 = vector.extract_strided_slice %809 {offsets = [5, 0], sizes = [16, 128], strides = [1, 1]} : vector<22x128xf32> to vector<16x128xf32>
    %831 = vector.broadcast %93 : f32 to vector<16x128xf32>
    %832 = arith.mulf %831, %830 : vector<16x128xf32>
    %833 = arith.addf %829, %832 : vector<16x128xf32>
    %834 = vector.extract_strided_slice %809 {offsets = [6, 0], sizes = [16, 128], strides = [1, 1]} : vector<22x128xf32> to vector<16x128xf32>
    %835 = vector.broadcast %100 : f32 to vector<16x128xf32>
    %836 = arith.mulf %835, %834 : vector<16x128xf32>
    %837 = arith.addf %833, %836 : vector<16x128xf32>
    %838 = vector.extract_strided_slice %750 {offsets = [0, 0], sizes = [16, 128], strides = [1, 1]} : vector<22x128xf32> to vector<16x128xf32>
    %839 = vector.broadcast %59 : f32 to vector<16x128xf32>
    %840 = arith.mulf %839, %838 : vector<16x128xf32>
    %841 = arith.addf %837, %840 : vector<16x128xf32>
    %842 = vector.extract_strided_slice %750 {offsets = [1, 0], sizes = [16, 128], strides = [1, 1]} : vector<22x128xf32> to vector<16x128xf32>
    %843 = vector.broadcast %66 : f32 to vector<16x128xf32>
    %844 = arith.mulf %843, %842 : vector<16x128xf32>
    %845 = arith.addf %841, %844 : vector<16x128xf32>
    %846 = vector.extract_strided_slice %750 {offsets = [2, 0], sizes = [16, 128], strides = [1, 1]} : vector<22x128xf32> to vector<16x128xf32>
    %847 = vector.broadcast %73 : f32 to vector<16x128xf32>
    %848 = arith.mulf %847, %846 : vector<16x128xf32>
    %849 = arith.addf %845, %848 : vector<16x128xf32>
    %850 = vector.extract_strided_slice %750 {offsets = [3, 0], sizes = [16, 128], strides = [1, 1]} : vector<22x128xf32> to vector<16x128xf32>
    %851 = vector.broadcast %80 : f32 to vector<16x128xf32>
    %852 = arith.mulf %851, %850 : vector<16x128xf32>
    %853 = arith.addf %849, %852 : vector<16x128xf32>
    %854 = vector.extract_strided_slice %750 {offsets = [4, 0], sizes = [16, 128], strides = [1, 1]} : vector<22x128xf32> to vector<16x128xf32>
    %855 = vector.broadcast %87 : f32 to vector<16x128xf32>
    %856 = arith.mulf %855, %854 : vector<16x128xf32>
    %857 = arith.addf %853, %856 : vector<16x128xf32>
    %858 = vector.extract_strided_slice %750 {offsets = [5, 0], sizes = [16, 128], strides = [1, 1]} : vector<22x128xf32> to vector<16x128xf32>
    %859 = vector.broadcast %94 : f32 to vector<16x128xf32>
    %860 = arith.mulf %859, %858 : vector<16x128xf32>
    %861 = arith.addf %857, %860 : vector<16x128xf32>
    %862 = vector.extract_strided_slice %750 {offsets = [6, 0], sizes = [16, 128], strides = [1, 1]} : vector<22x128xf32> to vector<16x128xf32>
    %863 = vector.broadcast %101 : f32 to vector<16x128xf32>
    %864 = arith.mulf %863, %862 : vector<16x128xf32>
    %865 = arith.addf %861, %864 : vector<16x128xf32>
    %c127_i32_57 = arith.constant 127 : i32
    %866 = tpu.dynamic_rotate %750 by %c127_i32_57 dim 1 : vector<22x128xf32>, i32 -> vector<22x128xf32>
    %867 = vector.extract_strided_slice %866 {offsets = [0, 0], sizes = [16, 128], strides = [1, 1]} : vector<22x128xf32> to vector<16x128xf32>
    %868 = vector.broadcast %60 : f32 to vector<16x128xf32>
    %869 = arith.mulf %868, %867 : vector<16x128xf32>
    %870 = arith.addf %865, %869 : vector<16x128xf32>
    %871 = vector.extract_strided_slice %866 {offsets = [1, 0], sizes = [16, 128], strides = [1, 1]} : vector<22x128xf32> to vector<16x128xf32>
    %872 = vector.broadcast %67 : f32 to vector<16x128xf32>
    %873 = arith.mulf %872, %871 : vector<16x128xf32>
    %874 = arith.addf %870, %873 : vector<16x128xf32>
    %875 = vector.extract_strided_slice %866 {offsets = [2, 0], sizes = [16, 128], strides = [1, 1]} : vector<22x128xf32> to vector<16x128xf32>
    %876 = vector.broadcast %74 : f32 to vector<16x128xf32>
    %877 = arith.mulf %876, %875 : vector<16x128xf32>
    %878 = arith.addf %874, %877 : vector<16x128xf32>
    %879 = vector.extract_strided_slice %866 {offsets = [3, 0], sizes = [16, 128], strides = [1, 1]} : vector<22x128xf32> to vector<16x128xf32>
    %880 = vector.broadcast %81 : f32 to vector<16x128xf32>
    %881 = arith.mulf %880, %879 : vector<16x128xf32>
    %882 = arith.addf %878, %881 : vector<16x128xf32>
    %883 = vector.extract_strided_slice %866 {offsets = [4, 0], sizes = [16, 128], strides = [1, 1]} : vector<22x128xf32> to vector<16x128xf32>
    %884 = vector.broadcast %88 : f32 to vector<16x128xf32>
    %885 = arith.mulf %884, %883 : vector<16x128xf32>
    %886 = arith.addf %882, %885 : vector<16x128xf32>
    %887 = vector.extract_strided_slice %866 {offsets = [5, 0], sizes = [16, 128], strides = [1, 1]} : vector<22x128xf32> to vector<16x128xf32>
    %888 = vector.broadcast %95 : f32 to vector<16x128xf32>
    %889 = arith.mulf %888, %887 : vector<16x128xf32>
    %890 = arith.addf %886, %889 : vector<16x128xf32>
    %891 = vector.extract_strided_slice %866 {offsets = [6, 0], sizes = [16, 128], strides = [1, 1]} : vector<22x128xf32> to vector<16x128xf32>
    %892 = vector.broadcast %102 : f32 to vector<16x128xf32>
    %893 = arith.mulf %892, %891 : vector<16x128xf32>
    %894 = arith.addf %890, %893 : vector<16x128xf32>
    %c126_i32_58 = arith.constant 126 : i32
    %895 = tpu.dynamic_rotate %750 by %c126_i32_58 dim 1 : vector<22x128xf32>, i32 -> vector<22x128xf32>
    %896 = vector.extract_strided_slice %895 {offsets = [0, 0], sizes = [16, 128], strides = [1, 1]} : vector<22x128xf32> to vector<16x128xf32>
    %897 = vector.broadcast %61 : f32 to vector<16x128xf32>
    %898 = arith.mulf %897, %896 : vector<16x128xf32>
    %899 = arith.addf %894, %898 : vector<16x128xf32>
    %900 = vector.extract_strided_slice %895 {offsets = [1, 0], sizes = [16, 128], strides = [1, 1]} : vector<22x128xf32> to vector<16x128xf32>
    %901 = vector.broadcast %68 : f32 to vector<16x128xf32>
    %902 = arith.mulf %901, %900 : vector<16x128xf32>
    %903 = arith.addf %899, %902 : vector<16x128xf32>
    %904 = vector.extract_strided_slice %895 {offsets = [2, 0], sizes = [16, 128], strides = [1, 1]} : vector<22x128xf32> to vector<16x128xf32>
    %905 = vector.broadcast %75 : f32 to vector<16x128xf32>
    %906 = arith.mulf %905, %904 : vector<16x128xf32>
    %907 = arith.addf %903, %906 : vector<16x128xf32>
    %908 = vector.extract_strided_slice %895 {offsets = [3, 0], sizes = [16, 128], strides = [1, 1]} : vector<22x128xf32> to vector<16x128xf32>
    %909 = vector.broadcast %82 : f32 to vector<16x128xf32>
    %910 = arith.mulf %909, %908 : vector<16x128xf32>
    %911 = arith.addf %907, %910 : vector<16x128xf32>
    %912 = vector.extract_strided_slice %895 {offsets = [4, 0], sizes = [16, 128], strides = [1, 1]} : vector<22x128xf32> to vector<16x128xf32>
    %913 = vector.broadcast %89 : f32 to vector<16x128xf32>
    %914 = arith.mulf %913, %912 : vector<16x128xf32>
    %915 = arith.addf %911, %914 : vector<16x128xf32>
    %916 = vector.extract_strided_slice %895 {offsets = [5, 0], sizes = [16, 128], strides = [1, 1]} : vector<22x128xf32> to vector<16x128xf32>
    %917 = vector.broadcast %96 : f32 to vector<16x128xf32>
    %918 = arith.mulf %917, %916 : vector<16x128xf32>
    %919 = arith.addf %915, %918 : vector<16x128xf32>
    %920 = vector.extract_strided_slice %895 {offsets = [6, 0], sizes = [16, 128], strides = [1, 1]} : vector<22x128xf32> to vector<16x128xf32>
    %921 = vector.broadcast %103 : f32 to vector<16x128xf32>
    %922 = arith.mulf %921, %920 : vector<16x128xf32>
    %923 = arith.addf %919, %922 : vector<16x128xf32>
    %c125_i32_59 = arith.constant 125 : i32
    %924 = tpu.dynamic_rotate %750 by %c125_i32_59 dim 1 : vector<22x128xf32>, i32 -> vector<22x128xf32>
    %925 = vector.extract_strided_slice %924 {offsets = [0, 0], sizes = [16, 128], strides = [1, 1]} : vector<22x128xf32> to vector<16x128xf32>
    %926 = vector.broadcast %62 : f32 to vector<16x128xf32>
    %927 = arith.mulf %926, %925 : vector<16x128xf32>
    %928 = arith.addf %923, %927 : vector<16x128xf32>
    %929 = vector.extract_strided_slice %924 {offsets = [1, 0], sizes = [16, 128], strides = [1, 1]} : vector<22x128xf32> to vector<16x128xf32>
    %930 = vector.broadcast %69 : f32 to vector<16x128xf32>
    %931 = arith.mulf %930, %929 : vector<16x128xf32>
    %932 = arith.addf %928, %931 : vector<16x128xf32>
    %933 = vector.extract_strided_slice %924 {offsets = [2, 0], sizes = [16, 128], strides = [1, 1]} : vector<22x128xf32> to vector<16x128xf32>
    %934 = vector.broadcast %76 : f32 to vector<16x128xf32>
    %935 = arith.mulf %934, %933 : vector<16x128xf32>
    %936 = arith.addf %932, %935 : vector<16x128xf32>
    %937 = vector.extract_strided_slice %924 {offsets = [3, 0], sizes = [16, 128], strides = [1, 1]} : vector<22x128xf32> to vector<16x128xf32>
    %938 = vector.broadcast %83 : f32 to vector<16x128xf32>
    %939 = arith.mulf %938, %937 : vector<16x128xf32>
    %940 = arith.addf %936, %939 : vector<16x128xf32>
    %941 = vector.extract_strided_slice %924 {offsets = [4, 0], sizes = [16, 128], strides = [1, 1]} : vector<22x128xf32> to vector<16x128xf32>
    %942 = vector.broadcast %90 : f32 to vector<16x128xf32>
    %943 = arith.mulf %942, %941 : vector<16x128xf32>
    %944 = arith.addf %940, %943 : vector<16x128xf32>
    %945 = vector.extract_strided_slice %924 {offsets = [5, 0], sizes = [16, 128], strides = [1, 1]} : vector<22x128xf32> to vector<16x128xf32>
    %946 = vector.broadcast %97 : f32 to vector<16x128xf32>
    %947 = arith.mulf %946, %945 : vector<16x128xf32>
    %948 = arith.addf %944, %947 : vector<16x128xf32>
    %949 = vector.extract_strided_slice %924 {offsets = [6, 0], sizes = [16, 128], strides = [1, 1]} : vector<22x128xf32> to vector<16x128xf32>
    %950 = vector.broadcast %104 : f32 to vector<16x128xf32>
    %951 = arith.mulf %950, %949 : vector<16x128xf32>
    %952 = arith.addf %948, %951 : vector<16x128xf32>
    %cst_60 = arith.constant 0.000000e+00 : f32
    %953 = vector.broadcast %cst_60 : f32 to vector<16x128xf32>
    %954 = arith.subf %953, %952 : vector<16x128xf32>
    %955 = math.exp %954 : vector<16x128xf32>
    %cst_61 = arith.constant 1.000000e+00 : f32
    %956 = vector.broadcast %cst_61 : f32 to vector<16x128xf32>
    %957 = arith.addf %956, %955 : vector<16x128xf32>
    %cst_62 = arith.constant 1.000000e+00 : f32
    %958 = vector.broadcast %cst_62 : f32 to vector<16x128xf32>
    %959 = arith.divf %958, %957 : vector<16x128xf32>
    %c1_63 = arith.constant 1 : index
    %c0_64 = arith.constant 0 : index
    %c0_65 = arith.constant 0 : index
    %960 = vector.load %arg3[%c1_63, %c0_64, %c0_65] : memref<2x16x128xf32, #tpu.memory_space<vmem>>, vector<1x16x128xf32>
    %961 = vector.shape_cast %960 : vector<1x16x128xf32> to vector<16x128xf32>
    %962 = vector.shape_cast %959 : vector<16x128xf32> to vector<1x16x128xf32>
    tpu.vector_store %arg3[%c1_63, %c0_64, %c0_65], %962 {strides = array<i32>} : memref<2x16x128xf32, #tpu.memory_space<vmem>>, vector<1x16x128xf32>,
    return
  }
  func.func @transform_0(%arg0: i32) -> i32 {
    %c0_i32 = arith.constant 0 : i32
    %c0_i32_0 = arith.constant 0 : i32
    return %c0_i32 : i32
  }
  func.func @transform_1(%arg0: i32) -> (i32, i32, i32, i32) {
    %c0_i32 = arith.constant 0 : i32
    %c0_i32_0 = arith.constant 0 : i32
    %c0_i32_1 = arith.constant 0 : i32
    %c0_i32_2 = arith.constant 0 : i32
    return %arg0, %c0_i32, %c0_i32_0, %c0_i32_1 : i32, i32, i32, i32
  }
  func.func @transform_2(%arg0: i32) -> (i32, i32, i32) {
    %c0_i32 = arith.constant 0 : i32
    %c0_i32_0 = arith.constant 0 : i32
    %c0_i32_1 = arith.constant 0 : i32
    return %arg0, %c0_i32, %c0_i32_0 : i32, i32, i32
  }
}

</mosaic_0001>

<bundles_post_ra>
// kernel: tpu_custom_call.1
= control target key start
LH: loop header
LB: loop body
LE: loop exit
PB: predicated region body
PF: predicated region fallthrough
CT: control target
= control target key end

     0   :  { %7 = vsyncpa [#allocation6], 0  ;;  %s6020_s0 = inlined_call_operand.hbm [shape: f32[98], index: 0, kind: input, shape index: {}]   ;;  %s6021_s1 = inlined_call_operand.hbm [shape: f32[2,4,16,16], index: 1, kind: input, shape index: {}]   ;;  %s6022_s2 = inlined_call_operand.hbm [shape: f32[2,16,128], index: 2, kind: output, shape index: {}]  }
   0x1   :  { %8 = vsyncpa [#allocation4], 0 }
   0x2   :  { %9 = vsyncpa [#allocation5], 0  ;;  %s3349_s9 = smov [#allocation3]   ;;  %s3350_s12 = smov [#allocation7]  }
   0x3   :  { %17 = dma.hbm_to_smem %s6020_s0, 16, %s3349_s9, [#allocation6]  }
   0x4   :  { %s23_s13 = sshll.u32 %s3350_s12, 4  ;;  %s24_s13 = int_to_ptr.vmem [resolvable:$true] %s23_s13 }
   0x5   :  { %s3311_s14 = scalar_lea.vmem %s24_s13, 2048  ;;  %p3316_p1 = scmp.lt.s32.totalorder %s24_s13, %s24_s13 }
   0x6   :  { %p3312_p0 = scmp.ne.s32.totalorder %s24_s13, %s3311_s14  ;;  %p3317_p2 = scmp.lt.s32.totalorder %s3311_s14, %s3311_s14 }
   0x8   :  { %p3318_p3 = por %p3317_p2, %p3316_p1 }
   0xa   :  { %p3319_p4 = pnand %p3318_p3, %p3312_p0 }
   0xc   :  { %3322 = shalt.err (!%p3319_p4)
}
   0xd   :  { %s3351_s15 = smov 128   ;;  %s3352_s16 = smov 8  }
   0xe   :  { %29 = dma.hbm_to_vmem [thread:$0]  %s6021_s1, 2048, %s24_s13, [#allocation4], %s3351_s15, %s3351_s15, %s3352_s16  }
   0xf   :  { %3343 = dma.done.wait [#allocation6], 16  }
  0x10   :  { %3344 = vsyncadd [#allocation6], 4294967280 }
  0x11   :  { %3345 = dma.done.wait [#allocation4], 2048  }
  0x12   :  { %3346 = vsyncadd [#allocation4], 4294965248 }
  0x13   :  { %36 = sfence }
  0x14   :  { %v43_v0 = vld [vmem:[#allocation7] sm:$0xff]  ;;  %v45_v1 = vld [vmem:[#allocation7 + $0x10] sm:$0xff]  ;;  %vm59_vm0 = vcmask 130048   ;;  %v3353_v3 = vmov 0.0   ;;  %v44_v8 = vld [vmem:[#allocation7 + $0x8] sm:$0xff]  ;;  %s3354_s0 = smov 3  }
  0x15   :  { %v47_v2 = vld [vmem:[#allocation7 + $0x20] sm:$0xff]  ;;  %37 = vst [vmem:[#allocation2] sm:$0xff] %v3353_v3  ;;  %38 = vst [vmem:[#allocation2 + $0x8] sm:$0xff] %v3353_v3  ;;  %v49_v4 = vld [vmem:[#allocation7 + $0x30] sm:$0xff]  ;;  %v60_v5 = vsel %vm59_vm0, %v43_v0, 0.0  ;;  %v61_v6 = vsel %vm59_vm0, %v45_v1, 0.0 }
  0x16   :  { %v63_v7 = vsel %vm59_vm0, %v47_v2, 0.0  ;;  %39 = vst [vmem:[#allocation2 + $0x10] sm:$0x3f] %v3353_v3  ;;  %40 = vst [vmem:[#allocation2 + $0x18] sm:$0xff] %v3353_v3  ;;  %v46_v9 = vld [vmem:[#allocation7 + $0x18] sm:$0xff]  ;;  %v62_v10 = vadd.f32 %v61_v6, %v60_v5  ;;  %v65_v11 = vsel %vm59_vm0, %v49_v4, 0.0 }
  0x17   :  { %41 = vst [vmem:[#allocation2 + $0x20] sm:$0xff] %v3353_v3  ;;  %42 = vst [vmem:[#allocation2 + $0x28] sm:$0x3f] %v3353_v3  ;;  %v48_v12 = vld [vmem:[#allocation7 + $0x28] sm:$0xff]  ;;  %v50_v13 = vld [vmem:[#allocation7 + $0x38] sm:$0xff]  ;;  %v67_v14 = vsel %vm59_vm0, %v44_v8, 0.0 }
  0x18   :  { %v68_v15 = vsel %vm59_vm0, %v46_v9, 0.0  ;;  %v51_v16 = vld [vmem:[#allocation7 + $0x40] sm:$0xff]  ;;  %v70_v18 = vsel %vm59_vm0, %v48_v12, 0.0  ;;  %v72_v19 = vsel %vm59_vm0, %v50_v13, 0.0  ;;  %v52_v20 = vld [vmem:[#allocation7 + $0x48] sm:$0xff]  ;;  %v53_v21 = vld [vmem:[#allocation7 + $0x50] sm:$0xff]  ;;  %v64_v24 = vadd.f32 %v63_v7, %v62_v10 }
  0x19   :  { %v69_v17 = vadd.f32 %v68_v15, %v67_v14  ;;  %v54_v22 = vld [vmem:[#allocation7 + $0x58] sm:$0xff]  ;;  %v74_v23 = vsel %vm59_vm0, %v51_v16, 0.0  ;;  %v55_v25 = vld [vmem:[#allocation7 + $0x60] sm:$0xff]  ;;  %v56_v26 = vld [vmem:[#allocation7 + $0x68] sm:$0xff]  ;;  %v75_v28 = vsel %vm59_vm0, %v53_v21, 0.0  ;;  %v81_v29 = vsel %vm59_vm0, %v52_v20, 0.0 }
  0x1a   :  { %v57_v27 = vld [vmem:[#allocation7 + $0x70] sm:$0xff]  ;;  %v82_v30 = vsel %vm59_vm0, %v54_v22, 0.0  ;;  %v58_v32 = vld [vmem:[#allocation7 + $0x78] sm:$0xff]  ;;  %v76_v33 = vadd.f32 %v75_v28, %v74_v23  ;;  %v77_v34 = vsel %vm59_vm0, %v55_v25, 0.0  ;;  %v66_v36 = vadd.f32 %v65_v11, %v64_v24  ;;  %s3355_s1 = smov 2   ;;  %s3356_s19 = smov 1  }
  0x1b   :  { %v71_v31 = vadd.f32 %v70_v18, %v69_v17  ;;  %v79_v35 = vsel %vm59_vm0, %v57_v27, 0.0  ;;  %v83_v37 = vadd.f32 %v82_v30, %v81_v29  ;;  %v84_v38 = vsel %vm59_vm0, %v56_v26, 0.0  ;;  %s3357_s20 = smov 127   ;;  %s3358_s21 = smov 126  }
  0x1c   :  { %v86_v39 = vsel %vm59_vm0, %v58_v32, 0.0  ;;  %v78_v41 = vadd.f32 %v77_v34, %v76_v33  ;;  %v93_v42 = vsel %vm59_vm0, %v43_v0, -inf  ;;  %v94_v43 = vsel %vm59_vm0, %v45_v1, -inf  ;;  %s3359_s22 = smov 125   ;;  %s3505_s23 = sld [smem:[#allocation3]] }
  0x1d   :  { %v73_v40 = vadd.f32 %v72_v19, %v71_v31  ;;  %v89_v44 = vmul.f32 0.25, %v66_v36  ;;  %v85_v45 = vadd.f32 %v84_v38, %v83_v37  ;;  %v95_v46 = vmax.f32 %v93_v42, %v94_v43  ;;  %s3507_s24 = sld [smem:[#allocation3 + $0x7]] }
  0x1e   :  { %v96_v47 = vsel %vm59_vm0, %v47_v2, -inf  ;;  %v98_v49 = vsel %vm59_vm0, %v49_v4, -inf  ;;  %v100_v50 = vsel %vm59_vm0, %v44_v8, -inf  ;;  %v101_v52 = vsel %vm59_vm0, %v46_v9, -inf  ;;  %s3509_s25 = sld [smem:[#allocation3 + $0xe]] }
  0x1f   :  { %v90_v48 = vmul.f32 0.25, %v73_v40  ;;  %219 = vst.msk [vmem:[#allocation2 + $0x3] sm:$0xff] %vm59_vm0, %v89_v44  ;;  %v97_v51 = vmax.f32 %v95_v46, %v96_v47  ;;  %v103_v53 = vsel %vm59_vm0, %v48_v12, -inf  ;;  %v80_v54 = vadd.f32 %v79_v35, %v78_v41  ;;  %s3511_s26 = sld [smem:[#allocation3 + $0x15]] }
  0x20   :  { %v87_v55 = vadd.f32 %v86_v39, %v85_v45  ;;  %v102_v56 = vmax.f32 %v100_v50, %v101_v52  ;;  %v107_v57 = vsel %vm59_vm0, %v51_v16, -inf  ;;  %v105_v59 = vsel %vm59_vm0, %v50_v13, -inf  ;;  %s3517_s27 = sld [smem:[#allocation3 + $0x1c]] }
  0x21   :  { %220 = vst.msk [vmem:[#allocation2 + $0xb] sm:$0xff] %vm59_vm0, %v90_v48  ;;  %v99_v58 = vmax.f32 %v97_v51, %v98_v49  ;;  %v108_v60 = vsel %vm59_vm0, %v53_v21, -inf  ;;  %v114_v63 = vsel %vm59_vm0, %v52_v20, -inf  ;;  %v110_v0 = vsel %vm59_vm0, %v55_v25, -inf  ;;  %s3519_s28 = sld [smem:[#allocation3 + $0x23]] }
  0x22   :  { %v104_v61 = vmax.f32 %v102_v56, %v103_v53  ;;  %v109_v62 = vmax.f32 %v107_v57, %v108_v60  ;;  %v115_v1 = vsel %vm59_vm0, %v54_v22, -inf  ;;  %v117_v2 = vsel %vm59_vm0, %v56_v26, -inf  ;;  %s3521_s29 = sld [smem:[#allocation3 + $0x2a]] }
  0x23   :  { %222 = vst.msk [vmem:[#allocation2 + $0x1b] sm:$0xff] %vm59_vm0, %v99_v58  ;;  %v91_v3 = vmul.f32 0.25, %v80_v54  ;;  %v92_v4 = vmul.f32 0.25, %v87_v55  ;;  %v116_v6 = vmax.f32 %v114_v63, %v115_v1  ;;  %v112_v12 = vsel %vm59_vm0, %v57_v27, -inf  ;;  %s3523_s30 = sld [smem:[#allocation3 + $0x1]] }
  0x24   :  { %v106_v5 = vmax.f32 %v104_v61, %v105_v59  ;;  %v111_v8 = vmax.f32 %v109_v62, %v110_v0  ;;  %v119_v13 = vsel %vm59_vm0, %v58_v32, -inf  ;;  %s3529_s3 = sld [smem:[#allocation3 + $0x8]]  ;;  %v3568_v25 = vstv %s3505_s23 }
  0x25   :  { %v118_v9 = vmax.f32 %v116_v6, %v117_v2  ;;  %s3531_s4 = sld [smem:[#allocation3 + $0xf]]  ;;  %v3575_v27 = vstv %s3507_s24  ;;  %v3578_v28 = vstv %s3509_s25  ;;  %v3581_v29 = vstv %s3511_s26 }
  0x26   :  { %v3418_v7 = vld [vmem:[#allocation2] sm:$0xff]  ;;  %223 = vst.msk [vmem:[#allocation2 + $0x23] sm:$0xff] %vm59_vm0, %v106_v5  ;;  %v113_v14 = vmax.f32 %v111_v8, %v112_v12  ;;  %s3533_s5 = sld [smem:[#allocation3 + $0x16]]  ;;  %v3584_v30 = vstv %s3517_s27  ;;  %vm245_vm1 = vcmask 1046528   ;;  %vm262_vm2 = vcmask 1045504  }
  0x27   :  { %227 = vrot.lane.b32.xlu0 %v3418_v7, %s3354_s0  ;;  %v120_v15 = vmax.f32 %v118_v9, %v119_v13  ;;  %s3176_s6 = sld [smem:[#allocation3 + $0xa]]  ;;  %v3589_v31 = vstv %s3519_s28  ;;  %vm279_vm3 = vcmask 1044480   ;;  %vm296_vm4 = vcmask 1043456  }
  0x28   :  { %v3423_v10 = vld [vmem:[#allocation2 + $0x10] sm:$0x3f]  ;;  %v3425_v11 = vld [vmem:[#allocation2 + $0x8] sm:$0xff]  ;;  %s3539_s7 = sld [smem:[#allocation3 + $0x1d]]  ;;  %v3592_v32 = vstv %s3521_s29  ;;  %vm313_vm5 = vcmask 1042432   ;;  %vm330_vm6 = vcmask 1041408  }
  0x29   :  { %231 = vrot.lane.b32.xlu1 %v3423_v10, %s3354_s0  ;;  %1736 = vst.msk [vmem:[#allocation2 + $0x3] sm:$0xff] %vm59_vm0, %v91_v3  ;;  %1737 = vst.msk [vmem:[#allocation2 + $0xb] sm:$0xff] %vm59_vm0, %v92_v4  ;;  %s3541_s8 = sld [smem:[#allocation3 + $0x24]]  ;;  %v3599_v35 = vstv %s3523_s30 }
  0x2a   :  { %v3435_v16 = vld [vmem:[#allocation2 + $0x18] sm:$0xff]  ;;  %s3543_s9 = sld [smem:[#allocation3 + $0x2b]]  ;;  %v3602_v36 = vstv %s3529_s3 }
  0x2b   :  { %229 = vrot.lane.b32.xlu0 %v3425_v11, %s3354_s0  ;;  %6035 = vst [vmem:[#allocation12_spill] sm:$0xff] %v3435_v16  ;;  %s3545_s10 = sld [smem:[#allocation3 + $0x2]]  ;;  %v3605_v37 = vstv %s3531_s4 }
  0x2c   :  { %s3551_s11 = sld [smem:[#allocation3 + $0x9]]  ;;  %v3613_v39 = vstv %s3533_s5 }
  0x2d   :  { %v3437_v17 = vld [vmem:[#allocation2 + $0x28] sm:$0x3f]  ;;  %v3439_v18 = vld [vmem:[#allocation2 + $0x20] sm:$0xff]  ;;  %s3557_s12 = sld [smem:[#allocation3 + $0x10]]  ;;  %v559_v24 = vstv %s3176_s6 }
  0x2e   :  { %1738 = vst.msk [vmem:[#allocation2 + $0x1b] sm:$0xff] %vm59_vm0, %v113_v14  ;;  %1739 = vst.msk [vmem:[#allocation2 + $0x23] sm:$0xff] %vm59_vm0, %v120_v15  ;;  %s3559_s13 = sld [smem:[#allocation3 + $0x17]]  ;;  %v561_v33 = vmul.f32 %v559_v24, %v3425_v11  ;;  %v562_v34 = vmul.f32 %v559_v24, %v3423_v10  ;;  %v560_v38 = vmul.f32 %v559_v24, %v3418_v7  ;;  %v3616_v40 = vstv %s3539_s7 }
  0x2f   :  { %s3561_s14 = sld [smem:[#allocation3 + $0x3]]  ;;  %v3619_v41 = vstv %s3541_s8 }
  0x30   :  { %v3443_v19 = vld [vmem:[#allocation2 + $0x8] sm:$0xff]  ;;  %v3445_v20 = vld [vmem:[#allocation2] sm:$0xff]  ;;  %v3451_v21 = vld [vmem:[#allocation2 + $0x10] sm:$0x3f]  ;;  %s3570_s17 = sld [smem:[#allocation3 + $0x1e]]  ;;  %v3622_v42 = vstv %s3543_s9  ;;  %v567_v47 = vrot.slane %v561_v33, 1 }
  0x31   :  { %1745 = vrot.lane.b32.xlu0 %v3443_v19, %s3354_s0  ;;  %1743 = vrot.lane.b32.xlu1 %v3445_v20, %s3354_s0  ;;  %s3586_s18 = sld [smem:[#allocation3 + $0x25]]  ;;  %v2048_v43 = vmul.f32 %v3443_v19, %v559_v24  ;;  %v2047_v44 = vmul.f32 %v3445_v20, %v559_v24  ;;  %v3627_v45 = vstv %s3545_s10  ;;  %v569_v48 = vrot.slane %v562_v34, 1 }
  0x32   :  { %s3596_s23 = sld [smem:[#allocation3 + $0x11]]  ;;  %v3630_v46 = vstv %s3551_s11  ;;  %v566_v51 = vrot.slane %v560_v38, 1  ;;  %v2049_v52 = vmul.f32 %v3451_v21, %v559_v24 }
  0x33   :  { %s3190_s24 = sld [smem:[#allocation3 + $0x18]]  ;;  %v3633_v49 = vstv %s3557_s12  ;;  %v2054_v56 = vrot.slane %v2048_v43, 1  ;;  %v2053_v57 = vrot.slane %v2047_v44, 1  ;;  %v3659_v60 = vsel %vm245_vm1, %v567_v47, %v569_v48 }
  0x34   :  { %v3642_v53 = vstv %s3559_s13  ;;  %s3647_s25 = sld [smem:[#allocation3 + $0x26]]  ;;  %6036 = vst [vmem:[#allocation13_spill] sm:$0xff] %v3659_v60  ;;  %v3669_v63 = vsel %vm245_vm1, %v566_v51, %v567_v47  ;;  %v2056_v1 = vrot.slane %v2049_v52, 1 }
  0x35   :  { %1747 = vrot.lane.b32.xlu1 %v3451_v21, %s3354_s0  ;;  %340 = vrot.lane.b32.xlu0 %v3418_v7, %s3355_s1  ;;  %v3553_v22 = vld [vmem:[#allocation2 + $0x20] sm:$0xff]  ;;  %v3555_v23 = vld [vmem:[#allocation2 + $0x18] sm:$0xff]  ;;  %v3572_v26 = vld [vmem:[#allocation2 + $0x28] sm:$0x3f]  ;;  %v554_v50 = vstv %s3561_s14  ;;  %s3664_s26 = sld [smem:[#allocation3 + $0x2d]]  ;;  %v3692_v8 = vsel %vm245_vm1, %v2053_v57, %v2054_v56 }
  0x36   :  { %v3645_v54 = vstv %s3570_s17  ;;  %v3656_v59 = vmul.f32 %v554_v50, %v3425_v11  ;;  %v3662_v61 = vmul.f32 %v554_v50, %v3418_v7  ;;  %v3672_v0 = vmul.f32 %v3445_v20, %v554_v50  ;;  %s3680_s27 = sld [smem:[#allocation3 + $0x2c]]  ;;  %6039 = vst [vmem:[#allocation16_spill] sm:$0xff] %v3692_v8 }
  0x37   :  { %v3650_v55 = vstv %s3586_s18  ;;  %v3683_v3 = vmul.f32 %v3443_v19, %v554_v50  ;;  %s3704_s28 = sld [smem:[#allocation3 + $0x4]]  ;;  %v3716_v34 = vsel %vm245_vm1, %v2054_v56, %v2056_v1 }
  0x38   :  { %v3653_v58 = vstv %s3596_s23  ;;  %6037 = vst [vmem:[#allocation14_spill] sm:$0xff] %v3672_v0  ;;  %6040 = vst [vmem:[#allocation17_spill] sm:$0xff] %v3716_v34  ;;  %s3718_s29 = sld [smem:[#allocation3 + $0xb]] }
  0x39   :  { %344 = vrot.lane.b32.xlu0 %v3423_v10, %s3355_s1  ;;  %342 = vrot.lane.b32.xlu1 %v3425_v11, %s3355_s1  ;;  %v3666_v62 = vstv %s3190_s24  ;;  %v2064_v2 = vmul.f32 %v3451_v21, %v3653_v58  ;;  %6038 = vst [vmem:[#allocation15_spill] sm:$0xff] %v3683_v3  ;;  %v577_v4 = vmul.f32 %v3653_v58, %v3425_v11  ;;  %s3735_s30 = sld [smem:[#allocation3 + $0x12]] }
  0x3a   :  { %v576_v6 = vmul.f32 %v3653_v58, %v3418_v7  ;;  %v593_v9 = vmul.f32 %v3666_v62, %v3425_v11  ;;  %v592_v12 = vmul.f32 %v3666_v62, %v3418_v7  ;;  %v578_v13 = vmul.f32 %v3653_v58, %v3423_v10  ;;  %s3766_s3 = sld [smem:[#allocation3 + $0x20]] }
  0x3b   :  { %v3702_v14 = vmul.f32 %v3443_v19, %v3653_v58  ;;  %v3711_v24 = vstv %s3647_s25  ;;  %v2071_v38 = vrot.slane %v2064_v2, 2  ;;  %v583_v47 = vrot.slane %v577_v4, 2  ;;  %s3771_s4 = sld [smem:[#allocation3 + $0x27]] }
  0x3c   :  { %v3722_v43 = vmul.f32 %v3711_v24, %v3425_v11  ;;  %v624_v44 = vmul.f32 %v3711_v24, %v3418_v7  ;;  %v3731_v48 = vstv %s3664_s26  ;;  %v582_v50 = vrot.slane %v576_v6, 2  ;;  %s3798_s5 = sld [smem:[#allocation3 + $0x2e]] }
  0x3d   :  { %1845 = vrot.lane.b32.xlu0 %v3443_v19, %s3355_s1  ;;  %1843 = vrot.lane.b32.xlu1 %v3445_v20, %s3355_s1  ;;  %v594_v51 = vmul.f32 %v3666_v62, %v3423_v10  ;;  %v599_v52 = vrot.slane %v593_v9, 3  ;;  %v641_v56 = vmul.f32 %v3731_v48, %v3425_v11  ;;  %v598_v57 = vrot.slane %v592_v12, 3  ;;  %s4367_s6 = sld [smem:[#allocation3 + $0x21]] }
  0x3e   :  { %v585_v1 = vrot.slane %v578_v13, 2  ;;  %v640_v6 = vmul.f32 %v3731_v48, %v3418_v7  ;;  %v6023_v3 = vrot.slane %v3702_v14, 2  ;;  %v631_v9 = vrot.slane %v3722_v43, 5  ;;  %s4373_s7 = sld [smem:[#allocation3 + $0x28]] }
  0x3f   :  { %v630_v8 = vrot.slane %v624_v44, 5  ;;  %v601_v0 = vrot.slane %v594_v51, 3  ;;  %v642_v12 = vmul.f32 %v3731_v48, %v3423_v10  ;;  %v2079_v13 = vmul.f32 %v3451_v21, %v3666_v62  ;;  %s4378_s8 = sld [smem:[#allocation3 + $0x2f]] }
  0x40   :  { %v3769_v43 = vsel %vm262_vm2, %v582_v50, %v583_v47  ;;  %v646_v44 = vrot.slane %v640_v6, 6  ;;  %v3780_v60 = vsel %vm262_vm2, %v583_v47, %v585_v1  ;;  %s4509_s9 = sld [smem:[#allocation3 + $0x6]] }
  0x41   :  { %1847 = vrot.lane.b32.xlu1 %v3451_v21, %s3355_s1  ;;  %447 = vrot.lane.b32.xlu0 %v3418_v7, %s3356_s19  ;;  %6042 = vst [vmem:[#allocation19_spill] sm:$0xff] %v3769_v43  ;;  %6045 = vst [vmem:[#allocation22_spill] sm:$0xff] %v3780_v60  ;;  %v3789_v50 = vsel %vm313_vm5, %v630_v8, %v631_v9  ;;  %v3792_v6 = vsel %vm279_vm3, %v599_v52, %v601_v0  ;;  %v649_v47 = vrot.slane %v642_v12, 6  ;;  %s4519_s10 = sld [smem:[#allocation3 + $0xd]] }
  0x42   :  { %6048 = vst [vmem:[#allocation25_spill] sm:$0xff] %v3789_v50  ;;  %6049 = vst [vmem:[#allocation26_spill] sm:$0xff] %v3792_v6  ;;  %v2109_v0 = vmul.f32 %v3451_v21, %v3711_v24  ;;  %v2078_v12 = vmul.f32 %v3443_v19, %v3666_v62  ;;  %v3826_v6 = vmul.f32 %v3443_v19, %v3731_v48  ;;  %s4525_s11 = sld [smem:[#allocation3 + $0x14]] }
  0x43   :  { %v2107_v50 = vmul.f32 %v3445_v20, %v3711_v24  ;;  %s4531_s12 = sld [smem:[#allocation3 + $0x1b]] }
  0x44   :  { %v2116_v60 = vrot.slane %v2109_v0, 5  ;;  %s4535_s13 = sld [smem:[#allocation3 + $0x22]] }
  0x45   :  { %451 = vrot.lane.b32.xlu0 %v3423_v10, %s3356_s19  ;;  %449 = vrot.lane.b32.xlu1 %v3425_v11, %s3356_s19  ;;  %v2113_v0 = vrot.slane %v2107_v50, 5  ;;  %s4541_s14 = sld [smem:[#allocation3 + $0x29]] }
  0x46   :  { %s4544_s17 = sld [smem:[#allocation3 + $0x30]] }
  0x47   :  { %s4671_s18 = sld [smem:[#allocation3 + $0x31]] }
  0x48   :  { %s4682_s23 = sld [smem:[#allocation3 + $0x38]] }
  0x49   :  { %1945 = vrot.lane.b32.xlu0 %v3443_v19, %s3356_s19  ;;  %1943 = vrot.lane.b32.xlu1 %v3445_v20, %s3356_s19  ;;  %s4690_s24 = sld [smem:[#allocation3 + $0x3f]] }
  0x4a   :  { %s4699_s25 = sld [smem:[#allocation3 + $0x4d]] }
  0x4b   :  { %s4705_s26 = sld [smem:[#allocation3 + $0x54]] }
  0x4d   :  { %1947 = vrot.lane.b32.xlu1 %v3451_v21, %s3356_s19  ;;  %655 = vrot.lane.b32.xlu0 %v3418_v7, %s3357_s20 }
  0x51   :  { %659 = vrot.lane.b32.xlu0 %v3423_v10, %s3357_s20  ;;  %657 = vrot.lane.b32.xlu1 %v3425_v11, %s3357_s20 }
  0x55   :  { %2139 = vrot.lane.b32.xlu0 %v3443_v19, %s3357_s20  ;;  %2137 = vrot.lane.b32.xlu1 %v3445_v20, %s3357_s20 }
  0x59   :  { %2141 = vrot.lane.b32.xlu1 %v3451_v21, %s3357_s20  ;;  %762 = vrot.lane.b32.xlu0 %v3418_v7, %s3358_s21 }
  0x5d   :  { %766 = vrot.lane.b32.xlu0 %v3423_v10, %s3358_s21  ;;  %764 = vrot.lane.b32.xlu1 %v3425_v11, %s3358_s21 }
  0x61   :  { %2239 = vrot.lane.b32.xlu0 %v3443_v19, %s3358_s21  ;;  %2237 = vrot.lane.b32.xlu1 %v3445_v20, %s3358_s21 }
  0x65   :  { %2241 = vrot.lane.b32.xlu1 %v3451_v21, %s3358_s21  ;;  %869 = vrot.lane.b32.xlu0 %v3418_v7, %s3359_s22 }
  0x69   :  { %873 = vrot.lane.b32.xlu0 %v3423_v10, %s3359_s22  ;;  %871 = vrot.lane.b32.xlu1 %v3425_v11, %s3359_s22 }
  0x6d   :  { %2339 = vrot.lane.b32.xlu0 %v3443_v19, %s3359_s22  ;;  %2337 = vrot.lane.b32.xlu1 %v3445_v20, %s3359_s22 }
  0x71   :  { %2341 = vrot.lane.b32.xlu1 %v3451_v21, %s3359_s22  ;;  %979 = vrot.lane.b32.xlu0 %v3435_v16, %s3354_s0 }
  0x75   :  { %983 = vrot.lane.b32.xlu0 %v3437_v17, %s3354_s0  ;;  %981 = vrot.lane.b32.xlu1 %v3439_v18, %s3354_s0 }
  0x79   :  { %2442 = vrot.lane.b32.xlu0 %v3553_v22, %s3354_s0  ;;  %2440 = vrot.lane.b32.xlu1 %v3555_v23, %s3354_s0 }
  0x7d   :  { %2444 = vrot.lane.b32.xlu1 %v3572_v26, %s3354_s0  ;;  %1086 = vrot.lane.b32.xlu0 %v3435_v16, %s3355_s1  ;;  %s3197_s0 = sld [smem:[#allocation3 + $0x1f]] }
  0x81   :  { %1090 = vrot.lane.b32.xlu0 %v3437_v17, %s3355_s1  ;;  %1088 = vrot.lane.b32.xlu1 %v3439_v18, %s3355_s1 }
  0x83   :  { %v3687_v5 = vstv %s3197_s0  ;;  %s4693_s0 = sld [smem:[#allocation3 + $0x46]] }
  0x84   :  { %v3708_v15 = vmul.f32 %v3687_v5, %v3425_v11  ;;  %v608_v33 = vmul.f32 %v3687_v5, %v3418_v7  ;;  %v610_v34 = vmul.f32 %v3687_v5, %v3423_v10  ;;  %v3753_v11 = vstv %s3680_s27  ;;  %s4709_s27 = sld [smem:[#allocation3 + $0x5b]] }
  0x85   :  { %2542 = vrot.lane.b32.xlu0 %v3553_v22, %s3355_s1  ;;  %2540 = vrot.lane.b32.xlu1 %v3555_v23, %s3355_s1  ;;  %v626_v7 = vmul.f32 %v3711_v24, %v3423_v10  ;;  %v3774_v10 = vsel %vm279_vm3, %v598_v57, %v599_v52  ;;  %v2086_v57 = vrot.slane %v2079_v13, 3  ;;  %v2094_v1 = vmul.f32 %v3451_v21, %v3687_v5 }
  0x86   :  { %v615_v2 = vrot.slane %v3708_v15, 4  ;;  %v614_v4 = vrot.slane %v608_v33, 4  ;;  %v3764_v15 = vsel %vm262_vm2, %v6023_v3, %v2071_v38  ;;  %v647_v33 = vrot.slane %v641_v56, 6  ;;  %6043 = vst [vmem:[#allocation20_spill] sm:$0xff] %v3774_v10 }
  0x87   :  { %6041 = vst [vmem:[#allocation18_spill] sm:$0xff] %v3764_v15  ;;  %v617_v38 = vrot.slane %v610_v34, 4  ;;  %v3783_v3 = vstv %s3704_s28  ;;  %v3786_v56 = vstv %s3718_s29  ;;  %v633_v34 = vrot.slane %v626_v7, 5  ;;  %s4833_s28 = sld [smem:[#allocation3 + $0x32]] }
  0x88   :  { %v3777_v51 = vsel %vm296_vm4, %v614_v4, %v615_v2  ;;  %6046 = vst [vmem:[#allocation23_spill] sm:$0xff] %v3783_v3  ;;  %6047 = vst [vmem:[#allocation24_spill] sm:$0xff] %v3786_v56  ;;  %v3803_v4 = vstv %s3735_s30  ;;  %v3806_v8 = vsel %vm330_vm6, %v646_v44, %v647_v33  ;;  %v2124_v52 = vmul.f32 %v3451_v21, %v3731_v48  ;;  %s4840_s29 = sld [smem:[#allocation3 + $0x39]] }
  0x89   :  { %2544 = vrot.lane.b32.xlu1 %v3572_v26, %s3355_s1  ;;  %1193 = vrot.lane.b32.xlu0 %v3435_v16, %s3356_s19  ;;  %s3739_s1 = sld [smem:[#allocation3 + $0x19]]  ;;  %6044 = vst [vmem:[#allocation21_spill] sm:$0xff] %v3777_v51  ;;  %6050 = vst [vmem:[#allocation27_spill] sm:$0xff] %v3803_v4  ;;  %v3816_v7 = vsel %vm296_vm4, %v615_v2, %v617_v38  ;;  %v2093_v13 = vmul.f32 %v3443_v19, %v3687_v5  ;;  %v3847_v3 = vstv %s3766_s3 }
  0x8a   :  { %6051 = vst [vmem:[#allocation28_spill] sm:$0xff] %v3806_v8  ;;  %6053 = vst [vmem:[#allocation30_spill] sm:$0xff] %v3816_v7  ;;  %v2108_v44 = vmul.f32 %v3443_v19, %v3711_v24  ;;  %v2062_v21 = vmul.f32 %v3445_v20, %v3653_v58  ;;  %v2077_v2 = vmul.f32 %v3445_v20, %v3666_v62  ;;  %v2101_v19 = vrot.slane %v2094_v1, 4  ;;  %s4852_s30 = sld [smem:[#allocation3 + $0x40]] }
  0x8b   :  { %v3837_v38 = vsel %vm313_vm5, %v631_v9, %v633_v34  ;;  %v3840_v7 = vsel %vm330_vm6, %v647_v33, %v649_v47  ;;  %v2092_v58 = vmul.f32 %v3445_v20, %v3687_v5  ;;  %v2131_v8 = vrot.slane %v2124_v52, 6  ;;  %6056 = vst [vmem:[#allocation33_spill] sm:$0xff] %v3847_v3  ;;  %s4863_s3 = sld [smem:[#allocation3 + $0x4e]] }
  0x8c   :  { %6054 = vst [vmem:[#allocation31_spill] sm:$0xff] %v3837_v38  ;;  %6055 = vst [vmem:[#allocation32_spill] sm:$0xff] %v3840_v7  ;;  %v2068_v62 = vrot.slane %v2062_v21, 2  ;;  %v3850_v51 = vstv %s3771_s4  ;;  %v2084_v9 = vrot.slane %v2078_v12, 3  ;;  %v2083_v34 = vrot.slane %v2077_v2, 3  ;;  %s4866_s4 = sld [smem:[#allocation3 + $0x55]] }
  0x8d   :  { %1197 = vrot.lane.b32.xlu0 %v3437_v17, %s3356_s19  ;;  %1195 = vrot.lane.b32.xlu1 %v3439_v18, %s3356_s19  ;;  %6057 = vst [vmem:[#allocation34_spill] sm:$0xff] %v3850_v51  ;;  %v2099_v38 = vrot.slane %v2093_v13, 4  ;;  %v2114_v33 = vrot.slane %v2108_v44, 5  ;;  %v6025_v47 = vrot.slane %v3826_v6, 6  ;;  %v2098_v1 = vrot.slane %v2092_v58, 4 }
  0x8e   :  { %v3858_v5 = vstv %s3798_s5  ;;  %v3861_v24 = vsel %vm279_vm3, %v2084_v9, %v2086_v57  ;;  %v3865_v52 = vmul.f32 %v3445_v20, %v3731_v48  ;;  %v6064_v57 = vrot.slane %v3702_v14, 2  ;;  %s4871_s5 = sld [smem:[#allocation3 + $0x5c]] }
  0x8f   :  { %v3813_v15 = vstv %s3739_s1  ;;  %6058 = vst [vmem:[#allocation35_spill] sm:$0xff] %v3858_v5  ;;  %6059 = vst [vmem:[#allocation36_spill] sm:$0xff] %v3861_v24  ;;  %v3868_v13 = vsel %vm296_vm4, %v2099_v38, %v2101_v19  ;;  %v3871_v44 = vsel %vm313_vm5, %v2114_v33, %v2116_v60  ;;  %v3876_v21 = vsel %vm330_vm6, %v6025_v47, %v2131_v8  ;;  %s4855_s1 = sld [smem:[#allocation3 + $0x47]] }
  0x90   :  { %6052 = vst [vmem:[#allocation29_spill] sm:$0xff] %v3813_v15  ;;  %6060 = vst [vmem:[#allocation37_spill] sm:$0xff] %v3865_v52  ;;  %v3881_v50 = vsel %vm262_vm2, %v2068_v62, %v6064_v57  ;;  %v3887_v60 = vsel %vm279_vm3, %v2083_v34, %v2084_v9  ;;  %v3895_v62 = vsel %vm296_vm4, %v2098_v1, %v2099_v38 }
  0x91   :  { %2642 = vrot.lane.b32.xlu0 %v3553_v22, %s3356_s19  ;;  %2640 = vrot.lane.b32.xlu1 %v3555_v23, %s3356_s19  ;;  %6061 = vst [vmem:[#allocation38_spill] sm:$0xff] %v3868_v13  ;;  %6062 = vst [vmem:[#allocation39_spill] sm:$0xff] %v3871_v44  ;;  %v3906_v9 = vsel %vm313_vm5, %v2113_v0, %v2114_v33 }
  0x92   :  { %6063 = vst [vmem:[#allocation40_spill] sm:$0xff] %v3876_v21  ;;  %6065 = vst [vmem:[#allocation41_spill] sm:$0xff] %v3881_v50 }
  0x93   :  { %6066 = vst [vmem:[#allocation42_spill] sm:$0xff] %v3887_v60  ;;  %6067 = vst [vmem:[#allocation43_spill] sm:$0xff] %v3895_v62 }
  0x94   :  { %6068 = vst [vmem:[#allocation44_spill] sm:$0xff] %v3906_v9 }
  0x95   :  { %2644 = vrot.lane.b32.xlu1 %v3572_v26, %s3356_s19  ;;  %1401 = vrot.lane.b32.xlu0 %v3435_v16, %s3357_s20  ;;  %s4347_s19 = sld [smem:[#allocation3 + $0x5]] }
  0x99   :  { %1405 = vrot.lane.b32.xlu0 %v3437_v17, %s3357_s20  ;;  %1403 = vrot.lane.b32.xlu1 %v3439_v18, %s3357_s20  ;;  %v228_v12 = vpop.permute.xlu0 %227 }
  0x9a   :  { %v239_v20 = vmul.f32 %v3575_v27, %v228_v12  ;;  %v256_v48 = vmul.f32 %v3578_v28, %v228_v12  ;;  %v273_v2 = vmul.f32 %v3581_v29, %v228_v12  ;;  %v290_v58 = vmul.f32 %v3584_v30, %v228_v12 }
  0x9b   :  { %v232_v19 = vpop.permute.xlu1 %231  ;;  %v3891_v8 = vmul.f32 %v3589_v31, %v228_v12  ;;  %v234_v57 = vmul.f32 %v3568_v25, %v228_v12  ;;  %v3899_v47 = vmul.f32 %v3592_v32, %v228_v12 }
  0x9c   :  { %v241_v14 = vmul.f32 %v3575_v27, %v232_v19  ;;  %v246_v60 = vrot.slane %v239_v20, 1  ;;  %v263_v21 = vrot.slane %v256_v48, 2  ;;  %v280_v38 = vrot.slane %v273_v2, 3 }
  0x9d   :  { %2836 = vrot.lane.b32.xlu0 %v3553_v22, %s3357_s20  ;;  %2834 = vrot.lane.b32.xlu1 %v3555_v23, %s3357_s20  ;;  %v258_v1 = vmul.f32 %v3578_v28, %v232_v19  ;;  %v230_v62 = vpop.permute.xlu0 %229  ;;  %v297_v50 = vrot.slane %v290_v58, 4  ;;  %v314_v12 = vrot.slane %v3891_v8, 5  ;;  %v275_v44 = vmul.f32 %v3581_v29, %v232_v19 }
  0x9e   :  { %v292_v13 = vmul.f32 %v3584_v30, %v232_v19  ;;  %v249_v24 = vrot.slane %v241_v14, 1  ;;  %v309_v7 = vmul.f32 %v3589_v31, %v232_v19  ;;  %v240_v33 = vmul.f32 %v3575_v27, %v230_v62 }
  0x9f   :  { %v257_v0 = vmul.f32 %v3578_v28, %v230_v62  ;;  %v3918_v48 = vmul.f32 %v3592_v32, %v232_v19  ;;  %v235_v2 = vmul.f32 %v3568_v25, %v230_v62  ;;  %v274_v58 = vmul.f32 %v3581_v29, %v230_v62 }
  0xa0   :  { %v266_v8 = vrot.slane %v258_v1, 2  ;;  %v247_v14 = vrot.slane %v240_v33, 1  ;;  %v291_v9 = vmul.f32 %v3584_v30, %v230_v62  ;;  %v283_v5 = vrot.slane %v275_v44, 3 }
  0xa1   :  { %2838 = vrot.lane.b32.xlu1 %v3572_v26, %s3357_s20  ;;  %1508 = vrot.lane.b32.xlu0 %v3435_v16, %s3358_s21  ;;  %v264_v34 = vrot.slane %v257_v0, 2  ;;  %v300_v20 = vrot.slane %v292_v13, 4  ;;  %v281_v51 = vrot.slane %v274_v58, 3  ;;  %v308_v19 = vmul.f32 %v3589_v31, %v230_v62  ;;  %s4352_s20 = sld [smem:[#allocation3 + $0xc]] }
  0xa2   :  { %v317_v3 = vrot.slane %v309_v7, 5  ;;  %v248_v15 = vsel %vm245_vm1, %v246_v60, %v247_v14  ;;  %v250_v4 = vsel %vm245_vm1, %v247_v14, %v249_v24  ;;  %v3931_v10 = vmul.f32 %v3592_v32, %v230_v62 }
  0xa3   :  { %v1746_v56 = vpop.permute.xlu0 %1745  ;;  %v253_v33 = vadd.f32 %v248_v15, %v234_v57  ;;  %v254_v0 = vadd.f32 %v250_v4, %v235_v2  ;;  %v265_v43 = vsel %vm262_vm2, %v263_v21, %v264_v34  ;;  %v1744_v44 = vpop.permute.xlu1 %1743  ;;  %v267_v7 = vsel %vm262_vm2, %v264_v34, %v266_v8 }
  0xa4   :  { %v282_v13 = vsel %vm279_vm3, %v280_v38, %v281_v51  ;;  %v298_v60 = vrot.slane %v291_v9, 4  ;;  %v315_v24 = vrot.slane %v308_v19, 5  ;;  %v1754_v15 = vmul.f32 %v1746_v56, %v3575_v27 }
  0xa5   :  { %1512 = vrot.lane.b32.xlu0 %v3437_v17, %s3358_s21  ;;  %1510 = vrot.lane.b32.xlu1 %v3439_v18, %s3358_s21  ;;  %v270_v62 = vadd.f32 %v265_v43, %v253_v33  ;;  %v271_v58 = vadd.f32 %v267_v7, %v254_v0  ;;  %v1769_v4 = vmul.f32 %v1746_v56, %v3578_v28 }
  0xa6   :  { %v284_v21 = vsel %vm279_vm3, %v281_v51, %v283_v5  ;;  %v299_v57 = vsel %vm296_vm4, %v297_v50, %v298_v60  ;;  %v1750_v34 = vmul.f32 %v1746_v56, %v3568_v25  ;;  %v301_v8 = vsel %vm296_vm4, %v298_v60, %v300_v20 }
  0xa7   :  { %v287_v38 = vadd.f32 %v282_v13, %v270_v62  ;;  %v288_v9 = vadd.f32 %v284_v21, %v271_v58  ;;  %v316_v14 = vsel %vm313_vm5, %v314_v12, %v315_v24  ;;  %v3952_v43 = vsel %vm313_vm5, %v315_v24, %v317_v3  ;;  %v1748_v0 = vpop.permute.xlu1 %1747 }
  0xa8   :  { %v1760_v19 = vrot.slane %v1754_v15, 1  ;;  %v1775_v51 = vrot.slane %v1769_v4, 2  ;;  %v1784_v5 = vmul.f32 %v1746_v56, %v3581_v29  ;;  %v1799_v50 = vmul.f32 %v1746_v56, %v3584_v30 }
  0xa9   :  { %2936 = vrot.lane.b32.xlu0 %v3553_v22, %s3358_s21  ;;  %2934 = vrot.lane.b32.xlu1 %v3555_v23, %s3358_s21  ;;  %v3959_v33 = vmul.f32 %v1746_v56, %v3589_v31  ;;  %v3962_v12 = vmul.f32 %v1746_v56, %v3592_v32  ;;  %v1753_v20 = vmul.f32 %v1744_v44, %v3575_v27 }
  0xaa   :  { %v304_v3 = vadd.f32 %v299_v57, %v287_v38  ;;  %v3965_v7 = vadd.f32 %v301_v8, %v288_v9  ;;  %v1790_v13 = vrot.slane %v1784_v5, 3  ;;  %v1749_v60 = vmul.f32 %v1744_v44, %v3568_v25 }
  0xab   :  { %v1759_v24 = vrot.slane %v1753_v20, 1  ;;  %v1768_v62 = vmul.f32 %v1744_v44, %v3578_v28  ;;  %v1783_v58 = vmul.f32 %v1744_v44, %v3581_v29  ;;  %v1798_v15 = vmul.f32 %v1744_v44, %v3584_v30 }
  0xac   :  { %v1813_v56 = vmul.f32 %v1744_v44, %v3589_v31  ;;  %v3975_v4 = vmul.f32 %v1744_v44, %v3592_v32  ;;  %v1755_v21 = vmul.f32 %v1748_v0, %v3575_v27  ;;  %v1770_v57 = vmul.f32 %v1748_v0, %v3578_v28 }
  0xad   :  { %1615 = vrot.lane.b32.xlu0 %v3435_v16, %s3359_s22  ;;  %2938 = vrot.lane.b32.xlu1 %v3572_v26, %s3358_s21  ;;  %v1805_v25 = vrot.slane %v1799_v50, 4  ;;  %v1761_v38 = vsel %vm245_vm1, %v1759_v24, %v1760_v19  ;;  %v1774_v9 = vrot.slane %v1768_v62, 2  ;;  %v1789_v8 = vrot.slane %v1783_v58, 3  ;;  %s4356_s21 = sld [smem:[#allocation3 + $0x13]] }
  0xae   :  { %v1820_v5 = vrot.slane %v3959_v33, 5  ;;  %v1835_v20 = vrot.slane %v3962_v12, 6  ;;  %v1766_v1 = vadd.f32 %v1761_v38, %v1749_v60  ;;  %v1762_v2 = vrot.slane %v1755_v21, 1  ;;  %v341_v33 = vpop.permute.xlu0 %340 }
  0xaf   :  { %v1776_v44 = vsel %vm262_vm2, %v1774_v9, %v1775_v51  ;;  %v1804_v16 = vrot.slane %v1798_v15, 4  ;;  %v1819_v27 = vrot.slane %v1813_v56, 5  ;;  %v1777_v52 = vrot.slane %v1770_v57, 2 }
  0xb0   :  { %v1781_v28 = vadd.f32 %v1776_v44, %v1766_v1  ;;  %v1763_v24 = vsel %vm245_vm1, %v1760_v19, %v1762_v2  ;;  %v1785_v62 = vmul.f32 %v1748_v0, %v3581_v29  ;;  %v1791_v60 = vsel %vm279_vm3, %v1789_v8, %v1790_v13 }
  0xb1   :  { %1619 = vrot.lane.b32.xlu0 %v3437_v17, %s3359_s22  ;;  %1617 = vrot.lane.b32.xlu1 %v3439_v18, %s3359_s22  ;;  %v1767_v58 = vadd.f32 %v1763_v24, %v1750_v34  ;;  %v1800_v15 = vmul.f32 %v1748_v0, %v3584_v30  ;;  %v1815_v56 = vmul.f32 %v1748_v0, %v3589_v31  ;;  %v6069_v9 = vrot.slane %v3931_v10, 6 }
  0xb2   :  { %v1778_v21 = vsel %vm262_vm2, %v1775_v51, %v1777_v52  ;;  %v1792_v1 = vrot.slane %v1785_v62, 3  ;;  %v1830_v57 = vmul.f32 %v1748_v0, %v3592_v32  ;;  %v321_v38 = vadd.f32 %v316_v14, %v304_v3 }
  0xb3   :  { %v1796_v2 = vadd.f32 %v1791_v60, %v1781_v28  ;;  %v1782_v19 = vadd.f32 %v1778_v21, %v1767_v58  ;;  %v1807_v29 = vrot.slane %v1800_v15, 4  ;;  %v6070_v44 = vrot.slane %v3899_v47, 6  ;;  %v345_v28 = vpop.permute.xlu0 %344 }
  0xb4   :  { %v1793_v30 = vsel %vm279_vm3, %v1790_v13, %v1792_v1  ;;  %v1822_v31 = vrot.slane %v1815_v56, 5  ;;  %v1837_v52 = vrot.slane %v1830_v57, 6  ;;  %v1806_v32 = vsel %vm296_vm4, %v1804_v16, %v1805_v25 }
  0xb5   :  { %v333_v8 = vsel %vm330_vm6, %v6070_v44, %v6069_v9  ;;  %3036 = vrot.lane.b32.xlu0 %v3553_v22, %s3359_s22  ;;  %3034 = vrot.lane.b32.xlu1 %v3555_v23, %s3359_s22  ;;  %v4009_v14 = vsel %vm313_vm5, %v1819_v27, %v1820_v5  ;;  %v1797_v51 = vadd.f32 %v1793_v30, %v1782_v19  ;;  %v343_v19 = vpop.permute.xlu1 %342 }
  0xb6   :  { %v338_v34 = vadd.f32 %v333_v8, %v321_v38  ;;  %v347_v47 = vmul.f32 %v3599_v35, %v341_v33  ;;  %v1808_v0 = vsel %vm296_vm4, %v1805_v25, %v1807_v29  ;;  %v352_v22 = vmul.f32 %v3602_v36, %v341_v33 }
  0xb7   :  { %v368_v3 = vmul.f32 %v3605_v37, %v341_v33  ;;  %v384_v13 = vmul.f32 %v3613_v39, %v341_v33  ;;  %v4016_v24 = vadd.f32 %v1806_v32, %v1796_v2  ;;  %v1812_v23 = vadd.f32 %v1808_v0, %v1797_v51 }
  0xb8   :  { %v400_v16 = vmul.f32 %v3616_v40, %v341_v33  ;;  %v4020_v27 = vmul.f32 %v3619_v41, %v341_v33  ;;  %v1823_v62 = vsel %vm313_vm5, %v1820_v5, %v1822_v31  ;;  %v1838_v25 = vsel %vm330_vm6, %v1835_v20, %v1837_v52 }
  0xb9   :  { %v349_v60 = vadd.f32 %v347_v47, %v338_v34  ;;  %v4027_v58 = vmul.f32 %v3622_v42, %v341_v33  ;;  %3038 = vrot.lane.b32.xlu1 %v3572_v26, %s3359_s22  ;;  %v1827_v15 = vadd.f32 %v1823_v62, %v1812_v23  ;;  %v358_v56 = vrot.slane %v352_v22, 1  ;;  %v1846_v23 = vpop.permute.xlu0 %1845  ;;  %s4361_s22 = sld [smem:[#allocation3 + $0x1a]] }
  0xba   :  { %v374_v21 = vrot.slane %v368_v3, 2  ;;  %v354_v1 = vmul.f32 %v3602_v36, %v345_v28  ;;  %v390_v57 = vrot.slane %v384_v13, 3  ;;  %v406_v38 = vrot.slane %v400_v16, 4 }
  0xbb   :  { %v370_v5 = vmul.f32 %v3605_v37, %v345_v28  ;;  %v386_v2 = vmul.f32 %v3613_v39, %v345_v28  ;;  %v1842_v29 = vadd.f32 %v1838_v25, %v1827_v15  ;;  %v422_v9 = vrot.slane %v4020_v27, 5 }
  0xbc   :  { %v402_v44 = vmul.f32 %v3616_v40, %v345_v28  ;;  %v361_v26 = vrot.slane %v354_v1, 1  ;;  %v418_v8 = vmul.f32 %v3619_v41, %v345_v28  ;;  %v4039_v30 = vmul.f32 %v3622_v42, %v345_v28 }
  0xbd   :  { %v322_v31 = vadd.f32 %v3952_v43, %v3965_v7  ;;  %v377_v52 = vrot.slane %v370_v5, 2  ;;  %v393_v34 = vrot.slane %v386_v2, 3  ;;  %v6071_v32 = vrot.slane %v3918_v48, 6 }
  0xbe   :  { %v6072_v51 = vrot.slane %v3931_v10, 6  ;;  %v348_v0 = vmul.f32 %v3599_v35, %v343_v19  ;;  %v353_v3 = vmul.f32 %v3602_v36, %v343_v19  ;;  %v369_v13 = vmul.f32 %v3605_v37, %v343_v19 }
  0xbf   :  { %v385_v28 = vmul.f32 %v3613_v39, %v343_v19  ;;  %v401_v43 = vmul.f32 %v3616_v40, %v343_v19  ;;  %v417_v7 = vmul.f32 %v3619_v41, %v343_v19  ;;  %v4055_v48 = vmul.f32 %v3622_v42, %v343_v19 }
  0xc0   :  { %v335_v47 = vsel %vm330_vm6, %v6072_v51, %v6071_v32  ;;  %v1850_v10 = vmul.f32 %v1846_v23, %v3599_v35  ;;  %v359_v27 = vrot.slane %v353_v3, 1  ;;  %v375_v62 = vrot.slane %v369_v13, 2 }
  0xc1   :  { %v339_v22 = vadd.f32 %v335_v47, %v322_v31  ;;  %v391_v25 = vrot.slane %v385_v28, 3  ;;  %v409_v15 = vrot.slane %v402_v44, 4  ;;  %v425_v1 = vrot.slane %v418_v8, 5 }
  0xc2   :  { %v441_v5 = vrot.slane %v4039_v30, 6  ;;  %v407_v2 = vrot.slane %v401_v43, 4  ;;  %v360_v31 = vsel %vm245_vm1, %v358_v56, %v359_v27  ;;  %v362_v32 = vsel %vm245_vm1, %v359_v27, %v361_v26 }
  0xc3   :  { %v350_v16 = vadd.f32 %v348_v0, %v339_v22  ;;  %v423_v51 = vrot.slane %v417_v7, 5  ;;  %v439_v47 = vrot.slane %v4055_v48, 6  ;;  %v365_v19 = vadd.f32 %v360_v31, %v349_v60  ;;  %v1844_v22 = vpop.permute.xlu1 %1843 }
  0xc4   :  { %v376_v50 = vsel %vm262_vm2, %v374_v21, %v375_v62  ;;  %v1852_v0 = vadd.f32 %v1850_v10, %v1842_v29  ;;  %v378_v3 = vsel %vm262_vm2, %v375_v62, %v377_v52  ;;  %v392_v44 = vsel %vm279_vm3, %v390_v57, %v391_v25 }
  0xc5   :  { %v366_v33 = vadd.f32 %v362_v32, %v350_v16  ;;  %v394_v8 = vsel %vm279_vm3, %v391_v25, %v393_v34  ;;  %v408_v13 = vsel %vm296_vm4, %v406_v38, %v407_v2  ;;  %v381_v56 = vadd.f32 %v376_v50, %v365_v19 }
  0xc6   :  { %v1854_v26 = vmul.f32 %v1846_v23, %v3602_v36  ;;  %v1869_v43 = vmul.f32 %v1846_v23, %v3605_v37  ;;  %v410_v60 = vsel %vm296_vm4, %v407_v2, %v409_v15  ;;  %v4071_v21 = vmul.f32 %v1846_v23, %v3613_v39 }
  0xc7   :  { %v382_v28 = vadd.f32 %v378_v3, %v366_v33  ;;  %v4074_v29 = vmul.f32 %v1846_v23, %v3616_v40  ;;  %v4077_v57 = vmul.f32 %v1846_v23, %v3619_v41  ;;  %v397_v52 = vadd.f32 %v392_v44, %v381_v56 }
  0xc8   :  { %v424_v38 = vsel %vm313_vm5, %v422_v9, %v423_v51  ;;  %v4081_v50 = vsel %vm313_vm5, %v423_v51, %v425_v1  ;;  %v4084_v33 = vmul.f32 %v1846_v23, %v3622_v42  ;;  %v1860_v7 = vrot.slane %v1854_v26, 1  ;;  %v1848_v23 = vpop.permute.xlu1 %1847 }
  0xc9   :  { %v398_v34 = vadd.f32 %v394_v8, %v382_v28  ;;  %v1875_v10 = vrot.slane %v1869_v43, 2  ;;  %v1890_v16 = vrot.slane %v4071_v21, 3  ;;  %v1905_v27 = vrot.slane %v4074_v29, 4 }
  0xca   :  { %v1920_v62 = vrot.slane %v4077_v57, 5  ;;  %v1826_v25 = vadd.f32 %v4009_v14, %v4016_v24  ;;  %v6073_v9 = vrot.slane %v3975_v4, 6  ;;  %v1849_v1 = vmul.f32 %v1844_v22, %v3599_v35 }
  0xcb   :  { %v1853_v2 = vmul.f32 %v1844_v22, %v3602_v36  ;;  %v1868_v31 = vmul.f32 %v1844_v22, %v3605_v37  ;;  %v1883_v32 = vmul.f32 %v1844_v22, %v3613_v39  ;;  %v1898_v19 = vmul.f32 %v1844_v22, %v3616_v40 }
  0xcc   :  { %v1836_v15 = vsel %vm330_vm6, %v6073_v9, %v1835_v20  ;;  %v1913_v14 = vmul.f32 %v1844_v22, %v3619_v41  ;;  %v4103_v12 = vmul.f32 %v1844_v22, %v3622_v42  ;;  %v1935_v4 = vrot.slane %v4084_v33, 6 }
  0xcd   :  { %v1841_v51 = vadd.f32 %v1836_v15, %v1826_v25  ;;  %v1859_v20 = vrot.slane %v1853_v2, 1  ;;  %v1874_v24 = vrot.slane %v1868_v31, 2  ;;  %v1855_v35 = vmul.f32 %v1848_v23, %v3602_v36 }
  0xce   :  { %v413_v3 = vadd.f32 %v408_v13, %v397_v52  ;;  %v414_v44 = vadd.f32 %v410_v60, %v398_v34  ;;  %v1889_v56 = vrot.slane %v1883_v32, 3  ;;  %v1904_v26 = vrot.slane %v1898_v19, 4  ;;  %v448_v52 = vpop.permute.xlu0 %447 }
  0xcf   :  { %v1851_v8 = vadd.f32 %v1849_v1, %v1841_v51  ;;  %v1861_v28 = vsel %vm245_vm1, %v1859_v20, %v1860_v7  ;;  %v1919_v43 = vrot.slane %v1913_v14, 5  ;;  %v1862_v21 = vrot.slane %v1855_v35, 1 }
  0xd0   :  { %v1876_v57 = vsel %vm262_vm2, %v1874_v24, %v1875_v10  ;;  %v1934_v22 = vrot.slane %v4103_v12, 6  ;;  %v1870_v25 = vmul.f32 %v1848_v23, %v3605_v37  ;;  %v1885_v36 = vmul.f32 %v1848_v23, %v3613_v39 }
  0xd1   :  { %v1866_v29 = vadd.f32 %v1861_v28, %v1851_v8  ;;  %v1863_v9 = vsel %vm245_vm1, %v1860_v7, %v1862_v21  ;;  %v1900_v13 = vmul.f32 %v1848_v23, %v3616_v40  ;;  %v1915_v60 = vmul.f32 %v1848_v23, %v3619_v41 }
  0xd2   :  { %v1867_v15 = vadd.f32 %v1863_v9, %v1852_v0  ;;  %v1877_v1 = vrot.slane %v1870_v25, 2  ;;  %v1930_v2 = vmul.f32 %v1848_v23, %v3622_v42  ;;  %v1891_v31 = vsel %vm279_vm3, %v1889_v56, %v1890_v16  ;;  %v452_v28 = vpop.permute.xlu0 %451 }
  0xd3   :  { %v1881_v34 = vadd.f32 %v1876_v57, %v1866_v29  ;;  %v1892_v32 = vrot.slane %v1885_v36, 3  ;;  %v1907_v51 = vrot.slane %v1900_v13, 4  ;;  %v429_v19 = vadd.f32 %v424_v38, %v413_v3 }
  0xd4   :  { %v1906_v37 = vsel %vm296_vm4, %v1904_v26, %v1905_v27  ;;  %v4119_v7 = vsel %vm313_vm5, %v1919_v43, %v1920_v62  ;;  %v1878_v39 = vsel %vm262_vm2, %v1875_v10, %v1877_v1  ;;  %v1922_v40 = vrot.slane %v1915_v60, 5 }
  0xd5   :  { %v1896_v41 = vadd.f32 %v1891_v31, %v1881_v34  ;;  %v1882_v14 = vadd.f32 %v1878_v39, %v1867_v15  ;;  %v1937_v20 = vrot.slane %v1930_v2, 6  ;;  %v6074_v42 = vrot.slane %v4027_v58, 6  ;;  %v450_v15 = vpop.permute.xlu1 %449 }
  0xd6   :  { %v1893_v23 = vsel %vm279_vm3, %v1890_v16, %v1892_v32  ;;  %v1908_v38 = vsel %vm296_vm4, %v1905_v27, %v1907_v51  ;;  %v454_v35 = vmul.f32 %v3627_v45, %v448_v52  ;;  %v459_v10 = vmul.f32 %v3630_v46, %v448_v52 }
  0xd7   :  { %v440_v0 = vsel %vm330_vm6, %v6074_v42, %v439_v47  ;;  %v1897_v3 = vadd.f32 %v1893_v23, %v1882_v14  ;;  %v475_v8 = vmul.f32 %v3633_v49, %v448_v52  ;;  %v491_v56 = vmul.f32 %v3642_v53, %v448_v52  ;;  %v1946_v23 = vpop.permute.xlu0 %1945 }
  0xd8   :  { %v445_v24 = vadd.f32 %v440_v0, %v429_v19  ;;  %v1923_v26 = vsel %vm313_vm5, %v1920_v62, %v1922_v40  ;;  %v507_v58 = vmul.f32 %v3645_v54, %v448_v52  ;;  %v523_v43 = vmul.f32 %v3650_v55, %v448_v52 }
  0xd9   :  { %v4137_v16 = vmul.f32 %v3753_v11, %v448_v52  ;;  %v4139_v27 = vadd.f32 %v1906_v37, %v1896_v41  ;;  %v1912_v21 = vadd.f32 %v1908_v38, %v1897_v3  ;;  %v1938_v29 = vsel %vm330_vm6, %v1935_v4, %v1937_v20 }
  0xda   :  { %v456_v57 = vadd.f32 %v454_v35, %v445_v24  ;;  %v465_v25 = vrot.slane %v459_v10, 1  ;;  %v481_v9 = vrot.slane %v475_v8, 2  ;;  %v497_v36 = vrot.slane %v491_v56, 3 }
  0xdb   :  { %v461_v62 = vmul.f32 %v3630_v46, %v452_v28  ;;  %v1927_v13 = vadd.f32 %v1923_v26, %v1912_v21  ;;  %v513_v60 = vrot.slane %v507_v58, 4  ;;  %v477_v34 = vmul.f32 %v3633_v49, %v452_v28 }
  0xdc   :  { %v493_v52 = vmul.f32 %v3642_v53, %v452_v28  ;;  %v529_v1 = vrot.slane %v523_v43, 5  ;;  %v545_v2 = vrot.slane %v4137_v16, 6  ;;  %v509_v31 = vmul.f32 %v3645_v54, %v452_v28 }
  0xdd   :  { %v430_v32 = vadd.f32 %v4081_v50, %v414_v44  ;;  %v1942_v51 = vadd.f32 %v1938_v29, %v1927_v13  ;;  %v468_v19 = vrot.slane %v461_v62, 1  ;;  %v525_v37 = vmul.f32 %v3650_v55, %v452_v28 }
  0xde   :  { %v541_v39 = vmul.f32 %v3753_v11, %v452_v28  ;;  %v484_v40 = vrot.slane %v477_v34, 2  ;;  %v500_v41 = vrot.slane %v493_v52, 3  ;;  %v442_v14 = vsel %vm330_vm6, %v439_v47, %v441_v5 }
  0xdf   :  { %v455_v20 = vmul.f32 %v3627_v45, %v450_v15  ;;  %v446_v42 = vadd.f32 %v442_v14, %v430_v32  ;;  %v460_v0 = vmul.f32 %v3630_v46, %v450_v15  ;;  %v476_v50 = vmul.f32 %v3633_v49, %v450_v15  ;;  %v1944_v14 = vpop.permute.xlu1 %1943 }
  0xe0   :  { %v492_v44 = vmul.f32 %v3642_v53, %v450_v15  ;;  %v508_v38 = vmul.f32 %v3645_v54, %v450_v15  ;;  %v524_v24 = vmul.f32 %v3650_v55, %v450_v15  ;;  %v540_v30 = vmul.f32 %v3753_v11, %v450_v15 }
  0xe1   :  { %v1950_v48 = vmul.f32 %v1946_v23, %v3627_v45  ;;  %v457_v35 = vadd.f32 %v455_v20, %v446_v42  ;;  %v466_v5 = vrot.slane %v460_v0, 1  ;;  %v482_v47 = vrot.slane %v476_v50, 2 }
  0xe2   :  { %v498_v3 = vrot.slane %v492_v44, 3  ;;  %v516_v10 = vrot.slane %v509_v31, 4  ;;  %v532_v8 = vrot.slane %v525_v37, 5  ;;  %v514_v56 = vrot.slane %v508_v38, 4 }
  0xe3   :  { %v530_v28 = vrot.slane %v524_v24, 5  ;;  %v548_v26 = vrot.slane %v541_v39, 6  ;;  %v467_v58 = vsel %vm245_vm1, %v465_v25, %v466_v5  ;;  %v469_v43 = vsel %vm245_vm1, %v466_v5, %v468_v19 }
  0xe4   :  { %v546_v16 = vrot.slane %v540_v30, 6  ;;  %v472_v21 = vadd.f32 %v467_v58, %v456_v57  ;;  %v473_v29 = vadd.f32 %v469_v43, %v457_v35  ;;  %v483_v62 = vsel %vm262_vm2, %v481_v9, %v482_v47  ;;  %v1948_v58 = vpop.permute.xlu1 %1947 }
  0xe5   :  { %v4168_v13 = vadd.f32 %v1950_v48, %v1942_v51  ;;  %v485_v34 = vsel %vm262_vm2, %v482_v47, %v484_v40  ;;  %v499_v52 = vsel %vm279_vm3, %v497_v36, %v498_v3  ;;  %v501_v15 = vsel %vm279_vm3, %v498_v3, %v500_v41 }
  0xe6   :  { %v515_v31 = vsel %vm296_vm4, %v513_v60, %v514_v56  ;;  %v488_v32 = vadd.f32 %v483_v62, %v472_v21  ;;  %v489_v37 = vadd.f32 %v485_v34, %v473_v29  ;;  %v517_v25 = vsel %vm296_vm4, %v514_v56, %v516_v10 }
  0xe7   :  { %v531_v19 = vsel %vm313_vm5, %v529_v1, %v530_v28  ;;  %v533_v57 = vsel %vm313_vm5, %v530_v28, %v532_v8  ;;  %v4178_v9 = vmul.f32 %v1946_v23, %v3630_v46  ;;  %v4181_v51 = vmul.f32 %v1946_v23, %v3633_v49 }
  0xe8   :  { %v4184_v36 = vmul.f32 %v1946_v23, %v3642_v53  ;;  %v504_v39 = vadd.f32 %v499_v52, %v488_v32  ;;  %v505_v40 = vadd.f32 %v501_v15, %v489_v37  ;;  %v547_v60 = vsel %vm330_vm6, %v545_v2, %v546_v16 }
  0xe9   :  { %v549_v41 = vsel %vm330_vm6, %v546_v16, %v548_v26  ;;  %v1960_v1 = vrot.slane %v4178_v9, 1  ;;  %v4190_v20 = vmul.f32 %v1946_v23, %v3645_v54  ;;  %v4193_v42 = vmul.f32 %v1946_v23, %v3650_v55 }
  0xea   :  { %v4196_v0 = vmul.f32 %v1946_v23, %v3753_v11  ;;  %v520_v50 = vadd.f32 %v515_v31, %v504_v39  ;;  %v521_v44 = vadd.f32 %v517_v25, %v505_v40  ;;  %v1975_v38 = vrot.slane %v4181_v51, 2  ;;  %v656_v40 = vpop.permute.xlu0 %655 }
  0xeb   :  { %v1990_v2 = vrot.slane %v4184_v36, 3  ;;  %v1926_v24 = vadd.f32 %v4119_v7, %v4139_v27  ;;  %v1936_v30 = vsel %vm330_vm6, %v1934_v22, %v1935_v4  ;;  %v1949_v48 = vmul.f32 %v1944_v14, %v3627_v45 }
  0xec   :  { %v1953_v23 = vmul.f32 %v1944_v14, %v3630_v46  ;;  %v536_v35 = vadd.f32 %v531_v19, %v520_v50  ;;  %v537_v5 = vadd.f32 %v533_v57, %v521_v44  ;;  %v1968_v47 = vmul.f32 %v1944_v14, %v3633_v49 }
  0xed   :  { %v1983_v3 = vmul.f32 %v1944_v14, %v3642_v53  ;;  %v1941_v10 = vadd.f32 %v1936_v30, %v1926_v24  ;;  %v1998_v7 = vmul.f32 %v1944_v14, %v3645_v54  ;;  %v2013_v33 = vmul.f32 %v1944_v14, %v3650_v55 }
  0xee   :  { %v1959_v8 = vrot.slane %v1953_v23, 1  ;;  %v552_v27 = vadd.f32 %v547_v60, %v536_v35  ;;  %v553_v12 = vadd.f32 %v549_v41, %v537_v5  ;;  %v1974_v56 = vrot.slane %v1968_v47, 2  ;;  %v6079_v23 = vld [vmem:[#allocation19_spill] sm:$0xff] }
  0xef   :  { %v1989_v4 = vrot.slane %v1983_v3, 3  ;;  %v2005_v45 = vrot.slane %v4190_v20, 4  ;;  %v2020_v22 = vrot.slane %v4193_v42, 5  ;;  %v1951_v28 = vadd.f32 %v1949_v48, %v1941_v10 }
  0xf0   :  { %v1961_v26 = vsel %vm245_vm1, %v1959_v8, %v1960_v1  ;;  %v557_v43 = vadd.f32 %v3662_v61, %v552_v27  ;;  %v2035_v16 = vrot.slane %v4196_v0, 6  ;;  %v2004_v21 = vrot.slane %v1998_v7, 4  ;;  %v6078_v0 = vld [vmem:[#allocation13_spill] sm:$0xff]  ;;  %v6081_v7 = vld [vmem:[#allocation20_spill] sm:$0xff]  ;;  %v6082_v27 = vld [vmem:[#allocation27_spill] sm:$0xff] }
  0xf1   :  { %v2019_v29 = vrot.slane %v2013_v33, 5  ;;  %v558_v62 = vadd.f32 %v3656_v59, %v553_v12  ;;  %v1966_v34 = vadd.f32 %v1961_v26, %v1951_v28  ;;  %v1976_v52 = vsel %vm262_vm2, %v1974_v56, %v1975_v38  ;;  %v6084_v28 = vld [vmem:[#allocation33_spill] sm:$0xff] }
  0xf2   :  { %v2028_v15 = vmul.f32 %v1944_v14, %v3753_v11  ;;  %v573_v31 = vadd.f32 %v3669_v63, %v557_v43  ;;  %v1991_v32 = vsel %vm279_vm3, %v1989_v4, %v1990_v2  ;;  %v1955_v37 = vmul.f32 %v1948_v58, %v3630_v46  ;;  %v6076_v14 = vld [vmem:[#allocation37_spill] sm:$0xff] }
  0xf3   :  { %v1970_v25 = vmul.f32 %v1948_v58, %v3633_v49  ;;  %v1981_v61 = vadd.f32 %v1976_v52, %v1966_v34  ;;  %v1985_v57 = vmul.f32 %v1948_v58, %v3642_v53  ;;  %v2000_v9 = vmul.f32 %v1948_v58, %v3645_v54  ;;  %v6088_v52 = vld [vmem:[#allocation14_spill] sm:$0xff] }
  0xf4   :  { %v2034_v19 = vrot.slane %v2028_v15, 6  ;;  %v1962_v59 = vrot.slane %v1955_v37, 1  ;;  %v2015_v36 = vmul.f32 %v1948_v58, %v3650_v55  ;;  %v2030_v39 = vmul.f32 %v1948_v58, %v3753_v11  ;;  %v6085_v58 = vld [vmem:[#allocation34_spill] sm:$0xff] }
  0xf5   :  { %v1977_v51 = vrot.slane %v1970_v25, 2  ;;  %v1996_v63 = vadd.f32 %v1991_v32, %v1981_v61  ;;  %v1992_v60 = vrot.slane %v1985_v57, 3  ;;  %v2007_v41 = vrot.slane %v2000_v9, 4  ;;  %v6089_v32 = vld [vmem:[#allocation35_spill] sm:$0xff]  ;;  %v6090_v61 = vld [vmem:[#allocation25_spill] sm:$0xff] }
  0xf6   :  { %v6075_v46 = vrot.slane %v3826_v6, 6  ;;  %v6077_v49 = vrot.slane %v6076_v14, 6  ;;  %v2006_v53 = vsel %vm296_vm4, %v2004_v21, %v2005_v45  ;;  %v2021_v54 = vsel %vm313_vm5, %v2019_v29, %v2020_v22  ;;  %v6086_v21 = vld [vmem:[#allocation21_spill] sm:$0xff]  ;;  %v6087_v29 = vld [vmem:[#allocation23_spill] sm:$0xff] }
  0xf7   :  { %v1963_v42 = vsel %vm245_vm1, %v1960_v1, %v1962_v59  ;;  %v2022_v55 = vrot.slane %v2015_v36, 5  ;;  %v574_v11 = vadd.f32 %v6078_v0, %v558_v62  ;;  %v2011_v50 = vadd.f32 %v2006_v53, %v1996_v63  ;;  %v6080_v1 = vld [vmem:[#allocation24_spill] sm:$0xff]  ;;  %v658_v63 = vpop.permute.xlu1 %657 }
  0xf8   :  { %v4234_v20 = vsel %vm330_vm6, %v6077_v49, %v6075_v46  ;;  %v2036_v44 = vsel %vm330_vm6, %v2034_v19, %v2035_v16  ;;  %v1967_v24 = vadd.f32 %v1963_v42, %v4168_v13  ;;  %v1978_v6 = vsel %vm262_vm2, %v1975_v38, %v1977_v51  ;;  %v6083_v13 = vld [vmem:[#allocation29_spill] sm:$0xff]  ;;  %v660_v38 = vpop.permute.xlu0 %659 }
  0xf9   :  { %v1993_v30 = vsel %vm279_vm3, %v1990_v2, %v1992_v60  ;;  %v2037_v48 = vrot.slane %v2030_v39, 6  ;;  %v589_v35 = vadd.f32 %v6079_v23, %v573_v31  ;;  %v2026_v5 = vadd.f32 %v2021_v54, %v2011_v50  ;;  %v6091_v60 = vld [vmem:[#allocation16_spill] sm:$0xff] }
  0xfa   :  { %v1982_v47 = vadd.f32 %v1978_v6, %v1967_v24  ;;  %v2008_v3 = vsel %vm296_vm4, %v2005_v45, %v2007_v41  ;;  %v667_v10 = vmul.f32 %v6080_v1, %v656_v40  ;;  %v2023_v8 = vsel %vm313_vm5, %v2020_v22, %v2022_v55  ;;  %v6092_v41 = vld [vmem:[#allocation28_spill] sm:$0xff]  ;;  %v6093_v55 = vld [vmem:[#allocation22_spill] sm:$0xff] }
  0xfb   :  { %v605_v33 = vadd.f32 %v6081_v7, %v589_v35  ;;  %v683_v12 = vmul.f32 %v6082_v27, %v656_v40  ;;  %v4251_v56 = vmul.f32 %v6083_v13, %v656_v40  ;;  %v2041_v2 = vadd.f32 %v2036_v44, %v2026_v5  ;;  %v6095_v5 = vld [vmem:[#allocation26_spill] sm:$0xff]  ;;  %v6096_v7 = vld [vmem:[#allocation17_spill] sm:$0xff] }
  0xfc   :  { %v1997_v4 = vadd.f32 %v1993_v30, %v1982_v47  ;;  %v4254_v26 = vmul.f32 %v6084_v28, %v656_v40  ;;  %v4257_v43 = vmul.f32 %v6085_v58, %v656_v40  ;;  %v2038_v45 = vsel %vm330_vm6, %v2035_v16, %v2037_v48  ;;  %v6094_v30 = vld [vmem:[#allocation15_spill] sm:$0xff] }
  0xfd   :  { %v621_v22 = vadd.f32 %v6086_v21, %v605_v33  ;;  %v662_v62 = vmul.f32 %v6087_v29, %v656_v40  ;;  %v673_v34 = vrot.slane %v667_v10, 1  ;;  %v2045_v15 = vadd.f32 %v6088_v52, %v2041_v2  ;;  %v6098_v21 = vld [vmem:[#allocation18_spill] sm:$0xff] }
  0xfe   :  { %v2012_v31 = vadd.f32 %v2008_v3, %v1997_v4  ;;  %v4264_v37 = vmul.f32 %v6089_v32, %v656_v40  ;;  %v669_v25 = vmul.f32 %v6080_v1, %v660_v38  ;;  %v689_v57 = vrot.slane %v683_v12, 2 }
  0xff   :  { %v637_v19 = vadd.f32 %v6090_v61, %v621_v22  ;;  %v685_v9 = vmul.f32 %v6082_v27, %v660_v38  ;;  %v701_v16 = vmul.f32 %v6083_v13, %v660_v38  ;;  %v705_v51 = vrot.slane %v4251_v56, 3  ;;  %v6097_v56 = vld [vmem:[#allocation30_spill] sm:$0xff] }
 0x100   :  { %v2027_v59 = vadd.f32 %v2023_v8, %v2012_v31  ;;  %v721_v36 = vrot.slane %v4254_v26, 4  ;;  %v737_v39 = vrot.slane %v4257_v43, 5  ;;  %v4274_v40 = vadd.f32 %v6091_v60, %v2045_v15 }
 0x101   :  { %v653_v46 = vadd.f32 %v6092_v41, %v637_v19  ;;  %v753_v14 = vrot.slane %v4264_v37, 6  ;;  %v717_v49 = vmul.f32 %v6084_v28, %v660_v38  ;;  %v676_v54 = vrot.slane %v669_v25, 1 }
 0x102   :  { %v2042_v53 = vadd.f32 %v2038_v45, %v2027_v59  ;;  %v692_v42 = vrot.slane %v685_v9, 2  ;;  %v590_v0 = vadd.f32 %v6093_v55, %v574_v11  ;;  %v708_v50 = vrot.slane %v701_v16, 3  ;;  %v2140_v16 = vpop.permute.xlu0 %2139  ;;  %v6100_v59 = vld [vmem:[#allocation32_spill] sm:$0xff] }
 0x103   :  { %v733_v44 = vmul.f32 %v6085_v58, %v660_v38  ;;  %v668_v24 = vmul.f32 %v6080_v1, %v658_v63  ;;  %v684_v6 = vmul.f32 %v6082_v27, %v658_v63  ;;  %v664_v23 = vadd.f32 %v662_v62, %v653_v46  ;;  %v6099_v62 = vld [vmem:[#allocation31_spill] sm:$0xff] }
 0x104   :  { %v2046_v48 = vadd.f32 %v6094_v30, %v2042_v53  ;;  %v4285_v35 = vmul.f32 %v6089_v32, %v660_v38  ;;  %v606_v47 = vadd.f32 %v6095_v5, %v590_v0  ;;  %v700_v8 = vmul.f32 %v6083_v13, %v658_v63  ;;  %v6102_v5 = vld [vmem:[#allocation38_spill] sm:$0xff] }
 0x105   :  { %v674_v3 = vrot.slane %v668_v24, 1  ;;  %v690_v10 = vrot.slane %v684_v6, 2  ;;  %v716_v11 = vmul.f32 %v6084_v28, %v658_v63  ;;  %v724_v12 = vrot.slane %v717_v49, 4 }
 0x106   :  { %v2061_v33 = vadd.f32 %v6096_v7, %v2046_v48  ;;  %v622_v2 = vadd.f32 %v6097_v56, %v606_v47  ;;  %v732_v4 = vmul.f32 %v6085_v58, %v658_v63  ;;  %v740_v26 = vrot.slane %v733_v44, 5  ;;  %v6101_v44 = vld [vmem:[#allocation36_spill] sm:$0xff]  ;;  %v6103_v7 = vld [vmem:[#allocation39_spill] sm:$0xff]  ;;  %v6104_v56 = vld [vmem:[#allocation41_spill] sm:$0xff] }
 0x107   :  { %v663_v43 = vmul.f32 %v6087_v29, %v658_v63  ;;  %v675_v38 = vsel %vm245_vm1, %v673_v34, %v674_v3  ;;  %v4296_v45 = vmul.f32 %v6089_v32, %v658_v63  ;;  %v706_v31 = vrot.slane %v700_v8, 3 }
 0x108   :  { %v2076_v22 = vadd.f32 %v6098_v21, %v2061_v33  ;;  %v638_v52 = vadd.f32 %v6099_v62, %v622_v2  ;;  %v680_v15 = vadd.f32 %v675_v38, %v664_v23  ;;  %v756_v25 = vrot.slane %v4285_v35, 6 }
 0x109   :  { %v691_v61 = vsel %vm262_vm2, %v689_v57, %v690_v10  ;;  %v722_v19 = vrot.slane %v716_v11, 4  ;;  %v738_v9 = vrot.slane %v732_v4, 5  ;;  %v677_v34 = vsel %vm245_vm1, %v674_v3, %v676_v54 }
 0x10a   :  { %v654_v60 = vadd.f32 %v6100_v59, %v638_v52  ;;  %v693_v63 = vsel %vm262_vm2, %v690_v10, %v692_v42  ;;  %v696_v41 = vadd.f32 %v691_v61, %v680_v15  ;;  %v707_v46 = vsel %vm279_vm3, %v705_v51, %v706_v31  ;;  %v6106_v15 = vld [vmem:[#allocation42_spill] sm:$0xff] }
 0x10b   :  { %v709_v49 = vsel %vm279_vm3, %v706_v31, %v708_v50  ;;  %v754_v53 = vrot.slane %v4296_v45, 6  ;;  %v2144_v55 = vmul.f32 %v2140_v16, %v6087_v29  ;;  %v2091_v24 = vadd.f32 %v6101_v44, %v2076_v22  ;;  %v2138_v50 = vpop.permute.xlu1 %2137  ;;  %v6105_v22 = vld [vmem:[#allocation40_spill] sm:$0xff] }
 0x10c   :  { %v665_v0 = vadd.f32 %v663_v43, %v654_v60  ;;  %v712_v57 = vadd.f32 %v707_v46, %v696_v41  ;;  %v4311_v6 = vmul.f32 %v2140_v16, %v6080_v1  ;;  %v723_v54 = vsel %vm296_vm4, %v721_v36, %v722_v19  ;;  %v6107_v60 = vld [vmem:[#allocation43_spill] sm:$0xff]  ;;  %v6108_v44 = vld [vmem:[#allocation44_spill] sm:$0xff] }
 0x10d   :  { %v725_v42 = vsel %vm296_vm4, %v722_v19, %v724_v12  ;;  %v4316_v30 = vsel %vm313_vm5, %v737_v39, %v738_v9  ;;  %v4319_v51 = vmul.f32 %v2140_v16, %v6082_v27  ;;  %v4322_v23 = vsel %vm313_vm5, %v738_v9, %v740_v26 }
 0x10e   :  { %v681_v48 = vadd.f32 %v677_v34, %v665_v0  ;;  %v2106_v47 = vadd.f32 %v6102_v5, %v2091_v24  ;;  %v4326_v3 = vmul.f32 %v2140_v16, %v6083_v13  ;;  %v4328_v10 = vadd.f32 %v723_v54, %v712_v57 }
 0x10f   :  { %v2154_v36 = vrot.slane %v4311_v6, 1  ;;  %v4332_v39 = vmul.f32 %v2140_v16, %v6084_v28  ;;  %v4335_v8 = vmul.f32 %v2140_v16, %v6085_v58  ;;  %v2169_v12 = vrot.slane %v4319_v51, 2 }
 0x110   :  { %v697_v11 = vadd.f32 %v693_v63, %v681_v48  ;;  %v2121_v33 = vadd.f32 %v6103_v7, %v2106_v47  ;;  %v2075_v2 = vadd.f32 %v6104_v56, %v4274_v40  ;;  %v4342_v4 = vmul.f32 %v2140_v16, %v6089_v32  ;;  %v2142_v16 = vpop.permute.xlu1 %2141 }
 0x111   :  { %v2147_v26 = vmul.f32 %v2138_v50, %v6080_v1  ;;  %v2162_v43 = vmul.f32 %v2138_v50, %v6082_v27  ;;  %v2177_v38 = vmul.f32 %v2138_v50, %v6083_v13  ;;  %v2184_v52 = vrot.slane %v4326_v3, 3 }
 0x112   :  { %v713_v21 = vadd.f32 %v709_v49, %v697_v11  ;;  %v2136_v62 = vadd.f32 %v6105_v22, %v2121_v33  ;;  %v2090_v31 = vadd.f32 %v6106_v15, %v2075_v2  ;;  %v2199_v40 = vrot.slane %v4332_v39, 4 }
 0x113   :  { %v2153_v61 = vrot.slane %v2147_v26, 1  ;;  %v2168_v19 = vrot.slane %v2162_v43, 2  ;;  %v2192_v9 = vmul.f32 %v2138_v50, %v6084_v28  ;;  %v2214_v59 = vrot.slane %v4335_v8, 5  ;;  %v763_v43 = vpop.permute.xlu0 %762 }
 0x114   :  { %v2105_v34 = vadd.f32 %v6107_v60, %v2090_v31  ;;  %v2183_v63 = vrot.slane %v2177_v38, 3  ;;  %v2207_v41 = vmul.f32 %v2138_v50, %v6085_v58  ;;  %v4363_v46 = vadd.f32 %v725_v42, %v713_v21 }
 0x115   :  { %v2146_v49 = vadd.f32 %v2144_v55, %v2136_v62  ;;  %v2229_v0 = vrot.slane %v4342_v4, 6  ;;  %v2143_v57 = vmul.f32 %v2138_v50, %v6087_v29  ;;  %v2155_v6 = vsel %vm245_vm1, %v2153_v61, %v2154_v36 }
 0x116   :  { %v2120_v24 = vadd.f32 %v6108_v44, %v2105_v34  ;;  %v2170_v54 = vsel %vm262_vm2, %v2168_v19, %v2169_v12  ;;  %v2149_v51 = vmul.f32 %v2142_v16, %v6080_v1  ;;  %v2198_v48 = vrot.slane %v2192_v9, 4 }
 0x117   :  { %v2164_v42 = vmul.f32 %v2142_v16, %v6082_v27  ;;  %v2179_v55 = vmul.f32 %v2142_v16, %v6083_v13  ;;  %v2194_v5 = vmul.f32 %v2142_v16, %v6084_v28  ;;  %v2185_v47 = vsel %vm279_vm3, %v2183_v63, %v2184_v52 }
 0x118   :  { %v2135_v29 = vadd.f32 %v4234_v20, %v2120_v24  ;;  %v2213_v3 = vrot.slane %v2207_v41, 5  ;;  %v2156_v39 = vrot.slane %v2149_v51, 1  ;;  %v2209_v33 = vmul.f32 %v2142_v16, %v6085_v58 }
 0x119   :  { %v2171_v11 = vrot.slane %v2164_v42, 2  ;;  %v2186_v1 = vrot.slane %v2179_v55, 3  ;;  %v2201_v7 = vrot.slane %v2194_v5, 4  ;;  %v4384_v13 = vmul.f32 %v2138_v50, %v6089_v32 }
 0x11a   :  { %v2145_v27 = vadd.f32 %v2143_v57, %v2135_v29  ;;  %v2157_v28 = vsel %vm245_vm1, %v2154_v36, %v2156_v39  ;;  %v2224_v20 = vmul.f32 %v2142_v16, %v6089_v32  ;;  %v2200_v56 = vsel %vm296_vm4, %v2198_v48, %v2199_v40 }
 0x11b   :  { %v2161_v2 = vadd.f32 %v2157_v28, %v2146_v49  ;;  %v2172_v26 = vsel %vm262_vm2, %v2169_v12, %v2171_v11  ;;  %v4391_v58 = vstv %s4347_s19  ;;  %v2187_v50 = vsel %vm279_vm3, %v2184_v52, %v2186_v1  ;;  %v765_v11 = vpop.permute.xlu1 %764  ;;  %s5000_s19 = sld [smem:[#allocation3 + $0x33]] }
 0x11c   :  { %v2160_v38 = vadd.f32 %v2155_v6, %v2145_v27  ;;  %v2202_v21 = vsel %vm296_vm4, %v2199_v40, %v2201_v7  ;;  %v2216_v36 = vrot.slane %v2209_v33, 5  ;;  %v2231_v62 = vrot.slane %v2224_v20, 6 }
 0x11d   :  { %v2176_v22 = vadd.f32 %v2172_v26, %v2161_v2  ;;  %v4396_v32 = vstv %s4352_s20  ;;  %v4399_v15 = vstv %s4356_s21  ;;  %v4402_v61 = vstv %s4361_s22  ;;  %s5011_s20 = sld [smem:[#allocation3 + $0x3a]] }
 0x11e   :  { %v2175_v31 = vadd.f32 %v2170_v54, %v2160_v38  ;;  %v4405_v12 = vstv %s4367_s6  ;;  %v4408_v19 = vstv %s4373_s7  ;;  %v4411_v16 = vstv %s4378_s8  ;;  %s5017_s21 = sld [smem:[#allocation3 + $0x41]] }
 0x11f   :  { %v2191_v9 = vadd.f32 %v2187_v50, %v2176_v22  ;;  %v744_v52 = vadd.f32 %v4316_v30, %v4328_v10  ;;  %v755_v40 = vsel %vm330_vm6, %v753_v14, %v754_v53  ;;  %v769_v34 = vmul.f32 %v4391_v58, %v763_v43  ;;  %v767_v30 = vpop.permute.xlu0 %766  ;;  %s5024_s22 = sld [smem:[#allocation3 + $0x48]] }
 0x120   :  { %v2190_v60 = vadd.f32 %v2185_v47, %v2175_v31  ;;  %v774_v63 = vmul.f32 %v4396_v32, %v763_v43  ;;  %v790_v41 = vmul.f32 %v4399_v15, %v763_v43  ;;  %v806_v44 = vmul.f32 %v4402_v61, %v763_v43  ;;  %s5028_s6 = sld [smem:[#allocation3 + $0x4f]] }
 0x121   :  { %v2206_v49 = vadd.f32 %v2202_v21, %v2191_v9  ;;  %v760_v57 = vadd.f32 %v755_v40, %v744_v52  ;;  %v4425_v24 = vmul.f32 %v4405_v12, %v763_v43  ;;  %v4430_v37 = vsel %vm313_vm5, %v2213_v3, %v2214_v59  ;;  %s5035_s7 = sld [smem:[#allocation3 + $0x56]] }
 0x122   :  { %v2228_v14 = vrot.slane %v4384_v13, 6  ;;  %v2217_v10 = vsel %vm313_vm5, %v2214_v59, %v2216_v36  ;;  %v4437_v6 = vmul.f32 %v4408_v19, %v763_v43  ;;  %v4439_v54 = vadd.f32 %v2200_v56, %v2190_v60  ;;  %s5038_s8 = sld [smem:[#allocation3 + $0x5d]] }
 0x123   :  { %v2221_v51 = vadd.f32 %v2217_v10, %v2206_v49  ;;  %v2232_v48 = vsel %vm330_vm6, %v2229_v0, %v2231_v62  ;;  %v780_v42 = vrot.slane %v774_v63, 1  ;;  %v796_v55 = vrot.slane %v790_v41, 2 }
 0x124   :  { %v4445_v5 = vmul.f32 %v4411_v16, %v763_v43  ;;  %v776_v29 = vmul.f32 %v4396_v32, %v767_v30  ;;  %v792_v8 = vmul.f32 %v4399_v15, %v767_v30  ;;  %v771_v59 = vadd.f32 %v769_v34, %v760_v57 }
 0x125   :  { %v812_v47 = vrot.slane %v806_v44, 3  ;;  %v828_v3 = vrot.slane %v4425_v24, 4  ;;  %v844_v39 = vrot.slane %v4437_v6, 5  ;;  %v2236_v1 = vadd.f32 %v2232_v48, %v2221_v51  ;;  %v2240_v44 = vpop.permute.xlu0 %2239  ;;  %v2238_v24 = vpop.permute.xlu1 %2237 }
 0x126   :  { %v808_v7 = vmul.f32 %v4402_v61, %v767_v30  ;;  %v824_v33 = vmul.f32 %v4405_v12, %v767_v30  ;;  %v840_v27 = vmul.f32 %v4408_v19, %v767_v30  ;;  %v860_v28 = vrot.slane %v4445_v5, 6 }
 0x127   :  { %v783_v20 = vrot.slane %v776_v29, 1  ;;  %v799_v56 = vrot.slane %v792_v8, 2  ;;  %v745_v2 = vadd.f32 %v4322_v23, %v4363_v46  ;;  %v4458_v26 = vmul.f32 %v4411_v16, %v767_v30 }
 0x128   :  { %v757_v43 = vsel %vm330_vm6, %v754_v53, %v756_v25  ;;  %v770_v38 = vmul.f32 %v4391_v58, %v765_v11  ;;  %v775_v50 = vmul.f32 %v4396_v32, %v765_v11  ;;  %v791_v36 = vmul.f32 %v4399_v15, %v765_v11 }
 0x129   :  { %v761_v21 = vadd.f32 %v757_v43, %v745_v2  ;;  %v807_v22 = vmul.f32 %v4402_v61, %v765_v11  ;;  %v823_v23 = vmul.f32 %v4405_v12, %v765_v11  ;;  %v815_v46 = vrot.slane %v808_v7, 3 }
 0x12a   :  { %v781_v62 = vrot.slane %v775_v50, 1  ;;  %v839_v31 = vmul.f32 %v4408_v19, %v765_v11  ;;  %v4472_v35 = vmul.f32 %v4411_v16, %v765_v11  ;;  %v831_v45 = vrot.slane %v824_v33, 4 }
 0x12b   :  { %v772_v25 = vadd.f32 %v770_v38, %v761_v21  ;;  %v797_v53 = vrot.slane %v791_v36, 2  ;;  %v813_v9 = vrot.slane %v807_v22, 3  ;;  %v847_v52 = vrot.slane %v840_v27, 5 }
 0x12c   :  { %v782_v40 = vsel %vm245_vm1, %v780_v42, %v781_v62  ;;  %v784_v60 = vsel %vm245_vm1, %v781_v62, %v783_v20  ;;  %v829_v34 = vrot.slane %v823_v23, 4  ;;  %v863_v63 = vrot.slane %v4458_v26, 6 }
 0x12d   :  { %v787_v41 = vadd.f32 %v782_v40, %v771_v59  ;;  %v788_v49 = vadd.f32 %v784_v60, %v772_v25  ;;  %v845_v57 = vrot.slane %v839_v31, 5  ;;  %v798_v30 = vsel %vm262_vm2, %v796_v55, %v797_v53 }
 0x12e   :  { %v800_v10 = vsel %vm262_vm2, %v797_v53, %v799_v56  ;;  %v861_v6 = vrot.slane %v4472_v35, 6  ;;  %v2244_v51 = vmul.f32 %v2240_v44, %v4391_v58  ;;  %v814_v29 = vsel %vm279_vm3, %v812_v47, %v813_v9 }
 0x12f   :  { %v803_v48 = vadd.f32 %v798_v30, %v787_v41  ;;  %v804_v42 = vadd.f32 %v800_v10, %v788_v49  ;;  %v816_v8 = vsel %vm279_vm3, %v813_v9, %v815_v46  ;;  %v830_v59 = vsel %vm296_vm4, %v828_v3, %v829_v34 }
 0x130   :  { %v2248_v11 = vmul.f32 %v2240_v44, %v4396_v32  ;;  %v4486_v7 = vmul.f32 %v2240_v44, %v4399_v15  ;;  %v4489_v55 = vmul.f32 %v2240_v44, %v4402_v61  ;;  %v832_v27 = vsel %vm296_vm4, %v829_v34, %v831_v45 }
 0x131   :  { %v819_v33 = vadd.f32 %v814_v29, %v803_v48  ;;  %v4493_v20 = vsel %vm313_vm5, %v844_v39, %v845_v57  ;;  %v4496_v47 = vsel %vm313_vm5, %v845_v57, %v847_v52  ;;  %v820_v56 = vadd.f32 %v816_v8, %v804_v42  ;;  %v2242_v39 = vpop.permute.xlu1 %2241 }
 0x132   :  { %v2246_v2 = vadd.f32 %v2244_v51, %v2236_v1  ;;  %v4499_v3 = vmul.f32 %v2240_v44, %v4405_v12  ;;  %v4502_v43 = vmul.f32 %v2240_v44, %v4408_v19  ;;  %v2254_v38 = vrot.slane %v2248_v11, 1 }
 0x133   :  { %v2269_v50 = vrot.slane %v4486_v7, 2  ;;  %v2284_v21 = vrot.slane %v4489_v55, 3  ;;  %v4507_v36 = vmul.f32 %v2240_v44, %v4411_v16  ;;  %v835_v22 = vadd.f32 %v830_v59, %v819_v33 }
 0x134   :  { %v2230_v1 = vsel %vm330_vm6, %v2228_v14, %v2229_v0  ;;  %v2220_v23 = vadd.f32 %v4430_v37, %v4439_v54  ;;  %v2243_v46 = vmul.f32 %v2238_v24, %v4391_v58  ;;  %v2247_v62 = vmul.f32 %v2238_v24, %v4396_v32 }
 0x135   :  { %v2262_v31 = vmul.f32 %v2238_v24, %v4399_v15  ;;  %v2277_v45 = vmul.f32 %v2238_v24, %v4402_v61  ;;  %v2292_v25 = vmul.f32 %v2238_v24, %v4405_v12  ;;  %v4527_v4 = vadd.f32 %v832_v27, %v820_v56 }
 0x136   :  { %v2235_v0 = vadd.f32 %v2230_v1, %v2220_v23  ;;  %v2307_v13 = vmul.f32 %v2238_v24, %v4408_v19  ;;  %v2249_v37 = vmul.f32 %v2242_v39, %v4396_v32  ;;  %v2299_v58 = vrot.slane %v4499_v3, 4 }
 0x137   :  { %v2314_v14 = vrot.slane %v4502_v43, 5  ;;  %v2253_v54 = vrot.slane %v2247_v62, 1  ;;  %v2268_v53 = vrot.slane %v2262_v31, 2  ;;  %v2329_v9 = vrot.slane %v4507_v36, 6 }
 0x138   :  { %v2245_v52 = vadd.f32 %v2243_v46, %v2235_v0  ;;  %v4539_v40 = vmul.f32 %v2238_v24, %v4411_v16  ;;  %v2256_v60 = vrot.slane %v2249_v37, 1  ;;  %v2283_v34 = vrot.slane %v2277_v45, 3 }
 0x139   :  { %v2255_v32 = vsel %vm245_vm1, %v2253_v54, %v2254_v38  ;;  %v2298_v41 = vrot.slane %v2292_v25, 4  ;;  %v2313_v49 = vrot.slane %v2307_v13, 5  ;;  %v2270_v44 = vsel %vm262_vm2, %v2268_v53, %v2269_v50 }
 0x13a   :  { %v2260_v57 = vadd.f32 %v2255_v32, %v2245_v52  ;;  %v2257_v30 = vsel %vm245_vm1, %v2254_v38, %v2256_v60  ;;  %v2264_v10 = vmul.f32 %v2242_v39, %v4399_v15  ;;  %v2279_v51 = vmul.f32 %v2242_v39, %v4402_v61 }
 0x13b   :  { %v2261_v24 = vadd.f32 %v2257_v30, %v2246_v2  ;;  %v2294_v48 = vmul.f32 %v2242_v39, %v4405_v12  ;;  %v2309_v42 = vmul.f32 %v2242_v39, %v4408_v19  ;;  %v2328_v8 = vrot.slane %v4539_v40, 6  ;;  %v870_v12 = vpop.permute.xlu0 %869 }
 0x13c   :  { %v2275_v29 = vadd.f32 %v2270_v44, %v2260_v57  ;;  %v2271_v59 = vrot.slane %v2264_v10, 2  ;;  %v2324_v11 = vmul.f32 %v2242_v39, %v4411_v16  ;;  %v2285_v7 = vsel %vm279_vm3, %v2283_v34, %v2284_v21 }
 0x13d   :  { %v2300_v15 = vsel %vm296_vm4, %v2298_v41, %v2299_v58  ;;  %v2286_v55 = vrot.slane %v2279_v51, 3  ;;  %v2301_v61 = vrot.slane %v2294_v48, 4  ;;  %v2316_v33 = vrot.slane %v2309_v42, 5  ;;  %v872_v51 = vpop.permute.xlu1 %871 }
 0x13e   :  { %v2272_v19 = vsel %vm262_vm2, %v2269_v50, %v2271_v59  ;;  %v4558_v27 = vstv %s4509_s9  ;;  %v4561_v56 = vstv %s4519_s10  ;;  %v2290_v2 = vadd.f32 %v2285_v7, %v2275_v29  ;;  %s5086_s9 = sld [smem:[#allocation3 + $0x34]] }
 0x13f   :  { %v2276_v16 = vadd.f32 %v2272_v19, %v2261_v24  ;;  %v2331_v3 = vrot.slane %v2324_v11, 6  ;;  %v4564_v43 = vstv %s4525_s11  ;;  %v2287_v38 = vsel %vm279_vm3, %v2284_v21, %v2286_v55  ;;  %s5097_s10 = sld [smem:[#allocation3 + $0x3b]] }
 0x140   :  { %v2302_v39 = vsel %vm296_vm4, %v2299_v58, %v2301_v61  ;;  %v4569_v1 = vstv %s4531_s12  ;;  %v4572_v23 = vstv %s4535_s13  ;;  %v4575_v50 = vstv %s4541_s14  ;;  %s5221_s11 = sld [smem:[#allocation3 + $0x42]] }
 0x141   :  { %v2291_v46 = vadd.f32 %v2287_v38, %v2276_v16  ;;  %v4578_v62 = vstv %s4544_s17  ;;  %v851_v31 = vadd.f32 %v4493_v20, %v835_v22  ;;  %v862_v45 = vsel %vm330_vm6, %v860_v28, %v861_v6  ;;  %v874_v20 = vpop.permute.xlu0 %873  ;;  %s5272_s12 = sld [smem:[#allocation3 + $0x49]] }
 0x142   :  { %v876_v21 = vmul.f32 %v4558_v27, %v870_v12  ;;  %v881_v25 = vmul.f32 %v4561_v56, %v870_v12  ;;  %v897_v0 = vmul.f32 %v4564_v43, %v870_v12  ;;  %v913_v58 = vmul.f32 %v4569_v1, %v870_v12  ;;  %s5281_s13 = sld [smem:[#allocation3 + $0x50]] }
 0x143   :  { %v2306_v13 = vadd.f32 %v2302_v39, %v2291_v46  ;;  %v867_v37 = vadd.f32 %v862_v45, %v851_v31  ;;  %v4591_v54 = vmul.f32 %v4572_v23, %v870_v12  ;;  %v4594_v22 = vsel %vm313_vm5, %v2313_v49, %v2314_v14  ;;  %s5286_s14 = sld [smem:[#allocation3 + $0x57]] }
 0x144   :  { %v2317_v5 = vsel %vm313_vm5, %v2314_v14, %v2316_v33  ;;  %v4598_v28 = vmul.f32 %v4575_v50, %v870_v12  ;;  %v4601_v53 = vmul.f32 %v4578_v62, %v870_v12  ;;  %v4603_v52 = vadd.f32 %v2300_v15, %v2290_v2  ;;  %s5296_s17 = sld [smem:[#allocation3 + $0x5e]] }
 0x145   :  { %v2321_v60 = vadd.f32 %v2317_v5, %v2306_v13  ;;  %v2332_v32 = vsel %vm330_vm6, %v2329_v9, %v2331_v3  ;;  %v887_v34 = vrot.slane %v881_v25, 1  ;;  %v878_v41 = vadd.f32 %v876_v21, %v867_v37  ;;  %v2340_v16 = vpop.permute.xlu0 %2339 }
 0x146   :  { %v903_v57 = vrot.slane %v897_v0, 2  ;;  %v883_v49 = vmul.f32 %v4561_v56, %v874_v20  ;;  %v899_v14 = vmul.f32 %v4564_v43, %v874_v20  ;;  %v919_v44 = vrot.slane %v913_v58, 3 }
 0x147   :  { %v935_v30 = vrot.slane %v4591_v54, 4  ;;  %v951_v10 = vrot.slane %v4598_v28, 5  ;;  %v967_v24 = vrot.slane %v4601_v53, 6  ;;  %v2336_v48 = vadd.f32 %v2332_v32, %v2321_v60 }
 0x148   :  { %v915_v42 = vmul.f32 %v4569_v1, %v874_v20  ;;  %v931_v29 = vmul.f32 %v4572_v23, %v874_v20  ;;  %v852_v59 = vadd.f32 %v4496_v47, %v4527_v4  ;;  %v890_v11 = vrot.slane %v883_v49, 1 }
 0x149   :  { %v906_v7 = vrot.slane %v899_v14, 2  ;;  %v947_v15 = vmul.f32 %v4575_v50, %v874_v20  ;;  %v864_v55 = vsel %vm330_vm6, %v861_v6, %v863_v63  ;;  %v4624_v61 = vmul.f32 %v4578_v62, %v874_v20  ;;  %v2338_v20 = vpop.permute.xlu1 %2337 }
 0x14a   :  { %v868_v12 = vadd.f32 %v864_v55, %v852_v59  ;;  %v877_v19 = vmul.f32 %v4558_v27, %v872_v51  ;;  %v882_v33 = vmul.f32 %v4561_v56, %v872_v51  ;;  %v898_v47 = vmul.f32 %v4564_v43, %v872_v51 }
 0x14b   :  { %v914_v4 = vmul.f32 %v4569_v1, %v872_v51  ;;  %v930_v2 = vmul.f32 %v4572_v23, %v872_v51  ;;  %v946_v26 = vmul.f32 %v4575_v50, %v872_v51  ;;  %v4633_v63 = vmul.f32 %v4578_v62, %v872_v51 }
 0x14c   :  { %v879_v35 = vadd.f32 %v877_v19, %v868_v12  ;;  %v888_v3 = vrot.slane %v882_v33, 1  ;;  %v2344_v6 = vmul.f32 %v2340_v16, %v4558_v27  ;;  %v922_v38 = vrot.slane %v915_v42, 3 }
 0x14d   :  { %v938_v39 = vrot.slane %v931_v29, 4  ;;  %v904_v46 = vrot.slane %v898_v47, 2  ;;  %v920_v31 = vrot.slane %v914_v4, 3  ;;  %v954_v45 = vrot.slane %v947_v15, 5 }
 0x14e   :  { %v970_v21 = vrot.slane %v4624_v61, 6  ;;  %v889_v25 = vsel %vm245_vm1, %v887_v34, %v888_v3  ;;  %v891_v0 = vsel %vm245_vm1, %v888_v3, %v890_v11  ;;  %v936_v58 = vrot.slane %v930_v2, 4 }
 0x14f   :  { %v894_v13 = vadd.f32 %v889_v25, %v878_v41  ;;  %v895_v37 = vadd.f32 %v891_v0, %v879_v35  ;;  %v952_v54 = vrot.slane %v946_v26, 5  ;;  %v905_v5 = vsel %vm262_vm2, %v903_v57, %v904_v46 }
 0x150   :  { %v907_v28 = vsel %vm262_vm2, %v904_v46, %v906_v7  ;;  %v968_v60 = vrot.slane %v4633_v63, 6  ;;  %v2346_v32 = vadd.f32 %v2344_v6, %v2336_v48  ;;  %v921_v51 = vsel %vm279_vm3, %v919_v44, %v920_v31 }
 0x151   :  { %v910_v49 = vadd.f32 %v905_v5, %v894_v13  ;;  %v911_v14 = vadd.f32 %v907_v28, %v895_v37  ;;  %v923_v34 = vsel %vm279_vm3, %v920_v31, %v922_v38  ;;  %v2348_v42 = vmul.f32 %v2340_v16, %v4561_v56 }
 0x152   :  { %v4646_v41 = vmul.f32 %v2340_v16, %v4564_v43  ;;  %v4649_v29 = vmul.f32 %v2340_v16, %v4569_v1  ;;  %v4652_v57 = vmul.f32 %v2340_v16, %v4572_v23  ;;  %v937_v59 = vsel %vm296_vm4, %v935_v30, %v936_v58 }
 0x153   :  { %v939_v48 = vsel %vm296_vm4, %v936_v58, %v938_v39  ;;  %v4657_v11 = vsel %vm313_vm5, %v951_v10, %v952_v54  ;;  %v4660_v44 = vsel %vm313_vm5, %v952_v54, %v954_v45  ;;  %v926_v7 = vadd.f32 %v921_v51, %v910_v49  ;;  %v2342_v10 = vpop.permute.xlu1 %2341 }
 0x154   :  { %v927_v15 = vadd.f32 %v923_v34, %v911_v14  ;;  %v4663_v55 = vmul.f32 %v2340_v16, %v4575_v50  ;;  %v4666_v12 = vmul.f32 %v2340_v16, %v4578_v62  ;;  %v2354_v19 = vrot.slane %v2348_v42, 1 }
 0x155   :  { %v2369_v33 = vrot.slane %v4646_v41, 2  ;;  %v2384_v30 = vrot.slane %v4649_v29, 3  ;;  %v2399_v47 = vrot.slane %v4652_v57, 4  ;;  %v2330_v4 = vsel %vm330_vm6, %v2328_v8, %v2329_v9 }
 0x156   :  { %v2320_v2 = vadd.f32 %v4594_v22, %v4603_v52  ;;  %v2343_v26 = vmul.f32 %v2338_v20, %v4558_v27  ;;  %v2347_v16 = vmul.f32 %v2338_v20, %v4561_v56  ;;  %v2362_v35 = vmul.f32 %v2338_v20, %v4564_v43 }
 0x157   :  { %v2377_v3 = vmul.f32 %v2338_v20, %v4569_v1  ;;  %v2392_v6 = vmul.f32 %v2338_v20, %v4572_v23  ;;  %v4688_v36 = vmul.f32 %v2338_v20, %v4575_v50  ;;  %v942_v9 = vadd.f32 %v937_v59, %v926_v7 }
 0x158   :  { %v2335_v40 = vadd.f32 %v2330_v4, %v2320_v2  ;;  %v2353_v8 = vrot.slane %v2347_v16, 1  ;;  %v2349_v27 = vmul.f32 %v2342_v10, %v4561_v56  ;;  %v4695_v22 = vadd.f32 %v939_v48, %v927_v15 }
 0x159   :  { %v2414_v52 = vrot.slane %v4663_v55, 5  ;;  %v2429_v38 = vrot.slane %v4666_v12, 6  ;;  %v2368_v39 = vrot.slane %v2362_v35, 2  ;;  %v4703_v45 = vmul.f32 %v2338_v20, %v4578_v62 }
 0x15a   :  { %v2345_v46 = vadd.f32 %v2343_v26, %v2335_v40  ;;  %v2355_v31 = vsel %vm245_vm1, %v2353_v8, %v2354_v19  ;;  %v2356_v25 = vrot.slane %v2349_v27, 1  ;;  %v2383_v0 = vrot.slane %v2377_v3, 3 }
 0x15b   :  { %v2370_v56 = vsel %vm262_vm2, %v2368_v39, %v2369_v33  ;;  %v2398_v13 = vrot.slane %v2392_v6, 4  ;;  %v2413_v37 = vrot.slane %v4688_v36, 5  ;;  %v2364_v5 = vmul.f32 %v2342_v10, %v4564_v43 }
 0x15c   :  { %v2360_v58 = vadd.f32 %v2355_v31, %v2345_v46  ;;  %v2357_v54 = vsel %vm245_vm1, %v2354_v19, %v2356_v25  ;;  %v2379_v20 = vmul.f32 %v2342_v10, %v4569_v1  ;;  %v2394_v49 = vmul.f32 %v2342_v10, %v4572_v23 }
 0x15d   :  { %v2361_v28 = vadd.f32 %v2357_v54, %v2346_v32  ;;  %v2409_v14 = vmul.f32 %v2342_v10, %v4575_v50  ;;  %v2424_v51 = vmul.f32 %v2342_v10, %v4578_v62  ;;  %v2428_v42 = vrot.slane %v4703_v45, 6  ;;  %v980_v50 = vpop.permute.xlu0 %979 }
 0x15e   :  { %v2375_v34 = vadd.f32 %v2370_v56, %v2360_v58  ;;  %v2371_v41 = vrot.slane %v2364_v5, 2  ;;  %v2386_v29 = vrot.slane %v2379_v20, 3  ;;  %v2385_v43 = vsel %vm279_vm3, %v2383_v0, %v2384_v30 }
 0x15f   :  { %v2400_v1 = vsel %vm296_vm4, %v2398_v13, %v2399_v47  ;;  %v2401_v32 = vrot.slane %v2394_v49, 4  ;;  %v4721_v23 = vstv %s4671_s18  ;;  %v2416_v57 = vrot.slane %v2409_v14, 5  ;;  %v982_v49 = vpop.permute.xlu1 %981  ;;  %s5299_s18 = sld [smem:[#allocation3 + $0x3c]] }
 0x160   :  { %v2372_v62 = vsel %vm262_vm2, %v2369_v33, %v2371_v41  ;;  %v2431_v59 = vrot.slane %v2424_v51, 6  ;;  %v4725_v48 = vstv %s4682_s23  ;;  %v2390_v7 = vadd.f32 %v2385_v43, %v2375_v34  ;;  %s5307_s23 = sld [smem:[#allocation3 + $0x43]] }
 0x161   :  { %v2376_v15 = vadd.f32 %v2372_v62, %v2361_v28  ;;  %v2387_v55 = vsel %vm279_vm3, %v2384_v30, %v2386_v29  ;;  %v4729_v19 = vstv %s4690_s24  ;;  %v2402_v10 = vsel %vm296_vm4, %v2399_v47, %v2401_v32  ;;  %s5319_s24 = sld [smem:[#allocation3 + $0x4a]] }
 0x162   :  { %v4733_v4 = vstv %s4693_s0  ;;  %v4736_v2 = vstv %s4699_s25  ;;  %v4739_v26 = vstv %s4705_s26  ;;  %v4742_v33 = vstv %s4709_s27  ;;  %s5331_s0 = sld [smem:[#allocation3 + $0x51]] }
 0x163   :  { %v2391_v16 = vadd.f32 %v2387_v55, %v2376_v15  ;;  %v958_v35 = vadd.f32 %v4657_v11, %v942_v9  ;;  %v969_v30 = vsel %vm330_vm6, %v967_v24, %v968_v60  ;;  %v986_v3 = vmul.f32 %v4721_v23, %v980_v50  ;;  %v984_v9 = vpop.permute.xlu0 %983  ;;  %s5336_s25 = sld [smem:[#allocation3 + $0x58]] }
 0x164   :  { %v991_v47 = vmul.f32 %v4725_v48, %v980_v50  ;;  %v1007_v6 = vmul.f32 %v4729_v19, %v980_v50  ;;  %v1023_v36 = vmul.f32 %v4733_v4, %v980_v50  ;;  %v1039_v27 = vmul.f32 %v4736_v2, %v980_v50  ;;  %s5344_s26 = sld [smem:[#allocation3 + $0x5f]] }
 0x165   :  { %v2406_v40 = vadd.f32 %v2402_v10, %v2391_v16  ;;  %v974_v8 = vadd.f32 %v969_v30, %v958_v35  ;;  %v4756_v11 = vmul.f32 %v4739_v26, %v980_v50  ;;  %v4759_v53 = vsel %vm313_vm5, %v2413_v37, %v2414_v52  ;;  %s5354_s27 = sld [smem:[#allocation3 + $0x35]] }
 0x166   :  { %v2417_v24 = vsel %vm313_vm5, %v2414_v52, %v2416_v57  ;;  %v2432_v39 = vsel %vm330_vm6, %v2429_v38, %v2431_v59  ;;  %v4766_v46 = vmul.f32 %v4742_v33, %v980_v50  ;;  %v4768_v31 = vadd.f32 %v2400_v1, %v2390_v7 }
 0x167   :  { %v2421_v25 = vadd.f32 %v2417_v24, %v2406_v40  ;;  %v997_v56 = vrot.slane %v991_v47, 1  ;;  %v1013_v0 = vrot.slane %v1007_v6, 2  ;;  %v988_v13 = vadd.f32 %v986_v3, %v974_v8  ;;  %v2443_v30 = vpop.permute.xlu0 %2442 }
 0x168   :  { %v1029_v58 = vrot.slane %v1023_v36, 3  ;;  %v993_v54 = vmul.f32 %v4725_v48, %v984_v9  ;;  %v1009_v37 = vmul.f32 %v4729_v19, %v984_v9  ;;  %v1045_v5 = vrot.slane %v1039_v27, 4 }
 0x169   :  { %v1061_v52 = vrot.slane %v4756_v11, 5  ;;  %v1077_v20 = vrot.slane %v4766_v46, 6  ;;  %v1025_v28 = vmul.f32 %v4733_v4, %v984_v9  ;;  %v2436_v14 = vadd.f32 %v2432_v39, %v2421_v25 }
 0x16a   :  { %v1041_v51 = vmul.f32 %v4736_v2, %v984_v9  ;;  %v1057_v34 = vmul.f32 %v4739_v26, %v984_v9  ;;  %v959_v41 = vadd.f32 %v4660_v44, %v4695_v22  ;;  %v1000_v29 = vrot.slane %v993_v54, 1 }
 0x16b   :  { %v1016_v43 = vrot.slane %v1009_v37, 2  ;;  %v4780_v1 = vmul.f32 %v4742_v33, %v984_v9  ;;  %v971_v32 = vsel %vm330_vm6, %v968_v60, %v970_v21  ;;  %v987_v62 = vmul.f32 %v4721_v23, %v982_v49  ;;  %v2441_v9 = vpop.permute.xlu1 %2440 }
 0x16c   :  { %v975_v50 = vadd.f32 %v971_v32, %v959_v41  ;;  %v992_v57 = vmul.f32 %v4725_v48, %v982_v49  ;;  %v1008_v59 = vmul.f32 %v4729_v19, %v982_v49  ;;  %v1024_v44 = vmul.f32 %v4733_v4, %v982_v49 }
 0x16d   :  { %v1040_v22 = vmul.f32 %v4736_v2, %v982_v49  ;;  %v1056_v7 = vmul.f32 %v4739_v26, %v982_v49  ;;  %v4794_v15 = vmul.f32 %v4742_v33, %v982_v49  ;;  %v1032_v61 = vrot.slane %v1025_v28, 3 }
 0x16e   :  { %v989_v63 = vadd.f32 %v987_v62, %v975_v50  ;;  %v998_v55 = vrot.slane %v992_v57, 1  ;;  %v1014_v21 = vrot.slane %v1008_v59, 2  ;;  %v1048_v60 = vrot.slane %v1041_v51, 4 }
 0x16f   :  { %v1064_v10 = vrot.slane %v1057_v34, 5  ;;  %v1030_v16 = vrot.slane %v1024_v44, 3  ;;  %v1046_v35 = vrot.slane %v1040_v22, 4  ;;  %v1080_v3 = vrot.slane %v4780_v1, 6 }
 0x170   :  { %v999_v47 = vsel %vm245_vm1, %v997_v56, %v998_v55  ;;  %v1001_v6 = vsel %vm245_vm1, %v998_v55, %v1000_v29  ;;  %v2447_v36 = vmul.f32 %v2443_v30, %v4721_v23  ;;  %v1062_v27 = vrot.slane %v1056_v7, 5 }
 0x171   :  { %v1004_v40 = vadd.f32 %v999_v47, %v988_v13  ;;  %v1005_v8 = vadd.f32 %v1001_v6, %v989_v63  ;;  %v1078_v11 = vrot.slane %v4794_v15, 6  ;;  %v1015_v24 = vsel %vm262_vm2, %v1013_v0, %v1014_v21 }
 0x172   :  { %v1017_v39 = vsel %vm262_vm2, %v1014_v21, %v1016_v43  ;;  %v1031_v25 = vsel %vm279_vm3, %v1029_v58, %v1030_v16  ;;  %v1033_v54 = vsel %vm279_vm3, %v1030_v16, %v1032_v61  ;;  %v1047_v28 = vsel %vm296_vm4, %v1045_v5, %v1046_v35 }
 0x173   :  { %v1020_v37 = vadd.f32 %v1015_v24, %v1004_v40  ;;  %v1021_v56 = vadd.f32 %v1017_v39, %v1005_v8  ;;  %v2451_v49 = vmul.f32 %v2443_v30, %v4725_v48  ;;  %v4808_v13 = vmul.f32 %v2443_v30, %v4729_v19 }
 0x174   :  { %v4811_v51 = vmul.f32 %v2443_v30, %v4733_v4  ;;  %v4814_v0 = vmul.f32 %v2443_v30, %v4736_v2  ;;  %v4817_v34 = vmul.f32 %v2443_v30, %v4739_v26  ;;  %v1049_v58 = vsel %vm296_vm4, %v1046_v35, %v1048_v60 }
 0x175   :  { %v4821_v41 = vsel %vm313_vm5, %v1061_v52, %v1062_v27  ;;  %v4824_v5 = vsel %vm313_vm5, %v1062_v27, %v1064_v10  ;;  %v2449_v29 = vadd.f32 %v2447_v36, %v2436_v14  ;;  %v1036_v43 = vadd.f32 %v1031_v25, %v1020_v37  ;;  %v2445_v52 = vpop.permute.xlu1 %2444 }
 0x176   :  { %v1037_v32 = vadd.f32 %v1033_v54, %v1021_v56  ;;  %v2457_v50 = vrot.slane %v2451_v49, 1  ;;  %v4827_v62 = vmul.f32 %v2443_v30, %v4742_v33  ;;  %v2472_v57 = vrot.slane %v4808_v13, 2 }
 0x177   :  { %v2487_v59 = vrot.slane %v4811_v51, 3  ;;  %v2502_v44 = vrot.slane %v4814_v0, 4  ;;  %v2517_v22 = vrot.slane %v4817_v34, 5  ;;  %v2420_v14 = vadd.f32 %v4759_v53, %v4768_v31 }
 0x178   :  { %v2446_v7 = vmul.f32 %v2441_v9, %v4721_v23  ;;  %v2450_v61 = vmul.f32 %v2441_v9, %v4725_v48  ;;  %v2465_v63 = vmul.f32 %v2441_v9, %v4729_v19  ;;  %v2430_v55 = vsel %vm330_vm6, %v2428_v42, %v2429_v38 }
 0x179   :  { %v2480_v21 = vmul.f32 %v2441_v9, %v4733_v4  ;;  %v2495_v60 = vmul.f32 %v2441_v9, %v4736_v2  ;;  %v4850_v53 = vmul.f32 %v2441_v9, %v4739_v26  ;;  %v2435_v23 = vadd.f32 %v2430_v55, %v2420_v14 }
 0x17a   :  { %v2456_v31 = vrot.slane %v2450_v61, 1  ;;  %v2471_v10 = vrot.slane %v2465_v63, 2  ;;  %v2452_v16 = vmul.f32 %v2445_v52, %v4725_v48  ;;  %v1052_v12 = vadd.f32 %v1047_v28, %v1036_v43 }
 0x17b   :  { %v4857_v45 = vadd.f32 %v1049_v58, %v1037_v32  ;;  %v2532_v38 = vrot.slane %v4827_v62, 6  ;;  %v4861_v42 = vmul.f32 %v2441_v9, %v4742_v33  ;;  %v2448_v35 = vadd.f32 %v2446_v7, %v2435_v23 }
 0x17c   :  { %v2458_v30 = vsel %vm245_vm1, %v2456_v31, %v2457_v50  ;;  %v2486_v47 = vrot.slane %v2480_v21, 3  ;;  %v2459_v6 = vrot.slane %v2452_v16, 1  ;;  %v2473_v48 = vsel %vm262_vm2, %v2471_v10, %v2472_v57 }
 0x17d   :  { %v2501_v36 = vrot.slane %v2495_v60, 4  ;;  %v2516_v40 = vrot.slane %v4850_v53, 5  ;;  %v2467_v8 = vmul.f32 %v2445_v52, %v4729_v19  ;;  %v2463_v27 = vadd.f32 %v2458_v30, %v2448_v35 }
 0x17e   :  { %v2460_v9 = vsel %vm245_vm1, %v2457_v50, %v2459_v6  ;;  %v2482_v24 = vmul.f32 %v2445_v52, %v4733_v4  ;;  %v2497_v39 = vmul.f32 %v2445_v52, %v4736_v2  ;;  %v2512_v37 = vmul.f32 %v2445_v52, %v4739_v26  ;;  %v1087_v26 = vpop.permute.xlu0 %1086 }
 0x17f   :  { %v2464_v25 = vadd.f32 %v2460_v9, %v2449_v29  ;;  %v2474_v54 = vrot.slane %v2467_v8, 2  ;;  %v2527_v56 = vmul.f32 %v2445_v52, %v4742_v33  ;;  %v2478_v28 = vadd.f32 %v2473_v48, %v2463_v27 }
 0x180   :  { %v2531_v19 = vrot.slane %v4861_v42, 6  ;;  %v2489_v49 = vrot.slane %v2482_v24, 3  ;;  %v2504_v13 = vrot.slane %v2497_v39, 4  ;;  %v2488_v51 = vsel %vm279_vm3, %v2486_v47, %v2487_v59 }
 0x181   :  { %v2503_v4 = vsel %vm296_vm4, %v2501_v36, %v2502_v44  ;;  %v2475_v2 = vsel %vm262_vm2, %v2472_v57, %v2474_v54  ;;  %v4883_v0 = vstv %s4833_s28  ;;  %v2519_v58 = vrot.slane %v2512_v37, 5  ;;  %v1089_v54 = vpop.permute.xlu1 %1088  ;;  %s5602_s28 = sld [smem:[#allocation3 + $0x36]] }
 0x182   :  { %v2479_v33 = vadd.f32 %v2475_v2, %v2464_v25  ;;  %v2534_v29 = vrot.slane %v2527_v56, 6  ;;  %v4886_v43 = vstv %s4840_s29  ;;  %v2493_v32 = vadd.f32 %v2488_v51, %v2478_v28  ;;  %s5606_s29 = sld [smem:[#allocation3 + $0x3d]] }
 0x183   :  { %v2490_v50 = vsel %vm279_vm3, %v2487_v59, %v2489_v49  ;;  %v4890_v52 = vstv %s4852_s30  ;;  %v4893_v14 = vstv %s4855_s1  ;;  %v2505_v61 = vsel %vm296_vm4, %v2502_v44, %v2504_v13  ;;  %s5615_s30 = sld [smem:[#allocation3 + $0x44]] }
 0x184   :  { %v2494_v7 = vadd.f32 %v2490_v50, %v2479_v33  ;;  %v4897_v63 = vstv %s4863_s3  ;;  %v4900_v57 = vstv %s4866_s4  ;;  %v4903_v55 = vstv %s4871_s5  ;;  %s5621_s1 = sld [smem:[#allocation3 + $0x4b]] }
 0x185   :  { %v1068_v21 = vadd.f32 %v4821_v41, %v1052_v12  ;;  %v1079_v59 = vsel %vm330_vm6, %v1077_v20, %v1078_v11  ;;  %v1093_v60 = vmul.f32 %v4883_v0, %v1087_v26  ;;  %v1098_v23 = vmul.f32 %v4886_v43, %v1087_v26  ;;  %v1091_v20 = vpop.permute.xlu0 %1090  ;;  %s5630_s3 = sld [smem:[#allocation3 + $0x52]] }
 0x186   :  { %v2509_v53 = vadd.f32 %v2505_v61, %v2494_v7  ;;  %v1114_v44 = vmul.f32 %v4890_v52, %v1087_v26  ;;  %v1130_v31 = vmul.f32 %v4893_v14, %v1087_v26  ;;  %v2520_v10 = vsel %vm313_vm5, %v2517_v22, %v2519_v58  ;;  %s5634_s4 = sld [smem:[#allocation3 + $0x59]] }
 0x187   :  { %v1084_v41 = vadd.f32 %v1079_v59, %v1068_v21  ;;  %v4919_v16 = vmul.f32 %v4897_v63, %v1087_v26  ;;  %v4922_v46 = vmul.f32 %v4900_v57, %v1087_v26  ;;  %v4924_v12 = vadd.f32 %v2503_v4, %v2493_v32  ;;  %s5649_s5 = sld [smem:[#allocation3 + $0x60]] }
 0x188   :  { %v4929_v35 = vsel %vm313_vm5, %v2516_v40, %v2517_v22  ;;  %v2524_v30 = vadd.f32 %v2520_v10, %v2509_v53  ;;  %v2535_v47 = vsel %vm330_vm6, %v2532_v38, %v2534_v29  ;;  %v1104_v6 = vrot.slane %v1098_v23, 1 }
 0x189   :  { %v1120_v48 = vrot.slane %v1114_v44, 2  ;;  %v1136_v36 = vrot.slane %v1130_v31, 3  ;;  %v4935_v8 = vmul.f32 %v4903_v55, %v1087_v26  ;;  %v1095_v27 = vadd.f32 %v1093_v60, %v1084_v41  ;;  %v2543_v58 = vpop.permute.xlu0 %2542 }
 0x18a   :  { %v1100_v9 = vmul.f32 %v4886_v43, %v1091_v20  ;;  %v1116_v24 = vmul.f32 %v4890_v52, %v1091_v20  ;;  %v1132_v34 = vmul.f32 %v4893_v14, %v1091_v20  ;;  %v2539_v22 = vadd.f32 %v2535_v47, %v2524_v30 }
 0x18b   :  { %v1152_v40 = vrot.slane %v4919_v16, 4  ;;  %v1168_v39 = vrot.slane %v4922_v46, 5  ;;  %v1069_v25 = vadd.f32 %v4824_v5, %v4857_v45  ;;  %v1148_v37 = vmul.f32 %v4897_v63, %v1091_v20 }
 0x18c   :  { %v1164_v56 = vmul.f32 %v4900_v57, %v1091_v20  ;;  %v4947_v28 = vmul.f32 %v4903_v55, %v1091_v20  ;;  %v1081_v49 = vsel %vm330_vm6, %v1078_v11, %v1080_v3  ;;  %v1107_v13 = vrot.slane %v1100_v9, 1  ;;  %v2541_v20 = vpop.permute.xlu1 %2540 }
 0x18d   :  { %v1123_v51 = vrot.slane %v1116_v24, 2  ;;  %v1139_v4 = vrot.slane %v1132_v34, 3  ;;  %v1085_v2 = vadd.f32 %v1081_v49, %v1069_v25  ;;  %v1094_v5 = vmul.f32 %v4883_v0, %v1089_v54 }
 0x18e   :  { %v1099_v45 = vmul.f32 %v4886_v43, %v1089_v54  ;;  %v1115_v26 = vmul.f32 %v4890_v52, %v1089_v54  ;;  %v1131_v33 = vmul.f32 %v4893_v14, %v1089_v54  ;;  %v1147_v29 = vmul.f32 %v4897_v63, %v1089_v54 }
 0x18f   :  { %v1163_v1 = vmul.f32 %v4900_v57, %v1089_v54  ;;  %v4961_v15 = vmul.f32 %v4903_v55, %v1089_v54  ;;  %v2547_v3 = vmul.f32 %v2543_v58, %v4883_v0  ;;  %v1096_v11 = vadd.f32 %v1094_v5, %v1085_v2 }
 0x190   :  { %v1105_v32 = vrot.slane %v1099_v45, 1  ;;  %v1121_v50 = vrot.slane %v1115_v26, 2  ;;  %v1137_v7 = vrot.slane %v1131_v33, 3  ;;  %v1184_v61 = vrot.slane %v4935_v8, 6  ;;  %v2545_v33 = vpop.permute.xlu1 %2544 }
 0x191   :  { %v1155_v21 = vrot.slane %v1148_v37, 4  ;;  %v1171_v59 = vrot.slane %v1164_v56, 5  ;;  %v1187_v60 = vrot.slane %v4947_v28, 6  ;;  %v1153_v44 = vrot.slane %v1147_v29, 4 }
 0x192   :  { %v1106_v53 = vsel %vm245_vm1, %v1104_v6, %v1105_v32  ;;  %v1108_v23 = vsel %vm245_vm1, %v1105_v32, %v1107_v13  ;;  %v1169_v31 = vrot.slane %v1163_v1, 5  ;;  %v1185_v16 = vrot.slane %v4961_v15, 6 }
 0x193   :  { %v1111_v10 = vadd.f32 %v1106_v53, %v1095_v27  ;;  %v1112_v41 = vadd.f32 %v1108_v23, %v1096_v11  ;;  %v4969_v46 = vadd.f32 %v2547_v3, %v2539_v22  ;;  %v1122_v30 = vsel %vm262_vm2, %v1120_v48, %v1121_v50 }
 0x194   :  { %v1124_v47 = vsel %vm262_vm2, %v1121_v50, %v1123_v51  ;;  %v1138_v9 = vsel %vm279_vm3, %v1136_v36, %v1137_v7  ;;  %v1140_v24 = vsel %vm279_vm3, %v1137_v7, %v1139_v4  ;;  %v2551_v25 = vmul.f32 %v2543_v58, %v4886_v43 }
 0x195   :  { %v1127_v6 = vadd.f32 %v1122_v30, %v1111_v10  ;;  %v1128_v34 = vadd.f32 %v1124_v47, %v1112_v41  ;;  %v4977_v27 = vmul.f32 %v2543_v58, %v4890_v52  ;;  %v1154_v54 = vsel %vm296_vm4, %v1152_v40, %v1153_v44 }
 0x196   :  { %v1156_v22 = vsel %vm296_vm4, %v1153_v44, %v1155_v21  ;;  %v4982_v37 = vmul.f32 %v2543_v58, %v4893_v14  ;;  %v4985_v48 = vmul.f32 %v2543_v58, %v4897_v63  ;;  %v4988_v36 = vsel %vm313_vm5, %v1168_v39, %v1169_v31 }
 0x197   :  { %v4991_v56 = vsel %vm313_vm5, %v1169_v31, %v1171_v59  ;;  %v4994_v49 = vmul.f32 %v2543_v58, %v4900_v57  ;;  %v4997_v13 = vmul.f32 %v2543_v58, %v4903_v55  ;;  %v1143_v40 = vadd.f32 %v1138_v9, %v1127_v6 }
 0x198   :  { %v1144_v51 = vadd.f32 %v1140_v24, %v1128_v34  ;;  %v2557_v4 = vrot.slane %v2551_v25, 1  ;;  %v2572_v2 = vrot.slane %v4977_v27, 2  ;;  %v2587_v5 = vrot.slane %v4982_v37, 3 }
 0x199   :  { %v2602_v39 = vrot.slane %v4985_v48, 4  ;;  %v2533_v45 = vsel %vm330_vm6, %v2531_v19, %v2532_v38  ;;  %v2523_v26 = vadd.f32 %v4929_v35, %v4924_v12  ;;  %v2546_v58 = vmul.f32 %v2541_v20, %v4883_v0 }
 0x19a   :  { %v2550_v29 = vmul.f32 %v2541_v20, %v4886_v43  ;;  %v2565_v1 = vmul.f32 %v2541_v20, %v4890_v52  ;;  %v2580_v3 = vmul.f32 %v2541_v20, %v4893_v14  ;;  %v2617_v62 = vrot.slane %v4994_v49, 5 }
 0x19b   :  { %v2538_v42 = vadd.f32 %v2533_v45, %v2523_v26  ;;  %v2595_v38 = vmul.f32 %v2541_v20, %v4897_v63  ;;  %v5022_v19 = vmul.f32 %v2541_v20, %v4900_v57  ;;  %v2632_v0 = vrot.slane %v4997_v13, 6 }
 0x19c   :  { %v2556_v12 = vrot.slane %v2550_v29, 1  ;;  %v2571_v35 = vrot.slane %v2565_v1, 2  ;;  %v2552_v11 = vmul.f32 %v2545_v33, %v4886_v43  ;;  %v1159_v32 = vadd.f32 %v1154_v54, %v1143_v40 }
 0x19d   :  { %v5030_v50 = vadd.f32 %v1156_v22, %v1144_v51  ;;  %v2548_v7 = vadd.f32 %v2546_v58, %v2538_v42  ;;  %v5033_v21 = vmul.f32 %v2541_v20, %v4903_v55  ;;  %v2586_v53 = vrot.slane %v2580_v3, 3 }
 0x19e   :  { %v2558_v59 = vsel %vm245_vm1, %v2556_v12, %v2557_v4  ;;  %v2601_v23 = vrot.slane %v2595_v38, 4  ;;  %v2559_v44 = vrot.slane %v2552_v11, 1  ;;  %v2573_v43 = vsel %vm262_vm2, %v2571_v35, %v2572_v2 }
 0x19f   :  { %v2563_v31 = vadd.f32 %v2558_v59, %v2548_v7  ;;  %v2616_v10 = vrot.slane %v5022_v19, 5  ;;  %v2567_v41 = vmul.f32 %v2545_v33, %v4890_v52  ;;  %v2582_v20 = vmul.f32 %v2545_v33, %v4893_v14 }
 0x1a0   :  { %v2560_v30 = vsel %vm245_vm1, %v2557_v4, %v2559_v44  ;;  %v2597_v47 = vmul.f32 %v2545_v33, %v4897_v63  ;;  %v2612_v9 = vmul.f32 %v2545_v33, %v4900_v57  ;;  %v2627_v25 = vmul.f32 %v2545_v33, %v4903_v55  ;;  %v1194_v63 = vpop.permute.xlu0 %1193 }
 0x1a1   :  { %v2578_v24 = vadd.f32 %v2573_v43, %v2563_v31  ;;  %v2564_v6 = vadd.f32 %v2560_v30, %v4969_v46  ;;  %v2574_v34 = vrot.slane %v2567_v41, 2  ;;  %v2588_v27 = vsel %vm279_vm3, %v2586_v53, %v2587_v5 }
 0x1a2   :  { %v2631_v52 = vrot.slane %v5033_v21, 6  ;;  %v2589_v54 = vrot.slane %v2582_v20, 3  ;;  %v2604_v14 = vrot.slane %v2597_v47, 4  ;;  %v2603_v57 = vsel %vm296_vm4, %v2601_v23, %v2602_v39 }
 0x1a3   :  { %v2575_v22 = vsel %vm262_vm2, %v2572_v2, %v2574_v34  ;;  %v2619_v46 = vrot.slane %v2612_v9, 5  ;;  %v5054_v37 = vstv %s5000_s19  ;;  %v2593_v55 = vadd.f32 %v2588_v27, %v2578_v24  ;;  %s5777_s19 = sld [smem:[#allocation3 + $0x37]] }
 0x1a4   :  { %v2579_v48 = vadd.f32 %v2575_v22, %v2564_v6  ;;  %v2634_v40 = vrot.slane %v2627_v25, 6  ;;  %v5057_v51 = vstv %s5011_s20  ;;  %v2590_v4 = vsel %vm279_vm3, %v2587_v5, %v2589_v54  ;;  %v1196_v6 = vpop.permute.xlu1 %1195  ;;  %s5788_s20 = sld [smem:[#allocation3 + $0x3e]] }
 0x1a5   :  { %v2605_v45 = vsel %vm296_vm4, %v2602_v39, %v2604_v14  ;;  %v5062_v26 = vstv %s5017_s21  ;;  %v5065_v33 = vstv %s5024_s22  ;;  %v5068_v29 = vstv %s5028_s6  ;;  %s5794_s21 = sld [smem:[#allocation3 + $0x45]] }
 0x1a6   :  { %v2594_v58 = vadd.f32 %v2590_v4, %v2579_v48  ;;  %v5071_v2 = vstv %s5035_s7  ;;  %v5074_v1 = vstv %s5038_s8  ;;  %v2620_v3 = vsel %vm313_vm5, %v2617_v62, %v2619_v46  ;;  %v6109_v48 = vld [vmem:[#allocation12_spill] sm:$0xff]  ;;  %s5799_s22 = sld [smem:[#allocation3 + $0x4c]] }
 0x1a7   :  { %v1175_v42 = vadd.f32 %v4988_v36, %v1159_v32  ;;  %v1186_v5 = vsel %vm330_vm6, %v1184_v61, %v1185_v16  ;;  %v1205_v39 = vmul.f32 %v5057_v51, %v1194_v63  ;;  %v5089_v19 = vmul.f32 %v5062_v26, %v1194_v63  ;;  %v1198_v36 = vpop.permute.xlu0 %1197  ;;  %s5803_s6 = sld [smem:[#allocation3 + $0x53]] }
 0x1a8   :  { %v2609_v38 = vadd.f32 %v2605_v45, %v2594_v58  ;;  %v5092_v12 = vmul.f32 %v5065_v33, %v1194_v63  ;;  %v5095_v35 = vmul.f32 %v5068_v29, %v1194_v63  ;;  %v1200_v61 = vmul.f32 %v5054_v37, %v1194_v63  ;;  %s5808_s7 = sld [smem:[#allocation3 + $0x5a]] }
 0x1a9   :  { %v1191_v8 = vadd.f32 %v1186_v5, %v1175_v42  ;;  %v5101_v11 = vmul.f32 %v5071_v2, %v1194_v63  ;;  %v5104_v32 = vmul.f32 %v5074_v1, %v1194_v63  ;;  %v5106_v7 = vadd.f32 %v2603_v57, %v2593_v55  ;;  %s5811_s8 = sld [smem:[#allocation3 + $0x61]] }
 0x1aa   :  { %v5111_v59 = vsel %vm313_vm5, %v2616_v10, %v2617_v62  ;;  %v2624_v53 = vadd.f32 %v2620_v3, %v2609_v38  ;;  %v2635_v23 = vsel %vm330_vm6, %v2632_v0, %v2634_v40  ;;  %v1211_v44 = vrot.slane %v1205_v39, 1 }
 0x1ab   :  { %v1227_v31 = vrot.slane %v5089_v19, 2  ;;  %v1243_v43 = vrot.slane %v5092_v12, 3  ;;  %v1207_v41 = vmul.f32 %v5057_v51, %v1198_v36  ;;  %v1259_v30 = vrot.slane %v5095_v35, 4 }
 0x1ac   :  { %v1223_v20 = vmul.f32 %v5062_v26, %v1198_v36  ;;  %v1239_v49 = vmul.f32 %v5065_v33, %v1198_v36  ;;  %v1255_v62 = vmul.f32 %v5068_v29, %v1198_v36  ;;  %v1202_v10 = vadd.f32 %v1200_v61, %v1191_v8 }
 0x1ad   :  { %v1275_v47 = vrot.slane %v5101_v11, 5  ;;  %v1291_v9 = vrot.slane %v5104_v32, 6  ;;  %v1176_v24 = vadd.f32 %v4991_v56, %v5030_v50  ;;  %v2639_v34 = vadd.f32 %v2635_v23, %v2624_v53 }
 0x1ae   :  { %v1214_v25 = vrot.slane %v1207_v41, 1  ;;  %v1271_v27 = vmul.f32 %v5071_v2, %v1198_v36  ;;  %v1188_v54 = vsel %vm330_vm6, %v1185_v16, %v1187_v60  ;;  %v1230_v14 = vrot.slane %v1223_v20, 2 }
 0x1af   :  { %v1246_v63 = vrot.slane %v1239_v49, 3  ;;  %v5134_v57 = vmul.f32 %v5074_v1, %v1198_v36  ;;  %v1192_v22 = vadd.f32 %v1188_v54, %v1176_v24  ;;  %v1262_v46 = vrot.slane %v1255_v62, 4  ;;  %v2643_v62 = vpop.permute.xlu0 %2642 }
 0x1b0   :  { %v5137_v55 = vstv %s5086_s9  ;;  %v5140_v56 = vstv %s5097_s10  ;;  %v1201_v50 = vmul.f32 %v5054_v37, %v1196_v6  ;;  %v1206_v16 = vmul.f32 %v5057_v51, %v1196_v6  ;;  %s3360_s9 = smov [#allocation8]  }
 0x1b1   :  { %v1306_v28 = vmul.f32 %v5140_v56, %v6109_v48  ;;  %v1307_v15 = vmul.f32 %v5140_v56, %v3439_v18  ;;  %v1308_v60 = vmul.f32 %v5140_v56, %v3437_v17  ;;  %v1222_v4 = vmul.f32 %v5062_v26, %v1196_v6  ;;  %s3154_s10 = sshll.u32 %s3360_s9, 4  ;;  %s3155_s10 = int_to_ptr.vmem [resolvable:$true] %s3154_s10 }
 0x1b2   :  { %v1203_v40 = vadd.f32 %v1201_v50, %v1192_v22  ;;  %v1238_v45 = vmul.f32 %v5065_v33, %v1196_v6  ;;  %v1254_v58 = vmul.f32 %v5068_v29, %v1196_v6  ;;  %v1278_v3 = vrot.slane %v1271_v27, 5  ;;  %p3328_p6 = scmp.lt.s32.totalorder %s3155_s10, %s3155_s10 }
 0x1b3   :  { %v1294_v42 = vrot.slane %v5134_v57, 6  ;;  %v5156_v5 = vmul.f32 %v5137_v55, %v6109_v48  ;;  %v1212_v39 = vrot.slane %v1206_v16, 1  ;;  %v1302_v38 = vmul.f32 %v5137_v55, %v3439_v18 }
 0x1b4   :  { %v1228_v19 = vrot.slane %v1222_v4, 2  ;;  %v1244_v12 = vrot.slane %v1238_v45, 3  ;;  %v1270_v36 = vmul.f32 %v5071_v2, %v1196_v6  ;;  %v1312_v8 = vrot.slane %v1306_v28, 1 }
 0x1b5   :  { %v1313_v61 = vrot.slane %v1307_v15, 1  ;;  %v1213_v11 = vsel %vm245_vm1, %v1211_v44, %v1212_v39  ;;  %v1215_v53 = vsel %vm245_vm1, %v1212_v39, %v1214_v25  ;;  %v1315_v23 = vrot.slane %v1308_v60, 1 }
 0x1b6   :  { %v1218_v41 = vadd.f32 %v1213_v11, %v1202_v10  ;;  %v1219_v20 = vadd.f32 %v1215_v53, %v1203_v40  ;;  %v1260_v49 = vrot.slane %v1254_v58, 4  ;;  %v1229_v24 = vsel %vm262_vm2, %v1227_v31, %v1228_v19 }
 0x1b7   :  { %v1231_v27 = vsel %vm262_vm2, %v1228_v19, %v1230_v14  ;;  %v1245_v54 = vsel %vm279_vm3, %v1243_v43, %v1244_v12  ;;  %v1247_v57 = vsel %vm279_vm3, %v1244_v12, %v1246_v63  ;;  %v1276_v28 = vrot.slane %v1270_v36, 5 }
 0x1b8   :  { %v1234_v22 = vadd.f32 %v1229_v24, %v1218_v41  ;;  %v1235_v50 = vadd.f32 %v1231_v27, %v1219_v20  ;;  %v1286_v44 = vmul.f32 %v5074_v1, %v1196_v6  ;;  %v2647_v25 = vmul.f32 %v2643_v62, %v5054_v37  ;;  %v5213_v41 = vld [vmem:[#allocation2 + $0x20] sm:$0xff] }
 0x1b9   :  { %v5170_v10 = vmul.f32 %v2643_v62, %v5057_v51  ;;  %v5173_v15 = vmul.f32 %v2643_v62, %v5062_v26  ;;  %v5176_v31 = vmul.f32 %v2643_v62, %v5065_v33  ;;  %v1314_v43 = vsel %vm245_vm1, %v1312_v8, %v1313_v61 }
 0x1ba   :  { %v1316_v14 = vsel %vm245_vm1, %v1313_v61, %v1315_v23  ;;  %v1250_v63 = vadd.f32 %v1245_v54, %v1234_v22  ;;  %v1251_v60 = vadd.f32 %v1247_v57, %v1235_v50  ;;  %v1261_v6 = vsel %vm296_vm4, %v1259_v30, %v1260_v49  ;;  %v5209_v23 = vld [vmem:[#allocation2 + $0x18] sm:$0xff] }
 0x1bb   :  { %v1263_v16 = vsel %vm296_vm4, %v1260_v49, %v1262_v46  ;;  %v1277_v40 = vsel %vm313_vm5, %v1275_v47, %v1276_v28  ;;  %v1292_v4 = vrot.slane %v1286_v44, 6  ;;  %v1279_v39 = vsel %vm313_vm5, %v1276_v28, %v1278_v3  ;;  %v2641_v3 = vpop.permute.xlu1 %2640 }
 0x1bc   :  { %v1266_v45 = vadd.f32 %v1261_v6, %v1250_v63  ;;  %v1267_v58 = vadd.f32 %v1263_v16, %v1251_v60  ;;  %v5186_v19 = vadd.f32 %v2647_v25, %v2639_v34  ;;  %v2657_v12 = vrot.slane %v5170_v10, 1 }
 0x1bd   :  { %v2672_v36 = vrot.slane %v5173_v15, 2  ;;  %v2687_v8 = vrot.slane %v5176_v31, 3  ;;  %v5192_v35 = vmul.f32 %v2643_v62, %v5068_v29  ;;  %v1293_v47 = vsel %vm330_vm6, %v1291_v9, %v1292_v4 }
 0x1be   :  { %v1282_v30 = vadd.f32 %v1277_v40, %v1266_v45  ;;  %v1283_v46 = vadd.f32 %v1279_v39, %v1267_v58  ;;  %v1295_v61 = vsel %vm330_vm6, %v1292_v4, %v1294_v42  ;;  %v5199_v34 = vmul.f32 %v2643_v62, %v5071_v2  ;;  %v5254_v39 = vld [vmem:[#allocation2 + $0x28] sm:$0x3f] }
 0x1bf   :  { %v5202_v11 = vmul.f32 %v2643_v62, %v5074_v1  ;;  %v2633_v53 = vsel %vm330_vm6, %v2631_v52, %v2632_v0  ;;  %v2744_v32 = vmul.f32 %v5209_v23, %v5140_v56  ;;  %v5217_v20 = vmul.f32 %v5213_v41, %v5140_v56  ;;  %v2645_v4 = vpop.permute.xlu1 %2644 }
 0x1c0   :  { %v1298_v9 = vadd.f32 %v1293_v47, %v1282_v30  ;;  %v1299_v42 = vadd.f32 %v1295_v61, %v1283_v46  ;;  %v2623_v13 = vadd.f32 %v5111_v59, %v5106_v7  ;;  %v2646_v0 = vmul.f32 %v2641_v3, %v5054_v37 }
 0x1c1   :  { %v2750_v21 = vrot.slane %v2744_v32, 1  ;;  %v2650_v52 = vmul.f32 %v2641_v3, %v5057_v51  ;;  %v2665_v49 = vmul.f32 %v2641_v3, %v5062_v26  ;;  %v2751_v27 = vrot.slane %v5217_v20, 1 }
 0x1c2   :  { %v1303_v62 = vadd.f32 %v5156_v5, %v1298_v9  ;;  %v1304_v24 = vadd.f32 %v1302_v38, %v1299_v42  ;;  %v2638_v54 = vadd.f32 %v2633_v53, %v2623_v13  ;;  %v2680_v50 = vmul.f32 %v2641_v3, %v5065_v33 }
 0x1c3   :  { %v2656_v57 = vrot.slane %v2650_v52, 1  ;;  %v2671_v22 = vrot.slane %v2665_v49, 2  ;;  %v2695_v7 = vmul.f32 %v2641_v3, %v5068_v29  ;;  %v2702_v59 = vrot.slane %v5192_v35, 4 }
 0x1c4   :  { %v2717_v37 = vrot.slane %v5199_v34, 5  ;;  %v2732_v28 = vrot.slane %v5202_v11, 6  ;;  %v2648_v44 = vadd.f32 %v2646_v0, %v2638_v54  ;;  %v5233_v25 = vadd.f32 %v1314_v43, %v1303_v62 }
 0x1c5   :  { %v5237_v5 = vmul.f32 %v5209_v23, %v5137_v55  ;;  %v2658_v38 = vsel %vm245_vm1, %v2656_v57, %v2657_v12  ;;  %v2686_v63 = vrot.slane %v2680_v50, 3  ;;  %v2701_v6 = vrot.slane %v2695_v7, 4 }
 0x1c6   :  { %v2663_v60 = vadd.f32 %v2658_v38, %v2648_v44  ;;  %v2710_v16 = vmul.f32 %v2641_v3, %v5071_v2  ;;  %v2725_v40 = vmul.f32 %v2641_v3, %v5074_v1  ;;  %v5244_v45 = vadd.f32 %v1316_v14, %v1304_v24 }
 0x1c7   :  { %v5249_v43 = vsel %vm245_vm1, %v2750_v21, %v2751_v27  ;;  %v2673_v58 = vsel %vm262_vm2, %v2671_v22, %v2672_v36  ;;  %v2746_v30 = vmul.f32 %v5254_v39, %v5140_v56  ;;  %v2688_v14 = vsel %vm279_vm3, %v2686_v63, %v2687_v8 }
 0x1c8   :  { %v2678_v46 = vadd.f32 %v2673_v58, %v2663_v60  ;;  %v2716_v47 = vrot.slane %v2710_v16, 5  ;;  %v5262_v61 = vstv %s5221_s11  ;;  %v2652_v32 = vmul.f32 %v2645_v4, %v5057_v51  ;;  %s3323_s11 = scalar_lea.vmem %s3155_s10, 512 }
 0x1c9   :  { %v5266_v3 = vmul.f32 %v5213_v41, %v5262_v61  ;;  %v2761_v53 = vmul.f32 %v5254_v39, %v5262_v61  ;;  %v2667_v9 = vmul.f32 %v2645_v4, %v5062_v26  ;;  %v2703_v42 = vsel %vm296_vm4, %v2701_v6, %v2702_v59  ;;  %p3324_p5 = scmp.ne.s32.totalorder %s3155_s10, %s3323_s11  ;;  %p3329_p7 = scmp.lt.s32.totalorder %s3323_s11, %s3323_s11 }
 0x1ca   :  { %v2693_v56 = vadd.f32 %v2688_v14, %v2678_v46  ;;  %v2731_v13 = vrot.slane %v2725_v40, 6  ;;  %v5279_v21 = vmul.f32 %v5213_v41, %v5137_v55  ;;  %v2753_v0 = vrot.slane %v2746_v30, 1 }
 0x1cb   :  { %v2768_v52 = vrot.slane %v2761_v53, 2  ;;  %v2659_v49 = vrot.slane %v2652_v32, 1  ;;  %v2674_v51 = vrot.slane %v2667_v9, 2  ;;  %v2682_v26 = vmul.f32 %v2645_v4, %v5065_v33  ;;  %p3330_p8 = por %p3329_p7, %p3328_p6 }
 0x1cc   :  { %v2708_v62 = vadd.f32 %v2703_v42, %v2693_v56  ;;  %v2697_v24 = vmul.f32 %v2645_v4, %v5068_v29  ;;  %v2712_v54 = vmul.f32 %v2645_v4, %v5071_v2  ;;  %v2718_v55 = vsel %vm313_vm5, %v2716_v47, %v2717_v37 }
 0x1cd   :  { %v2766_v57 = vrot.slane %v5266_v3, 2  ;;  %v2660_v22 = vsel %vm245_vm1, %v2657_v12, %v2659_v49  ;;  %v2727_v50 = vmul.f32 %v2645_v4, %v5074_v1  ;;  %v2689_v2 = vrot.slane %v2682_v26, 3  ;;  %p3331_p9 = pnand %p3330_p8, %p3324_p5 }
 0x1ce   :  { %v2723_v33 = vadd.f32 %v2718_v55, %v2708_v62  ;;  %v2664_v29 = vadd.f32 %v2660_v22, %v5186_v19  ;;  %v2704_v7 = vrot.slane %v2697_v24, 4  ;;  %v2733_v44 = vsel %vm330_vm6, %v2731_v13, %v2732_v28 }
 0x1cf   :  { %v2675_v10 = vsel %vm262_vm2, %v2672_v36, %v2674_v51  ;;  %v2719_v12 = vrot.slane %v2712_v54, 5  ;;  %v1322_v1 = vmul.f32 %v5262_v61, %v6109_v48  ;;  %v2754_v19 = vsel %vm245_vm1, %v2751_v27, %v2753_v0  ;;  %v1402_v0 = vpop.permute.xlu0 %1401 }
 0x1d0   :  { %v5317_v38 = vsel %vm262_vm2, %v2766_v57, %v2768_v52  ;;  %v2679_v15 = vadd.f32 %v2675_v10, %v2664_v29  ;;  %v5323_v36 = vmul.f32 %v5262_v61, %v3439_v18  ;;  %v2738_v63 = vadd.f32 %v2733_v44, %v2723_v33 }
 0x1d1   :  { %v2690_v60 = vsel %vm279_vm3, %v2687_v8, %v2689_v2  ;;  %v2705_v20 = vsel %vm296_vm4, %v2702_v59, %v2704_v7  ;;  %v2734_v27 = vrot.slane %v2727_v50, 6  ;;  %v2720_v16 = vsel %vm313_vm5, %v2717_v37, %v2719_v12 }
 0x1d2   :  { %v2694_v6 = vadd.f32 %v2690_v60, %v2679_v15  ;;  %v5339_v40 = vstv %s5272_s12  ;;  %v5342_v31 = vstv %s5281_s13  ;;  %v1328_v8 = vrot.slane %v1322_v1, 2 }
 0x1d3   :  { %v1338_v35 = vmul.f32 %v5339_v40, %v6109_v48  ;;  %v5350_v59 = vmul.f32 %v5339_v40, %v3439_v18  ;;  %v1354_v34 = vmul.f32 %v5342_v31, %v6109_v48  ;;  %v1329_v4 = vrot.slane %v5323_v36, 2 }
 0x1d4   :  { %v2709_v37 = vadd.f32 %v2705_v20, %v2694_v6  ;;  %v5359_v58 = vmul.f32 %v5342_v31, %v3439_v18  ;;  %v5362_v30 = vstv %s5286_s14  ;;  %v2735_v46 = vsel %vm330_vm6, %v2732_v28, %v2734_v27  ;;  %v1406_v20 = vpop.permute.xlu0 %1405 }
 0x1d5   :  { %v1344_v14 = vrot.slane %v1338_v35, 3  ;;  %v1345_v47 = vrot.slane %v5350_v59, 3  ;;  %v1370_v53 = vmul.f32 %v5362_v30, %v6109_v48  ;;  %v2742_v32 = vadd.f32 %v5237_v5, %v2738_v63 }
 0x1d6   :  { %v2724_v9 = vadd.f32 %v2720_v16, %v2709_v37  ;;  %v5373_v56 = vmul.f32 %v5362_v30, %v3439_v18  ;;  %v5376_v42 = vstv %s5296_s17  ;;  %v1360_v11 = vrot.slane %v1354_v34, 4 }
 0x1d7   :  { %v1361_v28 = vrot.slane %v5359_v58, 4  ;;  %v1386_v13 = vmul.f32 %v5376_v42, %v6109_v48  ;;  %v5383_v5 = vmul.f32 %v5376_v42, %v3439_v18  ;;  %v1330_v49 = vsel %vm262_vm2, %v1328_v8, %v1329_v4 }
 0x1d8   :  { %v2739_v52 = vadd.f32 %v2735_v46, %v2724_v9  ;;  %v1346_v51 = vsel %vm279_vm3, %v1344_v14, %v1345_v47  ;;  %v1376_v62 = vrot.slane %v1370_v53, 5  ;;  %v1377_v48 = vrot.slane %v5373_v56, 5 }
 0x1d9   :  { %v1392_v26 = vrot.slane %v1386_v13, 6  ;;  %v5393_v24 = vstv %s5299_s18  ;;  %v5396_v18 = vstv %s5307_s23  ;;  %v1393_v55 = vrot.slane %v5383_v5, 6 }
 0x1da   :  { %v2743_v54 = vadd.f32 %v5279_v21, %v2739_v52  ;;  %v5401_v22 = vstv %s5319_s24  ;;  %v5404_v50 = vstv %s5331_s0  ;;  %v1362_v33 = vsel %vm296_vm4, %v1360_v11, %v1361_v28 }
 0x1db   :  { %v5410_v29 = vstv %s5336_s25  ;;  %v5413_v2 = vstv %s5344_s26  ;;  %v1335_v7 = vadd.f32 %v1330_v49, %v5233_v25  ;;  %v5417_v10 = vstv %s5354_s27  ;;  %v1404_v49 = vpop.permute.xlu1 %1403 }
 0x1dc   :  { %v2758_v44 = vadd.f32 %v2754_v19, %v2743_v54  ;;  %v1413_v21 = vmul.f32 %v5393_v24, %v1402_v0  ;;  %v5421_v12 = vmul.f32 %v5396_v18, %v1402_v0  ;;  %v5424_v15 = vmul.f32 %v5401_v22, %v1402_v0 }
 0x1dd   :  { %v1351_v1 = vadd.f32 %v1346_v51, %v1335_v7  ;;  %v5427_v63 = vmul.f32 %v5404_v50, %v1402_v0  ;;  %v5430_v60 = vmul.f32 %v5410_v29, %v1402_v0  ;;  %v5433_v25 = vadd.f32 %v5249_v43, %v2742_v32 }
 0x1de   :  { %v1378_v19 = vsel %vm313_vm5, %v1376_v62, %v1377_v48  ;;  %v1394_v27 = vsel %vm330_vm6, %v1392_v26, %v1393_v55  ;;  %v5442_v6 = vmul.f32 %v5413_v2, %v1402_v0  ;;  %v5445_v16 = vadd.f32 %v5317_v38, %v2758_v44 }
 0x1df   :  { %v1367_v8 = vadd.f32 %v1362_v33, %v1351_v1  ;;  %v1408_v35 = vmul.f32 %v5417_v10, %v1402_v0  ;;  %v1419_v34 = vrot.slane %v1413_v21, 1  ;;  %v1435_v43 = vrot.slane %v5421_v12, 2 }
 0x1e0   :  { %v1451_v37 = vrot.slane %v5424_v15, 3  ;;  %v1415_v46 = vmul.f32 %v5393_v24, %v1406_v20  ;;  %v1431_v14 = vmul.f32 %v5396_v18, %v1406_v20  ;;  %v1467_v32 = vrot.slane %v5427_v63, 4 }
 0x1e1   :  { %v1383_v53 = vadd.f32 %v1378_v19, %v1367_v8  ;;  %v1483_v9 = vrot.slane %v5430_v60, 5  ;;  %v1447_v38 = vmul.f32 %v5401_v22, %v1406_v20  ;;  %v1499_v11 = vrot.slane %v5442_v6, 6 }
 0x1e2   :  { %v5457_v13 = vmul.f32 %v5404_v50, %v1406_v20  ;;  %v5460_v0 = vmul.f32 %v5410_v29, %v1406_v20  ;;  %v1324_v52 = vmul.f32 %v5262_v61, %v3437_v17  ;;  %v1422_v62 = vrot.slane %v1415_v46, 1 }
 0x1e3   :  { %v1399_v51 = vadd.f32 %v1394_v27, %v1383_v53  ;;  %v1438_v26 = vrot.slane %v1431_v14, 2  ;;  %v5465_v54 = vmul.f32 %v5413_v2, %v1406_v20  ;;  %v1340_v7 = vmul.f32 %v5339_v40, %v3437_v17 }
 0x1e4   :  { %v1331_v33 = vrot.slane %v1324_v52, 2  ;;  %v1356_v44 = vmul.f32 %v5342_v31, %v3437_v17  ;;  %v1372_v21 = vmul.f32 %v5362_v30, %v3437_v17  ;;  %v1454_v1 = vrot.slane %v1447_v38, 3 }
 0x1e5   :  { %v1410_v12 = vadd.f32 %v1408_v35, %v1399_v51  ;;  %v1388_v15 = vmul.f32 %v5376_v42, %v3437_v17  ;;  %v1414_v19 = vmul.f32 %v5393_v24, %v1404_v49  ;;  %v1347_v27 = vrot.slane %v1340_v7, 3 }
 0x1e6   :  { %v1332_v20 = vsel %vm262_vm2, %v1329_v4, %v1331_v33  ;;  %v1363_v8 = vrot.slane %v1356_v44, 4  ;;  %v1379_v46 = vrot.slane %v1372_v21, 5  ;;  %v1470_v14 = vrot.slane %v5457_v13, 4 }
 0x1e7   :  { %v1336_v53 = vadd.f32 %v1332_v20, %v5244_v45  ;;  %v1420_v52 = vrot.slane %v1414_v19, 1  ;;  %v1430_v35 = vmul.f32 %v5396_v18, %v1404_v49  ;;  %v1348_v17 = vsel %vm279_vm3, %v1345_v47, %v1347_v27 }
 0x1e8   :  { %v1364_v36 = vsel %vm296_vm4, %v1361_v28, %v1363_v8  ;;  %v1395_v38 = vrot.slane %v1388_v15, 6  ;;  %v1446_v4 = vmul.f32 %v5401_v22, %v1404_v49  ;;  %v1486_v51 = vrot.slane %v5460_v0, 5 }
 0x1e9   :  { %v1352_v33 = vadd.f32 %v1348_v17, %v1336_v53  ;;  %v1380_v45 = vsel %vm313_vm5, %v1377_v48, %v1379_v46  ;;  %v1421_v13 = vsel %vm245_vm1, %v1419_v34, %v1420_v52  ;;  %v1436_v59 = vrot.slane %v1430_v35, 2 }
 0x1ea   :  { %v1426_v7 = vadd.f32 %v1421_v13, %v1410_v12  ;;  %v1452_v44 = vrot.slane %v1446_v4, 3  ;;  %v1462_v47 = vmul.f32 %v5404_v50, %v1404_v49  ;;  %v1502_v58 = vrot.slane %v5465_v54, 6 }
 0x1eb   :  { %v1368_v28 = vadd.f32 %v1364_v36, %v1352_v33  ;;  %v1478_v21 = vmul.f32 %v5410_v29, %v1404_v49  ;;  %v5498_v15 = vmul.f32 %v5413_v2, %v1404_v49  ;;  %v1396_v56 = vsel %vm330_vm6, %v1393_v55, %v1395_v38 }
 0x1ec   :  { %v1409_v48 = vmul.f32 %v5417_v10, %v1404_v49  ;;  %v1437_v34 = vsel %vm262_vm2, %v1435_v43, %v1436_v59  ;;  %v5507_v12 = vmul.f32 %v5213_v41, %v5339_v40  ;;  %v1423_v20 = vsel %vm245_vm1, %v1420_v52, %v1422_v62 }
 0x1ed   :  { %v1384_v19 = vadd.f32 %v1380_v45, %v1368_v28  ;;  %v1442_v27 = vadd.f32 %v1437_v34, %v1426_v7  ;;  %v1468_v8 = vrot.slane %v1462_v47, 4  ;;  %v1439_v46 = vsel %vm262_vm2, %v1436_v59, %v1438_v26  ;;  %v2837_v59 = vpop.permute.xlu0 %2836 }
 0x1ee   :  { %v1453_v53 = vsel %vm279_vm3, %v1451_v37, %v1452_v44  ;;  %v2776_v5 = vmul.f32 %v5254_v39, %v5339_v40  ;;  %v5516_v55 = vmul.f32 %v5213_v41, %v5342_v31  ;;  %v1455_v49 = vsel %vm279_vm3, %v1452_v44, %v1454_v1 }
 0x1ef   :  { %v1400_v43 = vadd.f32 %v1396_v56, %v1384_v19  ;;  %v1484_v35 = vrot.slane %v1478_v21, 5  ;;  %v1500_v17 = vrot.slane %v5498_v15, 6  ;;  %v1458_v62 = vadd.f32 %v1453_v53, %v1442_v27 }
 0x1f0   :  { %v2781_v52 = vrot.slane %v5507_v12, 3  ;;  %v2783_v36 = vrot.slane %v2776_v5, 3  ;;  %v2791_v37 = vmul.f32 %v5254_v39, %v5342_v31  ;;  %v1469_v38 = vsel %vm296_vm4, %v1467_v32, %v1468_v8 }
 0x1f1   :  { %v1411_v26 = vadd.f32 %v1409_v48, %v1400_v43  ;;  %v2796_v4 = vrot.slane %v5516_v55, 4  ;;  %v5529_v1 = vmul.f32 %v5213_v41, %v5362_v30  ;;  %v2806_v13 = vmul.f32 %v5254_v39, %v5362_v30  ;;  %v2835_v43 = vpop.permute.xlu1 %2834 }
 0x1f2   :  { %v2784_v33 = vsel %vm279_vm3, %v2781_v52, %v2783_v36  ;;  %v2798_v45 = vrot.slane %v2791_v37, 4  ;;  %v5536_v7 = vmul.f32 %v5213_v41, %v5376_v42  ;;  %v1471_v32 = vsel %vm296_vm4, %v1468_v8, %v1470_v14 }
 0x1f3   :  { %v1427_v63 = vadd.f32 %v1423_v20, %v1411_v26  ;;  %v2821_v44 = vmul.f32 %v5254_v39, %v5376_v42  ;;  %v2788_v47 = vadd.f32 %v2784_v33, %v5445_v16  ;;  %v2811_v21 = vrot.slane %v5529_v1, 5 }
 0x1f4   :  { %v2799_v28 = vsel %vm296_vm4, %v2796_v4, %v2798_v45  ;;  %v2813_v56 = vrot.slane %v2806_v13, 5  ;;  %v2826_v48 = vrot.slane %v5536_v7, 6  ;;  %v5546_v19 = vmul.f32 %v2837_v59, %v5393_v24 }
 0x1f5   :  { %v1443_v34 = vadd.f32 %v1439_v46, %v1427_v63  ;;  %v2828_v12 = vrot.slane %v2821_v44, 6  ;;  %v2803_v41 = vadd.f32 %v2799_v28, %v2788_v47  ;;  %v5551_v14 = vsel %vm313_vm5, %v1483_v9, %v1484_v35 }
 0x1f6   :  { %v2814_v39 = vsel %vm313_vm5, %v2811_v21, %v2813_v56  ;;  %v5555_v16 = vmul.f32 %v2837_v59, %v5396_v18  ;;  %v5558_v20 = vmul.f32 %v2837_v59, %v5401_v22  ;;  %v5562_v53 = vmul.f32 %v2837_v59, %v5404_v50 }
 0x1f7   :  { %v1459_v27 = vadd.f32 %v1455_v49, %v1443_v34  ;;  %v2829_v8 = vsel %vm330_vm6, %v2826_v48, %v2828_v12  ;;  %v2818_v46 = vadd.f32 %v2814_v39, %v2803_v41  ;;  %v5564_v5 = vadd.f32 %v1469_v38, %v1458_v62 }
 0x1f8   :  { %v5569_v60 = vsel %vm313_vm5, %v1484_v35, %v1486_v51  ;;  %v2841_v9 = vmul.f32 %v2837_v59, %v5417_v10  ;;  %v2851_v55 = vrot.slane %v5546_v19, 1  ;;  %v2866_v49 = vrot.slane %v5555_v16, 2 }
 0x1f9   :  { %v2881_v36 = vrot.slane %v5558_v20, 3  ;;  %v5576_v37 = vmul.f32 %v2837_v59, %v5410_v29  ;;  %v2759_v62 = vmul.f32 %v5209_v23, %v5262_v61  ;;  %v2833_v26 = vadd.f32 %v2829_v8, %v2818_v46 }
 0x1fa   :  { %v2774_v0 = vmul.f32 %v5209_v23, %v5339_v40  ;;  %v2789_v51 = vmul.f32 %v5209_v23, %v5342_v31  ;;  %v2804_v35 = vmul.f32 %v5209_v23, %v5362_v30  ;;  %v5586_v38 = vadd.f32 %v1471_v32, %v1459_v27 }
 0x1fb   :  { %v2896_v1 = vrot.slane %v5562_v53, 4  ;;  %v2765_v33 = vrot.slane %v2759_v62, 2  ;;  %v2819_v45 = vmul.f32 %v5209_v23, %v5376_v42  ;;  %v5592_v61 = vmul.f32 %v2837_v59, %v5413_v2  ;;  %v2839_v59 = vpop.permute.xlu1 %2838 }
 0x1fc   :  { %v2780_v13 = vrot.slane %v2774_v0, 3  ;;  %v2795_v7 = vrot.slane %v2789_v51, 4  ;;  %v2810_v40 = vrot.slane %v2804_v35, 5  ;;  %v2844_v30 = vmul.f32 %v2835_v43, %v5393_v24 }
 0x1fd   :  { %v2767_v31 = vsel %vm262_vm2, %v2765_v33, %v2766_v57  ;;  %v2825_v63 = vrot.slane %v2819_v45, 6  ;;  %v2859_v32 = vmul.f32 %v2835_v43, %v5396_v18  ;;  %v2843_v44 = vadd.f32 %v2841_v9, %v2833_v26 }
 0x1fe   :  { %v2911_v47 = vrot.slane %v5576_v37, 5  ;;  %v2782_v23 = vsel %vm279_vm3, %v2780_v13, %v2781_v52  ;;  %v2772_v42 = vadd.f32 %v2767_v31, %v5433_v25  ;;  %v2797_v28 = vsel %vm296_vm4, %v2795_v7, %v2796_v4 }
 0x1ff   :  { %v2850_v3 = vrot.slane %v2844_v30, 1  ;;  %v2865_v56 = vrot.slane %v2859_v32, 2  ;;  %v2874_v57 = vmul.f32 %v2835_v43, %v5401_v22  ;;  %v2926_v34 = vrot.slane %v5592_v61, 6  ;;  %v1509_v32 = vpop.permute.xlu0 %1508 }
 0x200   :  { %v2787_v12 = vadd.f32 %v2782_v23, %v2772_v42  ;;  %v5610_v41 = vmul.f32 %v2835_v43, %v5404_v50  ;;  %v5613_v52 = vmul.f32 %v2835_v43, %v5410_v29  ;;  %v2812_v25 = vsel %vm313_vm5, %v2810_v40, %v2811_v21 }
 0x201   :  { %v2827_v4 = vsel %vm330_vm6, %v2825_v63, %v2826_v48  ;;  %v2840_v19 = vmul.f32 %v2835_v43, %v5417_v10  ;;  %v2846_v39 = vmul.f32 %v2839_v59, %v5393_v24  ;;  %v2852_v8 = vsel %vm245_vm1, %v2850_v3, %v2851_v55 }
 0x202   :  { %v2802_v27 = vadd.f32 %v2797_v28, %v2787_v12  ;;  %v2867_v46 = vsel %vm262_vm2, %v2865_v56, %v2866_v49  ;;  %v5628_v9 = vmul.f32 %v2835_v43, %v5413_v2  ;;  %v2880_v21 = vrot.slane %v2874_v57, 3 }
 0x203   :  { %v2853_v48 = vrot.slane %v2846_v39, 1  ;;  %v2861_v10 = vmul.f32 %v2839_v59, %v5396_v18  ;;  %v2876_v24 = vmul.f32 %v2839_v59, %v5401_v22  ;;  %v2895_v26 = vrot.slane %v5610_v41, 4 }
 0x204   :  { %v2817_v62 = vadd.f32 %v2812_v25, %v2802_v27  ;;  %v2910_v0 = vrot.slane %v5613_v52, 5  ;;  %v2891_v51 = vmul.f32 %v2839_v59, %v5404_v50  ;;  %v2906_v45 = vmul.f32 %v2839_v59, %v5410_v29 }
 0x205   :  { %v2854_v43 = vsel %vm245_vm1, %v2851_v55, %v2853_v48  ;;  %v2868_v35 = vrot.slane %v2861_v10, 2  ;;  %v2883_v33 = vrot.slane %v2876_v24, 3  ;;  %v2921_v7 = vmul.f32 %v2839_v59, %v5413_v2 }
 0x206   :  { %v2832_v13 = vadd.f32 %v2827_v4, %v2817_v62  ;;  %v2858_v18 = vadd.f32 %v2854_v43, %v2843_v44  ;;  %v2898_v22 = vrot.slane %v2891_v51, 4  ;;  %v2882_v40 = vsel %vm279_vm3, %v2880_v21, %v2881_v36 }
 0x207   :  { %v2925_v50 = vrot.slane %v5628_v9, 6  ;;  %v2869_v55 = vsel %vm262_vm2, %v2866_v49, %v2868_v35  ;;  %v2913_v29 = vrot.slane %v2906_v45, 5  ;;  %v2884_v2 = vsel %vm279_vm3, %v2881_v36, %v2883_v33 }
 0x208   :  { %v2842_v31 = vadd.f32 %v2840_v19, %v2832_v13  ;;  %v2873_v63 = vadd.f32 %v2869_v55, %v2858_v18  ;;  %v5655_v30 = vstv %s5602_s28  ;;  %v2899_v16 = vsel %vm296_vm4, %v2896_v1, %v2898_v22 }
 0x209   :  { %v2928_v44 = vrot.slane %v2921_v7, 6  ;;  %v5661_v23 = vstv %s5606_s29  ;;  %v5664_v49 = vstv %s5615_s30  ;;  %v5667_v28 = vstv %s5621_s1 }
 0x20a   :  { %v2857_v42 = vadd.f32 %v2852_v8, %v2842_v31  ;;  %v2888_v59 = vadd.f32 %v2884_v2, %v2873_v63  ;;  %v5670_v3 = vstv %s5630_s3  ;;  %v2914_v20 = vsel %vm313_vm5, %v2911_v47, %v2913_v29  ;;  %v1513_v8 = vpop.permute.xlu0 %1512 }
 0x20b   :  { %v5676_v36 = vstv %s5634_s4  ;;  %v1490_v56 = vadd.f32 %v5551_v14, %v5564_v5  ;;  %v1501_v57 = vsel %vm330_vm6, %v1499_v11, %v1500_v17  ;;  %v1515_v52 = vmul.f32 %v5655_v30, %v1509_v32 }
 0x20c   :  { %v2872_v12 = vadd.f32 %v2867_v46, %v2857_v42  ;;  %v2903_v41 = vadd.f32 %v2899_v16, %v2888_v59  ;;  %v1520_v25 = vmul.f32 %v5661_v23, %v1509_v32  ;;  %v1536_v19 = vmul.f32 %v5664_v49, %v1509_v32 }
 0x20d   :  { %v1506_v4 = vadd.f32 %v1501_v57, %v1490_v56  ;;  %v1552_v39 = vmul.f32 %v5667_v28, %v1509_v32  ;;  %v5690_v14 = vmul.f32 %v5670_v3, %v1509_v32  ;;  %v2897_v6 = vsel %vm296_vm4, %v2895_v26, %v2896_v1 }
 0x20e   :  { %v2887_v5 = vadd.f32 %v2882_v40, %v2872_v12  ;;  %v2918_v11 = vadd.f32 %v2914_v20, %v2903_v41  ;;  %v5696_v27 = vmul.f32 %v5676_v36, %v1509_v32  ;;  %v5701_v46 = vsel %vm313_vm5, %v2910_v0, %v2911_v47  ;;  %v1511_v0 = vpop.permute.xlu1 %1510 }
 0x20f   :  { %v2929_v21 = vsel %vm330_vm6, %v2926_v34, %v2928_v44  ;;  %v5707_v48 = vstv %s5649_s5  ;;  %v1526_v10 = vrot.slane %v1520_v25, 1  ;;  %v1517_v53 = vadd.f32 %v1515_v52, %v1506_v4 }
 0x210   :  { %v1542_v24 = vrot.slane %v1536_v19, 2  ;;  %v1558_v1 = vrot.slane %v1552_v39, 3  ;;  %v1574_v62 = vrot.slane %v5690_v14, 4  ;;  %v5710_v26 = vadd.f32 %v2897_v6, %v2887_v5 }
 0x211   :  { %v1522_v51 = vmul.f32 %v5661_v23, %v1513_v8  ;;  %v1538_v37 = vmul.f32 %v5664_v49, %v1513_v8  ;;  %v1554_v47 = vmul.f32 %v5667_v28, %v1513_v8  ;;  %v2933_v43 = vadd.f32 %v2929_v21, %v2918_v11 }
 0x212   :  { %v1590_v35 = vrot.slane %v5696_v27, 5  ;;  %v5717_v33 = vmul.f32 %v5707_v48, %v1509_v32  ;;  %v1491_v45 = vadd.f32 %v5569_v60, %v5586_v38  ;;  %v1570_v18 = vmul.f32 %v5670_v3, %v1513_v8  ;;  %v2937_v32 = vpop.permute.xlu0 %2936  ;;  %v2935_v6 = vpop.permute.xlu1 %2934 }
 0x213   :  { %v1529_v13 = vrot.slane %v1522_v51, 1  ;;  %v1586_v22 = vmul.f32 %v5676_v36, %v1513_v8  ;;  %v5724_v7 = vmul.f32 %v5707_v48, %v1513_v8  ;;  %v1545_v40 = vrot.slane %v1538_v37, 2 }
 0x214   :  { %v1561_v55 = vrot.slane %v1554_v47, 3  ;;  %v1503_v29 = vsel %vm330_vm6, %v1500_v17, %v1502_v58  ;;  %v1516_v31 = vmul.f32 %v5655_v30, %v1511_v0  ;;  %v1521_v60 = vmul.f32 %v5661_v23, %v1511_v0 }
 0x215   :  { %v1507_v63 = vadd.f32 %v1503_v29, %v1491_v45  ;;  %v1537_v38 = vmul.f32 %v5664_v49, %v1511_v0  ;;  %v1553_v2 = vmul.f32 %v5667_v28, %v1511_v0  ;;  %v1569_v16 = vmul.f32 %v5670_v3, %v1511_v0 }
 0x216   :  { %v1585_v44 = vmul.f32 %v5676_v36, %v1511_v0  ;;  %v5738_v54 = vmul.f32 %v5707_v48, %v1511_v0  ;;  %v2941_v15 = vmul.f32 %v2937_v32, %v5655_v30  ;;  %v1527_v17 = vrot.slane %v1521_v60, 1  ;;  %v2939_v60 = vpop.permute.xlu1 %2938 }
 0x217   :  { %v1518_v58 = vadd.f32 %v1516_v31, %v1507_v63  ;;  %v1543_v42 = vrot.slane %v1537_v38, 2  ;;  %v1559_v59 = vrot.slane %v1553_v2, 3  ;;  %v1606_v20 = vrot.slane %v5717_v33, 6 }
 0x218   :  { %v1577_v56 = vrot.slane %v1570_v18, 4  ;;  %v1593_v57 = vrot.slane %v1586_v22, 5  ;;  %v1609_v12 = vrot.slane %v5724_v7, 6  ;;  %v1528_v41 = vsel %vm245_vm1, %v1526_v10, %v1527_v17 }
 0x219   :  { %v1530_v52 = vsel %vm245_vm1, %v1527_v17, %v1529_v13  ;;  %v1575_v25 = vrot.slane %v1569_v16, 4  ;;  %v1591_v4 = vrot.slane %v1585_v44, 5  ;;  %v1533_v19 = vadd.f32 %v1528_v41, %v1517_v53 }
 0x21a   :  { %v1534_v39 = vadd.f32 %v1530_v52, %v1518_v58  ;;  %v1607_v14 = vrot.slane %v5738_v54, 6  ;;  %v5746_v5 = vadd.f32 %v2941_v15, %v2933_v43  ;;  %v1544_v11 = vsel %vm262_vm2, %v1542_v24, %v1543_v42 }
 0x21b   :  { %v1546_v27 = vsel %vm262_vm2, %v1543_v42, %v1545_v40  ;;  %v1560_v8 = vsel %vm279_vm3, %v1558_v1, %v1559_v59  ;;  %v1562_v21 = vsel %vm279_vm3, %v1559_v59, %v1561_v55  ;;  %v1549_v10 = vadd.f32 %v1544_v11, %v1533_v19 }
 0x21c   :  { %v1550_v51 = vadd.f32 %v1546_v27, %v1534_v39  ;;  %v2945_v37 = vmul.f32 %v2937_v32, %v5661_v23  ;;  %v5754_v53 = vmul.f32 %v2937_v32, %v5664_v49  ;;  %v1576_v47 = vsel %vm296_vm4, %v1574_v62, %v1575_v25 }
 0x21d   :  { %v1578_v0 = vsel %vm296_vm4, %v1575_v25, %v1577_v56  ;;  %v5759_v43 = vmul.f32 %v2937_v32, %v5667_v28  ;;  %v5762_v24 = vmul.f32 %v2937_v32, %v5670_v3  ;;  %v5765_v1 = vsel %vm313_vm5, %v1590_v35, %v1591_v4 }
 0x21e   :  { %v5768_v45 = vsel %vm313_vm5, %v1591_v4, %v1593_v57  ;;  %v5771_v13 = vmul.f32 %v2937_v32, %v5676_v36  ;;  %v5774_v18 = vmul.f32 %v2937_v32, %v5707_v48  ;;  %v1565_v62 = vadd.f32 %v1560_v8, %v1549_v10 }
 0x21f   :  { %v1566_v22 = vadd.f32 %v1562_v21, %v1550_v51  ;;  %v2951_v40 = vrot.slane %v2945_v37, 1  ;;  %v2966_v55 = vrot.slane %v5754_v53, 2  ;;  %v2981_v29 = vrot.slane %v5759_v43, 3  ;;  %v1616_v51 = vpop.permute.xlu0 %1615 }
 0x220   :  { %v2996_v35 = vrot.slane %v5762_v24, 4  ;;  %v2927_v31 = vsel %vm330_vm6, %v2925_v50, %v2926_v34  ;;  %v2917_v63 = vadd.f32 %v5701_v46, %v5710_v26  ;;  %v2940_v38 = vmul.f32 %v2935_v6, %v5655_v30 }
 0x221   :  { %v2944_v2 = vmul.f32 %v2935_v6, %v5661_v23  ;;  %v2959_v32 = vmul.f32 %v2935_v6, %v5664_v49  ;;  %v2974_v16 = vmul.f32 %v2935_v6, %v5667_v28  ;;  %v3011_v61 = vrot.slane %v5771_v13, 5 }
 0x222   :  { %v2932_v9 = vadd.f32 %v2927_v31, %v2917_v63  ;;  %v2989_v34 = vmul.f32 %v2935_v6, %v5670_v3  ;;  %v3004_v50 = vmul.f32 %v2935_v6, %v5676_v36  ;;  %v3026_v46 = vrot.slane %v5774_v18, 6 }
 0x223   :  { %v2950_v30 = vrot.slane %v2944_v2, 1  ;;  %v2965_v26 = vrot.slane %v2959_v32, 2  ;;  %v2946_v44 = vmul.f32 %v2939_v60, %v5661_v23  ;;  %v1581_v15 = vadd.f32 %v1576_v47, %v1565_v62 }
 0x224   :  { %v2942_v58 = vadd.f32 %v2940_v38, %v2932_v9  ;;  %v2980_v17 = vrot.slane %v2974_v16, 3  ;;  %v5806_v42 = vmul.f32 %v2935_v6, %v5707_v48  ;;  %v2995_v56 = vrot.slane %v2989_v34, 4  ;;  %v1620_v34 = vpop.permute.xlu0 %1619 }
 0x225   :  { %v2952_v59 = vsel %vm245_vm1, %v2950_v30, %v2951_v40  ;;  %v3010_v57 = vrot.slane %v3004_v50, 5  ;;  %v2953_v41 = vrot.slane %v2946_v44, 1  ;;  %v1582_v52 = vadd.f32 %v1578_v0, %v1566_v22 }
 0x226   :  { %v2957_v25 = vadd.f32 %v2952_v59, %v2942_v58  ;;  %v2967_v23 = vsel %vm262_vm2, %v2965_v26, %v2966_v55  ;;  %v2961_v4 = vmul.f32 %v2939_v60, %v5664_v49  ;;  %v2976_v39 = vmul.f32 %v2939_v60, %v5667_v28 }
 0x227   :  { %v2954_v19 = vsel %vm245_vm1, %v2951_v40, %v2953_v41  ;;  %v2991_v6 = vmul.f32 %v2939_v60, %v5670_v3  ;;  %v3006_v11 = vmul.f32 %v2939_v60, %v5676_v36  ;;  %v3025_v8 = vrot.slane %v5806_v42, 6  ;;  %v1618_v41 = vpop.permute.xlu1 %1617 }
 0x228   :  { %v2972_v27 = vadd.f32 %v2967_v23, %v2957_v25  ;;  %v2958_v21 = vadd.f32 %v2954_v19, %v5746_v5  ;;  %v2968_v10 = vrot.slane %v2961_v4, 2  ;;  %v2982_v49 = vsel %vm279_vm3, %v2980_v17, %v2981_v29 }
 0x229   :  { %v2997_v28 = vsel %vm296_vm4, %v2995_v56, %v2996_v35  ;;  %v5828_v3 = vsel %vm313_vm5, %v3010_v57, %v3011_v61  ;;  %v2983_v36 = vrot.slane %v2976_v39, 3  ;;  %v2998_v37 = vrot.slane %v2991_v6, 4 }
 0x22a   :  { %v2969_v5 = vsel %vm262_vm2, %v2966_v55, %v2968_v10  ;;  %v3013_v53 = vrot.slane %v3006_v11, 5  ;;  %v5832_v47 = vmul.f32 %v2939_v60, %v5707_v48  ;;  %v2987_v0 = vadd.f32 %v2982_v49, %v2972_v27 }
 0x22b   :  { %v2973_v43 = vadd.f32 %v2969_v5, %v2958_v21  ;;  %v5835_v62 = vstv %s5777_s19  ;;  %v5838_v22 = vstv %s5788_s20  ;;  %v2984_v40 = vsel %vm279_vm3, %v2981_v29, %v2983_v36 }
 0x22c   :  { %v5842_v31 = vstv %s5794_s21  ;;  %v5845_v63 = vstv %s5799_s22  ;;  %v5848_v38 = vstv %s5803_s6  ;;  %v5851_v2 = vstv %s5808_s7 }
 0x22d   :  { %v2988_v55 = vadd.f32 %v2984_v40, %v2973_v43  ;;  %v5854_v32 = vstv %s5811_s8  ;;  %v1597_v48 = vadd.f32 %v5765_v1, %v1581_v15  ;;  %v1608_v60 = vsel %vm330_vm6, %v1606_v20, %v1607_v14 }
 0x22e   :  { %v1622_v29 = vmul.f32 %v5835_v62, %v1616_v51  ;;  %v1627_v16 = vmul.f32 %v5838_v22, %v1616_v51  ;;  %v5865_v9 = vmul.f32 %v5842_v31, %v1616_v51  ;;  %v3028_v50 = vrot.slane %v5832_v47, 6 }
 0x22f   :  { %v1613_v30 = vadd.f32 %v1608_v60, %v1597_v48  ;;  %v1659_v26 = vmul.f32 %v5845_v63, %v1616_v51  ;;  %v5870_v1 = vmul.f32 %v5848_v38, %v1616_v51  ;;  %v2999_v33 = vsel %vm296_vm4, %v2996_v35, %v2998_v37 }
 0x230   :  { %v3014_v20 = vsel %vm313_vm5, %v3011_v61, %v3013_v53  ;;  %v5879_v44 = vmul.f32 %v5851_v2, %v1616_v51  ;;  %v5882_v15 = vmul.f32 %v5854_v32, %v1616_v51  ;;  %v5884_v58 = vadd.f32 %v2997_v28, %v2987_v0 }
 0x231   :  { %v3003_v17 = vadd.f32 %v2999_v33, %v2988_v55  ;;  %v1633_v59 = vrot.slane %v1627_v16, 1  ;;  %v1629_v56 = vmul.f32 %v5838_v22, %v1620_v34  ;;  %v1624_v57 = vadd.f32 %v1622_v29, %v1613_v30  ;;  %v3037_v55 = vpop.permute.xlu0 %3036 }
 0x232   :  { %v1649_v24 = vrot.slane %v5865_v9, 2  ;;  %v1665_v35 = vrot.slane %v1659_v26, 3  ;;  %v1645_v13 = vmul.f32 %v5842_v31, %v1620_v34  ;;  %v1681_v61 = vrot.slane %v5870_v1, 4  ;;  %v3035_v9 = vpop.permute.xlu1 %3034 }
 0x233   :  { %v1697_v25 = vrot.slane %v5879_v44, 5  ;;  %v1713_v23 = vrot.slane %v5882_v15, 6  ;;  %v1661_v4 = vmul.f32 %v5845_v63, %v1620_v34  ;;  %v1636_v19 = vrot.slane %v1629_v56, 1 }
 0x234   :  { %v5894_v39 = vmul.f32 %v5848_v38, %v1620_v34  ;;  %v5897_v6 = vmul.f32 %v5851_v2, %v1620_v34  ;;  %v1598_v11 = vadd.f32 %v5768_v45, %v1582_v52  ;;  %v1652_v27 = vrot.slane %v1645_v13, 2 }
 0x235   :  { %v5901_v21 = vmul.f32 %v5854_v32, %v1620_v34  ;;  %v1610_v10 = vsel %vm330_vm6, %v1607_v14, %v1609_v12  ;;  %v1623_v51 = vmul.f32 %v5835_v62, %v1618_v41  ;;  %v1628_v28 = vmul.f32 %v5838_v22, %v1618_v41 }
 0x236   :  { %v1614_v49 = vadd.f32 %v1610_v10, %v1598_v11  ;;  %v1644_v36 = vmul.f32 %v5842_v31, %v1618_v41  ;;  %v1660_v5 = vmul.f32 %v5845_v63, %v1618_v41  ;;  %v1668_v45 = vrot.slane %v1661_v4, 3 }
 0x237   :  { %v5913_v52 = vmul.f32 %v5848_v38, %v1618_v41  ;;  %v5916_v37 = vmul.f32 %v5851_v2, %v1618_v41  ;;  %v5919_v7 = vmul.f32 %v5854_v32, %v1618_v41  ;;  %v1684_v54 = vrot.slane %v5894_v39, 4 }
 0x238   :  { %v1625_v12 = vadd.f32 %v1623_v51, %v1614_v49  ;;  %v1634_v14 = vrot.slane %v1628_v28, 1  ;;  %v3018_v53 = vadd.f32 %v3014_v20, %v3003_v17  ;;  %v1700_v47 = vrot.slane %v5897_v6, 5 }
 0x239   :  { %v1716_v0 = vrot.slane %v5901_v21, 6  ;;  %v1650_v43 = vrot.slane %v1644_v36, 2  ;;  %v1666_v40 = vrot.slane %v1660_v5, 3  ;;  %v1682_v29 = vrot.slane %v5913_v52, 4 }
 0x23a   :  { %v1635_v48 = vsel %vm245_vm1, %v1633_v59, %v1634_v14  ;;  %v1637_v60 = vsel %vm245_vm1, %v1634_v14, %v1636_v19  ;;  %v1698_v16 = vrot.slane %v5916_v37, 5  ;;  %v1714_v26 = vrot.slane %v5919_v7, 6 }
 0x23b   :  { %v1640_v34 = vadd.f32 %v1635_v48, %v1624_v57  ;;  %v1641_v30 = vadd.f32 %v1637_v60, %v1625_v12  ;;  %v3029_v33 = vsel %vm330_vm6, %v3026_v46, %v3028_v50  ;;  %v3041_v17 = vmul.f32 %v3037_v55, %v5835_v62 }
 0x23c   :  { %v3033_v20 = vadd.f32 %v3029_v33, %v3018_v53  ;;  %v3045_v59 = vmul.f32 %v3037_v55, %v5838_v22  ;;  %v3060_v56 = vmul.f32 %v3037_v55, %v5842_v31  ;;  %v1651_v13 = vsel %vm262_vm2, %v1649_v24, %v1650_v43 }
 0x23d   :  { %v1653_v41 = vsel %vm262_vm2, %v1650_v43, %v1652_v27  ;;  %v1667_v57 = vsel %vm279_vm3, %v1665_v35, %v1666_v40  ;;  %v1669_v4 = vsel %vm279_vm3, %v1666_v40, %v1668_v45  ;;  %v1656_v19 = vadd.f32 %v1651_v13, %v1640_v34  ;;  %v3039_v45 = vpop.permute.xlu1 %3038 }
 0x23e   :  { %v1657_v11 = vadd.f32 %v1653_v41, %v1641_v30  ;;  %v3075_v10 = vmul.f32 %v3037_v55, %v5845_v63  ;;  %v5941_v50 = vmul.f32 %v3037_v55, %v5848_v38  ;;  %v3043_v51 = vadd.f32 %v3041_v17, %v3033_v20 }
 0x23f   :  { %v3051_v49 = vrot.slane %v3045_v59, 1  ;;  %v5944_v28 = vmul.f32 %v3037_v55, %v5851_v2  ;;  %v5947_v24 = vmul.f32 %v3037_v55, %v5854_v32  ;;  %v3066_v27 = vrot.slane %v3060_v56, 2 }
 0x240   :  { %v3017_v35 = vadd.f32 %v5828_v3, %v5884_v58  ;;  %v3040_v36 = vmul.f32 %v3035_v9, %v5835_v62  ;;  %v3044_v5 = vmul.f32 %v3035_v9, %v5838_v22  ;;  %v3027_v12 = vsel %vm330_vm6, %v3025_v8, %v3026_v46 }
 0x241   :  { %v3059_v14 = vmul.f32 %v3035_v9, %v5842_v31  ;;  %v3074_v53 = vmul.f32 %v3035_v9, %v5845_v63  ;;  %v3089_v43 = vmul.f32 %v3035_v9, %v5848_v38  ;;  %v3081_v40 = vrot.slane %v3075_v10, 3 }
 0x242   :  { %v3032_v55 = vadd.f32 %v3027_v12, %v3017_v35  ;;  %v3050_v3 = vrot.slane %v3044_v5, 1  ;;  %v3104_v62 = vmul.f32 %v3035_v9, %v5851_v2  ;;  %v3096_v58 = vrot.slane %v5941_v50, 4 }
 0x243   :  { %v3111_v48 = vrot.slane %v5944_v28, 5  ;;  %v3126_v18 = vrot.slane %v5947_v24, 6  ;;  %v3046_v42 = vmul.f32 %v3039_v45, %v5838_v22  ;;  %v3065_v60 = vrot.slane %v3059_v14, 2 }
 0x244   :  { %v3042_v46 = vadd.f32 %v3040_v36, %v3032_v55  ;;  %v3052_v8 = vsel %vm245_vm1, %v3050_v3, %v3051_v49  ;;  %v3119_v34 = vmul.f32 %v3035_v9, %v5854_v32  ;;  %v3080_v30 = vrot.slane %v3074_v53, 3 }
 0x245   :  { %v3095_v33 = vrot.slane %v3089_v43, 4  ;;  %v3053_v20 = vrot.slane %v3046_v42, 1  ;;  %v3061_v17 = vmul.f32 %v3039_v45, %v5842_v31  ;;  %v3110_v56 = vrot.slane %v3104_v62, 5 }
 0x246   :  { %v3057_v59 = vadd.f32 %v3052_v8, %v3042_v46  ;;  %v3076_v13 = vmul.f32 %v3039_v45, %v5845_v63  ;;  %v3091_v41 = vmul.f32 %v3039_v45, %v5848_v38  ;;  %v3106_v50 = vmul.f32 %v3039_v45, %v5851_v2 }
 0x247   :  { %v3054_v10 = vsel %vm245_vm1, %v3051_v49, %v3053_v20  ;;  %v3068_v22 = vrot.slane %v3061_v17, 2  ;;  %v1672_v28 = vadd.f32 %v1667_v57, %v1656_v19  ;;  %v3067_v24 = vsel %vm262_vm2, %v3065_v60, %v3066_v27 }
 0x248   :  { %v3058_v9 = vadd.f32 %v3054_v10, %v3043_v51  ;;  %v3083_v35 = vrot.slane %v3076_v13, 3  ;;  %v3121_v36 = vmul.f32 %v3039_v45, %v5854_v32  ;;  %v3072_v5 = vadd.f32 %v3067_v24, %v3057_v59 }
 0x249   :  { %v3069_v31 = vsel %vm262_vm2, %v3066_v27, %v3068_v22  ;;  %v3098_v12 = vrot.slane %v3091_v41, 4  ;;  %v1673_v14 = vadd.f32 %v1669_v4, %v1657_v11  ;;  %v3082_v63 = vsel %vm279_vm3, %v3080_v30, %v3081_v40 }
 0x24a   :  { %v3125_v38 = vrot.slane %v3119_v34, 6  ;;  %v3073_v53 = vadd.f32 %v3069_v31, %v3058_v9  ;;  %v1683_v2 = vsel %vm296_vm4, %v1681_v61, %v1682_v29  ;;  %v3084_v57 = vsel %vm279_vm3, %v3081_v40, %v3083_v35 }
 0x24b   :  { %v3113_v19 = vrot.slane %v3106_v50, 5  ;;  %v1685_v32 = vsel %vm296_vm4, %v1682_v29, %v1684_v54  ;;  %v1688_v4 = vadd.f32 %v1683_v2, %v1672_v28  ;;  %v3128_v51 = vrot.slane %v3121_v36, 6 }
 0x24c   :  { %v3088_v11 = vadd.f32 %v3084_v57, %v3073_v53  ;;  %v1689_v49 = vadd.f32 %v1685_v32, %v1673_v14  ;;  %v1699_v1 = vsel %vm313_vm5, %v1697_v25, %v1698_v16  ;;  %v3099_v61 = vsel %vm296_vm4, %v3096_v58, %v3098_v12 }
 0x24d   :  { %v1701_v39 = vsel %vm313_vm5, %v1698_v16, %v1700_v47  ;;  %v1704_v52 = vadd.f32 %v1699_v1, %v1688_v4  ;;  %v3087_v54 = vadd.f32 %v3082_v63, %v3072_v5  ;;  %v1715_v44 = vsel %vm330_vm6, %v1713_v23, %v1714_v26 }
 0x24e   :  { %v3103_v29 = vadd.f32 %v3099_v61, %v3088_v11  ;;  %v1705_v27 = vadd.f32 %v1701_v39, %v1689_v49  ;;  %v3097_v25 = vsel %vm296_vm4, %v3095_v33, %v3096_v58  ;;  %v3114_v45 = vsel %vm313_vm5, %v3111_v48, %v3113_v19 }
 0x24f   :  { %v1717_v6 = vsel %vm330_vm6, %v1714_v26, %v1716_v0  ;;  %v1720_v37 = vadd.f32 %v1715_v44, %v1704_v52  ;;  %v3102_v47 = vadd.f32 %v3097_v25, %v3087_v54  ;;  %v3112_v40 = vsel %vm313_vm5, %v3110_v56, %v3111_v48 }
 0x250   :  { %v3118_v16 = vadd.f32 %v3114_v45, %v3103_v29  ;;  %v1721_v43 = vadd.f32 %v1717_v6, %v1705_v27  ;;  %v3129_v15 = vsel %vm330_vm6, %v3126_v18, %v3128_v51  ;;  %v3127_v58 = vsel %vm330_vm6, %v3125_v38, %v3126_v18 }
 0x251   :  { %v1722_v55 = vsub.f32 0.0, %v1720_v37  ;;  %v3117_v23 = vadd.f32 %v3112_v40, %v3102_v47 }
 0x252   :  { %v3133_v3 = vadd.f32 %v3129_v15, %v3118_v16  ;;  %v1723_v62 = vsub.f32 0.0, %v1721_v43 }
 0x253   :  { %v1724_v42 = vmul.f32 1.442695, %v1722_v55  ;;  %v3132_v21 = vadd.f32 %v3127_v58, %v3117_v23 }
 0x254   :  { %v1726_v46 = vmul.f32 1.442695, %v1723_v62  ;;  %v3135_v7 = vsub.f32 0.0, %v3133_v3 }
 0x255   :  { %3276 = vpow2.f32 %v1724_v42  ;;  %v3134_v0 = vsub.f32 0.0, %v3132_v21 }
 0x256   :  { %3278 = vpow2.f32 %v1726_v46  ;;  %v3138_v26 = vmul.f32 1.442695, %v3135_v7 }
 0x257   :  { %v3136_v8 = vmul.f32 1.442695, %v3134_v0 }
 0x258   :  { %3280 = vpow2.f32 %v3138_v26 }
 0x259   :  { %3282 = vpow2.f32 %v3136_v8 }
 0x262   :  { %v3277_v48 = vpop.eup %3276 }
 0x263   :  { %v3279_v60 = vpop.eup %3278  ;;  %v1728_v34 = vadd.f32 1.0, %v3277_v48 }
 0x264   :  { %v1729_v30 = vadd.f32 1.0, %v3279_v60 }
 0x265   :  { %v3281_v33 = vpop.eup %3280  ;;  %3284 = vrcp.f32 %v1728_v34 }
 0x266   :  { %v3283_v20 = vpop.eup %3282  ;;  %3286 = vrcp.f32 %v1729_v30  ;;  %v3141_v18 = vadd.f32 1.0, %v3281_v33 }
 0x267   :  { %v3140_v17 = vadd.f32 1.0, %v3283_v20 }
 0x268   :  { %3288 = vrcp.f32 %v3141_v18 }
 0x269   :  { %3290 = vrcp.f32 %v3140_v17 }
 0x272   :  { %v3285_v59 = vpop.eup %3284 }
 0x273   :  { %v3287_v56 = vpop.eup %3286  ;;  %1734 = vst [vmem:[#allocation8] sm:$0xff] %v3285_v59 }
 0x274   :  { %1735 = vst [vmem:[#allocation8 + $0x8] sm:$0xff] %v3287_v56 }
 0x275   :  { %v3289_v13 = vpop.eup %3288 }
 0x276   :  { %v3291_v41 = vpop.eup %3290  ;;  %3148 = vst [vmem:[#allocation8 + $0x18] sm:$0xff] %v3289_v13 }
 0x277   :  { %3147 = vst [vmem:[#allocation8 + $0x10] sm:$0xff] %v3291_v41 }
 0x278   :  { %3334 = shalt.err (!%p3331_p9)
}
 0x279   :  { %3160 = dma.vmem_to_hbm [thread:$0]  %s3155_s10, 512, %s6022_s2, [#allocation5], %s3351_s15, %s3351_s15, %s3352_s16  }
 0x27a   :  { %3347 = dma.done.wait [#allocation5], 512  }
 0x27b   :  { %3348 = vsyncadd [#allocation5], 4294966784 }
 0x27c   :  { %3164 = vsyncpa [#allocation4], 1 }
 0x27d   :  { %3165 = vsyncpa [#allocation5], 1 }
 0x27e   :  { %3166 = vsyncpa [#allocation6], 1 }

</bundles_post_ra>
